<compile_context>
chip_gen: v6e
topology: v6e:2x2x1
jax: 0.10.0
libtpu: 0.0.40
codegen_flags: <defaults>
</compile_context>

<pallas_src>
import functools

import numpy as np
import jax
import jax.numpy as jnp
from jax.experimental import pallas as pl
from jax.experimental.pallas import tpu as pltpu


# ----------------------------------------------------------------------------- kernel
def _head_kernel(x_ref, t1_ref, t2_ref, ah_ref, awt_ref, o_ref, xp_ref, h1p_ref):
    """Fused head for one image:
       pad -> conv1(5x5)+bias+ReLU -> pad -> conv2(5x5)+bias -> sigmoid -> bicubic.

    x_ref  : (1, Cin, H, W)            latent map for this grid step (one image)
    t1_ref : (5, R1, S1)  banded conv1 weights; R1 = Cmid*(Ho1+2), S1 = Cin*(H+2)+1
    t2_ref : (5, Ho2, S2) banded conv2 weights; S2 = R1+1
    ah_ref : (OH, Ho2)    bicubic row-interp matrix
    awt_ref: (Wo2, OW)    bicubic col-interp matrix (transposed)
    o_ref  : (1, OH, OW)
    xp_ref : (S1, W+2)    scratch: padded conv1 input, channels stacked on sublanes,
                          last row == 1 (affine bias trick)
    h1p_ref: (S2, Wo1+2)  scratch: padded conv1 output (conv2 input), last row == 1
    """
    f32 = jnp.float32
    _, cin, H, W = x_ref.shape
    KW = t1_ref.shape[0]
    Ho2 = t2_ref.shape[1]
    S1, Wp1 = xp_ref.shape
    S2, Wp2 = h1p_ref.shape
    R1 = S2 - 1
    Hp1 = H + 2
    Wo1 = Wp2 - 2
    Wo2 = Wo1 - 2

    # ---- build zero-padded conv1 input in VMEM (replaces jnp.pad round trip) ----
    xp_ref[...] = jnp.zeros(xp_ref.shape, f32)
    xp_ref[S1 - 1:S1, :] = jnp.ones((1, Wp1), f32)          # "ones" row -> bias column
    for c in range(cin):
        r0 = c * Hp1 + 1
        xp_ref[r0:r0 + H, 1:1 + W] = x_ref[0, c]

    # ---- conv1 + bias as 5 MXU matmuls against banded weight matrices ----
    xp = xp_ref[...]
    acc1 = jnp.zeros((R1, Wo1), f32)
    for kx in range(KW):
        prod = jnp.dot(t1_ref[kx], xp, preferred_element_type=f32)   # (R1, Wp1)
        acc1 = acc1 + prod[:, kx:kx + Wo1]
    h1 = jnp.maximum(acc1, 0.0)                                      # ReLU

    # ---- stash conv1 output zero-padded (conv2 input), keep in VMEM ----
    h1p_ref[...] = jnp.zeros(h1p_ref.shape, f32)
    h1p_ref[S2 - 1:S2, :] = jnp.ones((1, Wp2), f32)
    h1p_ref[0:R1, 1:1 + Wo1] = h1

    # ---- conv2 + bias -> sigmoid ----
    h1p = h1p_ref[...]
    acc2 = jnp.zeros((Ho2, Wo2), f32)
    for kx in range(KW):
        prod = jnp.dot(t2_ref[kx], h1p, preferred_element_type=f32)  # (Ho2, Wp2)
        acc2 = acc2 + prod[:, kx:kx + Wo2]
    p = 1.0 / (1.0 + jnp.exp(-acc2))                                 # sigmoid, (Ho2, Wo2)

    # ---- bicubic resize: two MXU matmuls ----
    tmp = jnp.dot(ah_ref[...], p, preferred_element_type=f32)        # (OH, Wo2)
    o_ref[0] = jnp.dot(tmp, awt_ref[...], preferred_element_type=f32).astype(o_ref.dtype)


# ----------------------------------------------------------------------------- helpers
@functools.lru_cache(maxsize=None)
def _bicubic_matrix(in_size, out_size, a=-0.75):
    """(out, in) interpolation matrix reproducing torch.nn.functional.interpolate
    mode='bicubic', align_corners=False (cubic kernel a=-0.75, border-clamped taps)."""
    def cc1(x):  # |x| <= 1
        return ((a + 2) * x - (a + 3)) * x * x + 1
    def cc2(x):  # 1 < |x| < 2
        return ((a * x - 5 * a) * x + 8 * a) * x - 4 * a

    m = np.zeros((out_size, in_size), np.float64)
    scale = in_size / out_size
    for i in range(out_size):
        real = (i + 0.5) * scale - 0.5
        i0 = int(np.floor(real))
        t = real - i0
        ws = (cc2(t + 1.0), cc1(t), cc1(1.0 - t), cc2(2.0 - t))
        for k in range(4):
            idx = min(max(i0 - 1 + k, 0), in_size - 1)
            m[i, idx] += ws[k]
    return m


def _build_conv1_mats(w1_oihw, b1, H, W):
    """Banded matrices T (5, R1, S1) with T[kx] @ XP giving conv1 row-contributions
    (channels of the padded input stacked along the contraction axis; last column of
    XP is all-ones so the bias rides in column S1-1 of T[0])."""
    Cmid, Cin, KH, KW = w1_oihw.shape
    Ho1 = H + 2 - KH + 1                      # = H - 2
    R1 = Cmid * (Ho1 + 2)
    S1 = Cin * (H + 2) + 1
    c1, c0, ky, kx, h = np.meshgrid(np.arange(Cmid), np.arange(Cin),
                                    np.arange(KH), np.arange(KW),
                                    np.arange(Ho1), indexing="ij")
    r = c1 * (Ho1 + 2) + 1 + h                # padded output row (channel-stacked)
    s = c0 * (H + 2) + h + ky                 # padded input row (channel-stacked)
    vals = jnp.broadcast_to(w1_oihw[:, :, :, :, None], c1.shape).reshape(-1)
    T = jnp.zeros((KW, R1, S1), jnp.float32)
    T = T.at[kx.reshape(-1), r.reshape(-1), s.reshape(-1)].set(vals.astype(jnp.float32))
    rb = (np.arange(Cmid)[:, None] * (Ho1 + 2) + 1 + np.arange(Ho1)[None, :]).reshape(-1)
    T = T.at[0, rb, S1 - 1].set(jnp.repeat(b1.astype(jnp.float32), Ho1))
    return T


def _build_conv2_mats(w2_oihw, b2, Ho1):
    """Banded matrices T (5, Ho2, S2) acting on the padded, channel-stacked conv1
    output (whose last row is all-ones, carrying the conv2 bias)."""
    _, Cmid, KH, KW = w2_oihw.shape
    Ho2 = Ho1 + 2 - KH + 1                    # = Ho1 - 2
    S2 = Cmid * (Ho1 + 2) + 1
    c1, ky, kx, h = np.meshgrid(np.arange(Cmid), np.arange(KH),
                                np.arange(KW), np.arange(Ho2), indexing="ij")
    s = c1 * (Ho1 + 2) + h + ky
    vals = jnp.broadcast_to(w2_oihw[0][:, :, :, None], c1.shape).reshape(-1)
    T = jnp.zeros((KW, Ho2, S2), jnp.float32)
    T = T.at[kx.reshape(-1), h.reshape(-1), s.reshape(-1)].set(vals.astype(jnp.float32))
    T = T.at[0, np.arange(Ho2), S2 - 1].set(b2[0].astype(jnp.float32))
    return T


# ----------------------------------------------------------------------------- wrapper
@functools.partial(jax.jit, static_argnames=("out_size",))
def sd_head_forward(model_pred_nchw, w1_oihw, b1, w2_oihw, b2, *, out_size):
    """Pallas version of the tail of SDInference.forward:
    head(Conv2d(4,16,5,1,1) -> ReLU -> Conv2d(16,1,5,1,1)) -> sigmoid -> bicubic resize.
    Takes / returns NCHW tensors to match the PyTorch module."""
    N, Cin, H, W = model_pred_nchw.shape
    Cmid = w1_oihw.shape[0]
    oh, ow = out_size
    Ho1, Wo1 = H - 2, W - 2
    Ho2, Wo2 = H - 4, W - 4

    t1 = _build_conv1_mats(w1_oihw, b1, H, W)                        # (5, R1, S1)
    t2 = _build_conv2_mats(w2_oihw, b2, Ho1)                         # (5, Ho2, S2)
    ah = jnp.asarray(_bicubic_matrix(Ho2, oh), jnp.float32)          # (oh, Ho2)
    awt = jnp.asarray(_bicubic_matrix(Wo2, ow), jnp.float32).T       # (Wo2, ow)

    S1 = Cin * (H + 2) + 1
    S2 = Cmid * (Ho1 + 2) + 1

    out = pl.pallas_call(
        _head_kernel,
        out_shape=jax.ShapeDtypeStruct((N, oh, ow), jnp.float32),
        grid_spec=pltpu.PrefetchScalarGridSpec(
            num_scalar_prefetch=0,
            grid=(N,),
            in_specs=[
                pl.BlockSpec((1, Cin, H, W), lambda n: (n, 0, 0, 0)),
                pl.BlockSpec(t1.shape, lambda n: (0, 0, 0)),
                pl.BlockSpec(t2.shape, lambda n: (0, 0, 0)),
                pl.BlockSpec(ah.shape, lambda n: (0, 0)),
                pl.BlockSpec(awt.shape, lambda n: (0, 0)),
            ],
            out_specs=pl.BlockSpec((1, oh, ow), lambda n: (n, 0, 0)),
            scratch_shapes=[
                pltpu.VMEM((S1, W + 2), jnp.float32),      # padded conv1 input (+ones row)
                pltpu.VMEM((S2, Wo1 + 2), jnp.float32),    # padded conv1 output (+ones row)
            ],
        ),
        compiler_params=pltpu.CompilerParams(
            dimension_semantics=("parallel",)),            # v7x: split batch over 2 TCs
    )(model_pred_nchw.astype(jnp.float32), t1, t2, ah, awt)

    return out[:, None, :, :]                              # NCHW: (N, 1, oh, ow)


# ----------------------------------------------------------------------------- reference
def reference_forward(model_pred_nchw, w1_oihw, b1, w2_oihw, b2, out_size):
    x = jnp.transpose(model_pred_nchw, (0, 2, 3, 1))
    w1 = jnp.transpose(w1_oihw, (2, 3, 1, 0))
    w2 = jnp.transpose(w2_oihw, (2, 3, 1, 0))
    dn = ("NHWC", "HWIO", "NHWC")
    h1 = jax.lax.conv_general_dilated(x, w1, (1, 1), ((1, 1), (1, 1)),
                                      dimension_numbers=dn) + b1
    h1 = jnp.maximum(h1, 0.0)
    h2 = jax.lax.conv_general_dilated(h1, w2, (1, 1), ((1, 1), (1, 1)),
                                      dimension_numbers=dn) + b2
    p = 1.0 / (1.0 + jnp.exp(-h2))
    oh, ow = out_size
    ah = jnp.asarray(_bicubic_matrix(h2.shape[1], oh), jnp.float32)
    aw = jnp.asarray(_bicubic_matrix(h2.shape[2], ow), jnp.float32)
    up = jnp.einsum("oi,nij,pj->nop", ah, p[..., 0], aw)
    return up[:, None, :, :]


# ----------------------------------------------------------------------------- main
if __name__ == "__main__":
    key = jax.random.PRNGKey(0)
    k_x, k_w1, k_b1, k_w2, k_b2 = jax.random.split(key, 5)

    # Synthetic UNet output ("model_pred"): small stand-in for the (1, 4, 64, 64) latent map.
    N, C, H, W = 2, 4, 16, 16
    oh, ow = 32, 32                       # original image size to resize back to
    model_pred = jax.random.normal(k_x, (N, C, H, W), jnp.float32)

    # Deterministic head params (PyTorch Conv2d shapes, uniform(-1/sqrt(fan_in), +)).
    fan1 = 4 * 5 * 5
    w1 = jax.random.uniform(k_w1, (16, 4, 5, 5), jnp.float32,
                            -1 / np.sqrt(fan1), 1 / np.sqrt(fan1))
    b1 = jax.random.uniform(k_b1, (16,), jnp.float32,
                            -1 / np.sqrt(fan1), 1 / np.sqrt(fan1))
    fan2 = 16 * 5 * 5
    w2 = jax.random.uniform(k_w2, (1, 16, 5, 5), jnp.float32,
                            -1 / np.sqrt(fan2), 1 / np.sqrt(fan2))
    b2 = jax.random.uniform(k_b2, (1,), jnp.float32,
                            -1 / np.sqrt(fan2), 1 / np.sqrt(fan2))

    pred = sd_head_forward(model_pred, w1, b1, w2, b2, out_size=(oh, ow))
    pred = jax.block_until_ready(pred)
    assert pred.shape == (N, 1, oh, ow), pred.shape

    ref = jax.block_until_ready(reference_forward(model_pred, w1, b1, w2, b2, (oh, ow)))
    np.testing.assert_allclose(np.asarray(pred), np.asarray(ref), rtol=1e-3, atol=1e-3)

    print("KERNEL_OK")
</pallas_src>

<mosaic_0001>
module attributes {stable_mosaic.version = 11 : i64} {
  func.func @_head_kernel(%arg0: i32, %arg1: memref<1x4x16x16xf32, #tpu.memory_space<vmem>>, %arg2: memref<5x256x73xf32, #tpu.memory_space<vmem>>, %arg3: memref<5x12x257xf32, #tpu.memory_space<vmem>>, %arg4: memref<32x12xf32, #tpu.memory_space<vmem>>, %arg5: memref<12x32xf32, #tpu.memory_space<vmem>>, %arg6: memref<1x32x32xf32, #tpu.memory_space<vmem>>, %arg7: memref<73x18xf32, #tpu.memory_space<vmem>>, %arg8: memref<257x16xf32, #tpu.memory_space<vmem>>) attributes {dimension_semantics = [#tpu.dimension_semantics<parallel>], iteration_bounds = array<i64: 2>, scalar_prefetch = 0 : i64, scratch_operands = 2 : i64, tpu.core_type = #tpu.core_type<tc>, window_params = [{transform_indices = @transform_0, window_bounds = array<i64: 1, 4, 16, 16>}, {pipeline_mode = #tpu.pipeline_mode<synchronous>, transform_indices = @transform_1, window_bounds = array<i64: 5, 256, 73>}, {pipeline_mode = #tpu.pipeline_mode<synchronous>, transform_indices = @transform_2, window_bounds = array<i64: 5, 12, 257>}, {pipeline_mode = #tpu.pipeline_mode<synchronous>, transform_indices = @transform_3, window_bounds = array<i64: 32, 12>}, {pipeline_mode = #tpu.pipeline_mode<synchronous>, transform_indices = @transform_4, window_bounds = array<i64: 12, 32>}, {transform_indices = @transform_5, window_bounds = array<i64: 1, 32, 32>}]} {
    %cst = arith.constant 0.000000e+00 : f32
    %0 = vector.broadcast %cst : f32 to vector<73x18xf32>
    %c0 = arith.constant 0 : index
    %c0_0 = arith.constant 0 : index
    %1 = vector.load %arg7[%c0, %c0_0] : memref<73x18xf32, #tpu.memory_space<vmem>>, vector<73x18xf32>
    tpu.vector_store %arg7[%c0, %c0_0], %0 {strides = array<i32>} : memref<73x18xf32, #tpu.memory_space<vmem>>, vector<73x18xf32>,
    %cst_1 = arith.constant 1.000000e+00 : f32
    %2 = vector.broadcast %cst_1 : f32 to vector<1x18xf32>
    %c72 = arith.constant 72 : index
    %c0_2 = arith.constant 0 : index
    %3 = vector.load %arg7[%c72, %c0_2] : memref<73x18xf32, #tpu.memory_space<vmem>>, vector<1x18xf32>
    tpu.vector_store %arg7[%c72, %c0_2], %2 {strides = array<i32>} : memref<73x18xf32, #tpu.memory_space<vmem>>, vector<1x18xf32>,
    %c0_3 = arith.constant 0 : index
    %c0_4 = arith.constant 0 : index
    %c0_5 = arith.constant 0 : index
    %c0_6 = arith.constant 0 : index
    %4 = vector.load %arg1[%c0_3, %c0_4, %c0_5, %c0_6] : memref<1x4x16x16xf32, #tpu.memory_space<vmem>>, vector<1x1x16x16xf32>
    %5 = vector.shape_cast %4 : vector<1x1x16x16xf32> to vector<16x16xf32>
    %c1 = arith.constant 1 : index
    %c1_7 = arith.constant 1 : index
    %6 = vector.load %arg7[%c1, %c1_7] : memref<73x18xf32, #tpu.memory_space<vmem>>, vector<16x16xf32>
    tpu.vector_store %arg7[%c1, %c1_7], %5 {strides = array<i32>} : memref<73x18xf32, #tpu.memory_space<vmem>>, vector<16x16xf32>,
    %c0_8 = arith.constant 0 : index
    %c1_9 = arith.constant 1 : index
    %c0_10 = arith.constant 0 : index
    %c0_11 = arith.constant 0 : index
    %7 = vector.load %arg1[%c0_8, %c1_9, %c0_10, %c0_11] : memref<1x4x16x16xf32, #tpu.memory_space<vmem>>, vector<1x1x16x16xf32>
    %8 = vector.shape_cast %7 : vector<1x1x16x16xf32> to vector<16x16xf32>
    %c19 = arith.constant 19 : index
    %c1_12 = arith.constant 1 : index
    %9 = vector.load %arg7[%c19, %c1_12] : memref<73x18xf32, #tpu.memory_space<vmem>>, vector<16x16xf32>
    tpu.vector_store %arg7[%c19, %c1_12], %8 {strides = array<i32>} : memref<73x18xf32, #tpu.memory_space<vmem>>, vector<16x16xf32>,
    %c0_13 = arith.constant 0 : index
    %c2 = arith.constant 2 : index
    %c0_14 = arith.constant 0 : index
    %c0_15 = arith.constant 0 : index
    %10 = vector.load %arg1[%c0_13, %c2, %c0_14, %c0_15] : memref<1x4x16x16xf32, #tpu.memory_space<vmem>>, vector<1x1x16x16xf32>
    %11 = vector.shape_cast %10 : vector<1x1x16x16xf32> to vector<16x16xf32>
    %c37 = arith.constant 37 : index
    %c1_16 = arith.constant 1 : index
    %12 = vector.load %arg7[%c37, %c1_16] : memref<73x18xf32, #tpu.memory_space<vmem>>, vector<16x16xf32>
    tpu.vector_store %arg7[%c37, %c1_16], %11 {strides = array<i32>} : memref<73x18xf32, #tpu.memory_space<vmem>>, vector<16x16xf32>,
    %c0_17 = arith.constant 0 : index
    %c3 = arith.constant 3 : index
    %c0_18 = arith.constant 0 : index
    %c0_19 = arith.constant 0 : index
    %13 = vector.load %arg1[%c0_17, %c3, %c0_18, %c0_19] : memref<1x4x16x16xf32, #tpu.memory_space<vmem>>, vector<1x1x16x16xf32>
    %14 = vector.shape_cast %13 : vector<1x1x16x16xf32> to vector<16x16xf32>
    %c55 = arith.constant 55 : index
    %c1_20 = arith.constant 1 : index
    %15 = vector.load %arg7[%c55, %c1_20] : memref<73x18xf32, #tpu.memory_space<vmem>>, vector<16x16xf32>
    tpu.vector_store %arg7[%c55, %c1_20], %14 {strides = array<i32>} : memref<73x18xf32, #tpu.memory_space<vmem>>, vector<16x16xf32>,
    %c0_21 = arith.constant 0 : index
    %c0_22 = arith.constant 0 : index
    %16 = vector.load %arg7[%c0_21, %c0_22] : memref<73x18xf32, #tpu.memory_space<vmem>>, vector<73x18xf32>
    %cst_23 = arith.constant 0.000000e+00 : f32
    %17 = vector.broadcast %cst_23 : f32 to vector<256x14xf32>
    %c0_24 = arith.constant 0 : index
    %c0_25 = arith.constant 0 : index
    %c0_26 = arith.constant 0 : index
    %18 = vector.load %arg2[%c0_24, %c0_25, %c0_26] : memref<5x256x73xf32, #tpu.memory_space<vmem>>, vector<1x256x73xf32>
    %19 = vector.shape_cast %18 : vector<1x256x73xf32> to vector<256x73xf32>
    %cst_27 = arith.constant dense<0.000000e+00> : vector<256x18xf32>
    %20 = tpu.matmul %19, %16, %cst_27 {dimension_numbers = #tpu.dot_dimension_numbers<[1], [0], [0], [1], [0, 0, 1, 1], [], []>} : vector<256x73xf32>, vector<73x18xf32>, vector<256x18xf32> -> vector<256x18xf32>
    %21 = vector.extract_strided_slice %20 {offsets = [0, 0], sizes = [256, 14], strides = [1, 1]} : vector<256x18xf32> to vector<256x14xf32>
    %22 = arith.addf %17, %21 : vector<256x14xf32>
    %c1_28 = arith.constant 1 : index
    %c0_29 = arith.constant 0 : index
    %c0_30 = arith.constant 0 : index
    %23 = vector.load %arg2[%c1_28, %c0_29, %c0_30] : memref<5x256x73xf32, #tpu.memory_space<vmem>>, vector<1x256x73xf32>
    %24 = vector.shape_cast %23 : vector<1x256x73xf32> to vector<256x73xf32>
    %cst_31 = arith.constant dense<0.000000e+00> : vector<256x18xf32>
    %25 = tpu.matmul %24, %16, %cst_31 {dimension_numbers = #tpu.dot_dimension_numbers<[1], [0], [0], [1], [0, 0, 1, 1], [], []>} : vector<256x73xf32>, vector<73x18xf32>, vector<256x18xf32> -> vector<256x18xf32>
    %26 = vector.extract_strided_slice %25 {offsets = [0, 1], sizes = [256, 14], strides = [1, 1]} : vector<256x18xf32> to vector<256x14xf32>
    %27 = arith.addf %22, %26 : vector<256x14xf32>
    %c2_32 = arith.constant 2 : index
    %c0_33 = arith.constant 0 : index
    %c0_34 = arith.constant 0 : index
    %28 = vector.load %arg2[%c2_32, %c0_33, %c0_34] : memref<5x256x73xf32, #tpu.memory_space<vmem>>, vector<1x256x73xf32>
    %29 = vector.shape_cast %28 : vector<1x256x73xf32> to vector<256x73xf32>
    %cst_35 = arith.constant dense<0.000000e+00> : vector<256x18xf32>
    %30 = tpu.matmul %29, %16, %cst_35 {dimension_numbers = #tpu.dot_dimension_numbers<[1], [0], [0], [1], [0, 0, 1, 1], [], []>} : vector<256x73xf32>, vector<73x18xf32>, vector<256x18xf32> -> vector<256x18xf32>
    %31 = vector.extract_strided_slice %30 {offsets = [0, 2], sizes = [256, 14], strides = [1, 1]} : vector<256x18xf32> to vector<256x14xf32>
    %32 = arith.addf %27, %31 : vector<256x14xf32>
    %c3_36 = arith.constant 3 : index
    %c0_37 = arith.constant 0 : index
    %c0_38 = arith.constant 0 : index
    %33 = vector.load %arg2[%c3_36, %c0_37, %c0_38] : memref<5x256x73xf32, #tpu.memory_space<vmem>>, vector<1x256x73xf32>
    %34 = vector.shape_cast %33 : vector<1x256x73xf32> to vector<256x73xf32>
    %cst_39 = arith.constant dense<0.000000e+00> : vector<256x18xf32>
    %35 = tpu.matmul %34, %16, %cst_39 {dimension_numbers = #tpu.dot_dimension_numbers<[1], [0], [0], [1], [0, 0, 1, 1], [], []>} : vector<256x73xf32>, vector<73x18xf32>, vector<256x18xf32> -> vector<256x18xf32>
    %36 = vector.extract_strided_slice %35 {offsets = [0, 3], sizes = [256, 14], strides = [1, 1]} : vector<256x18xf32> to vector<256x14xf32>
    %37 = arith.addf %32, %36 : vector<256x14xf32>
    %c4 = arith.constant 4 : index
    %c0_40 = arith.constant 0 : index
    %c0_41 = arith.constant 0 : index
    %38 = vector.load %arg2[%c4, %c0_40, %c0_41] : memref<5x256x73xf32, #tpu.memory_space<vmem>>, vector<1x256x73xf32>
    %39 = vector.shape_cast %38 : vector<1x256x73xf32> to vector<256x73xf32>
    %cst_42 = arith.constant dense<0.000000e+00> : vector<256x18xf32>
    %40 = tpu.matmul %39, %16, %cst_42 {dimension_numbers = #tpu.dot_dimension_numbers<[1], [0], [0], [1], [0, 0, 1, 1], [], []>} : vector<256x73xf32>, vector<73x18xf32>, vector<256x18xf32> -> vector<256x18xf32>
    %41 = vector.extract_strided_slice %40 {offsets = [0, 4], sizes = [256, 14], strides = [1, 1]} : vector<256x18xf32> to vector<256x14xf32>
    %42 = arith.addf %37, %41 : vector<256x14xf32>
    %cst_43 = arith.constant 0.000000e+00 : f32
    %43 = vector.broadcast %cst_43 : f32 to vector<256x14xf32>
    %44 = arith.maximumf %42, %43 : vector<256x14xf32>
    %cst_44 = arith.constant 0.000000e+00 : f32
    %45 = vector.broadcast %cst_44 : f32 to vector<257x16xf32>
    %c0_45 = arith.constant 0 : index
    %c0_46 = arith.constant 0 : index
    %46 = vector.load %arg8[%c0_45, %c0_46] : memref<257x16xf32, #tpu.memory_space<vmem>>, vector<257x16xf32>
    tpu.vector_store %arg8[%c0_45, %c0_46], %45 {strides = array<i32>} : memref<257x16xf32, #tpu.memory_space<vmem>>, vector<257x16xf32>,
    %cst_47 = arith.constant 1.000000e+00 : f32
    %47 = vector.broadcast %cst_47 : f32 to vector<1x16xf32>
    %c256 = arith.constant 256 : index
    %c0_48 = arith.constant 0 : index
    %48 = vector.load %arg8[%c256, %c0_48] : memref<257x16xf32, #tpu.memory_space<vmem>>, vector<1x16xf32>
    tpu.vector_store %arg8[%c256, %c0_48], %47 {strides = array<i32>} : memref<257x16xf32, #tpu.memory_space<vmem>>, vector<1x16xf32>,
    %c0_49 = arith.constant 0 : index
    %c1_50 = arith.constant 1 : index
    %49 = vector.load %arg8[%c0_49, %c1_50] : memref<257x16xf32, #tpu.memory_space<vmem>>, vector<256x14xf32>
    tpu.vector_store %arg8[%c0_49, %c1_50], %44 {strides = array<i32>} : memref<257x16xf32, #tpu.memory_space<vmem>>, vector<256x14xf32>,
    %c0_51 = arith.constant 0 : index
    %c0_52 = arith.constant 0 : index
    %50 = vector.load %arg8[%c0_51, %c0_52] : memref<257x16xf32, #tpu.memory_space<vmem>>, vector<257x16xf32>
    %cst_53 = arith.constant 0.000000e+00 : f32
    %51 = vector.broadcast %cst_53 : f32 to vector<12x12xf32>
    %c0_54 = arith.constant 0 : index
    %c0_55 = arith.constant 0 : index
    %c0_56 = arith.constant 0 : index
    %52 = vector.load %arg3[%c0_54, %c0_55, %c0_56] : memref<5x12x257xf32, #tpu.memory_space<vmem>>, vector<1x12x257xf32>
    %53 = vector.shape_cast %52 : vector<1x12x257xf32> to vector<12x257xf32>
    %cst_57 = arith.constant dense<0.000000e+00> : vector<12x16xf32>
    %54 = tpu.matmul %53, %50, %cst_57 {dimension_numbers = #tpu.dot_dimension_numbers<[1], [0], [0], [1], [0, 0, 1, 1], [], []>} : vector<12x257xf32>, vector<257x16xf32>, vector<12x16xf32> -> vector<12x16xf32>
    %55 = vector.extract_strided_slice %54 {offsets = [0, 0], sizes = [12, 12], strides = [1, 1]} : vector<12x16xf32> to vector<12x12xf32>
    %56 = arith.addf %51, %55 : vector<12x12xf32>
    %c1_58 = arith.constant 1 : index
    %c0_59 = arith.constant 0 : index
    %c0_60 = arith.constant 0 : index
    %57 = vector.load %arg3[%c1_58, %c0_59, %c0_60] : memref<5x12x257xf32, #tpu.memory_space<vmem>>, vector<1x12x257xf32>
    %58 = vector.shape_cast %57 : vector<1x12x257xf32> to vector<12x257xf32>
    %cst_61 = arith.constant dense<0.000000e+00> : vector<12x16xf32>
    %59 = tpu.matmul %58, %50, %cst_61 {dimension_numbers = #tpu.dot_dimension_numbers<[1], [0], [0], [1], [0, 0, 1, 1], [], []>} : vector<12x257xf32>, vector<257x16xf32>, vector<12x16xf32> -> vector<12x16xf32>
    %60 = vector.extract_strided_slice %59 {offsets = [0, 1], sizes = [12, 12], strides = [1, 1]} : vector<12x16xf32> to vector<12x12xf32>
    %61 = arith.addf %56, %60 : vector<12x12xf32>
    %c2_62 = arith.constant 2 : index
    %c0_63 = arith.constant 0 : index
    %c0_64 = arith.constant 0 : index
    %62 = vector.load %arg3[%c2_62, %c0_63, %c0_64] : memref<5x12x257xf32, #tpu.memory_space<vmem>>, vector<1x12x257xf32>
    %63 = vector.shape_cast %62 : vector<1x12x257xf32> to vector<12x257xf32>
    %cst_65 = arith.constant dense<0.000000e+00> : vector<12x16xf32>
    %64 = tpu.matmul %63, %50, %cst_65 {dimension_numbers = #tpu.dot_dimension_numbers<[1], [0], [0], [1], [0, 0, 1, 1], [], []>} : vector<12x257xf32>, vector<257x16xf32>, vector<12x16xf32> -> vector<12x16xf32>
    %65 = vector.extract_strided_slice %64 {offsets = [0, 2], sizes = [12, 12], strides = [1, 1]} : vector<12x16xf32> to vector<12x12xf32>
    %66 = arith.addf %61, %65 : vector<12x12xf32>
    %c3_66 = arith.constant 3 : index
    %c0_67 = arith.constant 0 : index
    %c0_68 = arith.constant 0 : index
    %67 = vector.load %arg3[%c3_66, %c0_67, %c0_68] : memref<5x12x257xf32, #tpu.memory_space<vmem>>, vector<1x12x257xf32>
    %68 = vector.shape_cast %67 : vector<1x12x257xf32> to vector<12x257xf32>
    %cst_69 = arith.constant dense<0.000000e+00> : vector<12x16xf32>
    %69 = tpu.matmul %68, %50, %cst_69 {dimension_numbers = #tpu.dot_dimension_numbers<[1], [0], [0], [1], [0, 0, 1, 1], [], []>} : vector<12x257xf32>, vector<257x16xf32>, vector<12x16xf32> -> vector<12x16xf32>
    %70 = vector.extract_strided_slice %69 {offsets = [0, 3], sizes = [12, 12], strides = [1, 1]} : vector<12x16xf32> to vector<12x12xf32>
    %71 = arith.addf %66, %70 : vector<12x12xf32>
    %c4_70 = arith.constant 4 : index
    %c0_71 = arith.constant 0 : index
    %c0_72 = arith.constant 0 : index
    %72 = vector.load %arg3[%c4_70, %c0_71, %c0_72] : memref<5x12x257xf32, #tpu.memory_space<vmem>>, vector<1x12x257xf32>
    %73 = vector.shape_cast %72 : vector<1x12x257xf32> to vector<12x257xf32>
    %cst_73 = arith.constant dense<0.000000e+00> : vector<12x16xf32>
    %74 = tpu.matmul %73, %50, %cst_73 {dimension_numbers = #tpu.dot_dimension_numbers<[1], [0], [0], [1], [0, 0, 1, 1], [], []>} : vector<12x257xf32>, vector<257x16xf32>, vector<12x16xf32> -> vector<12x16xf32>
    %75 = vector.extract_strided_slice %74 {offsets = [0, 4], sizes = [12, 12], strides = [1, 1]} : vector<12x16xf32> to vector<12x12xf32>
    %76 = arith.addf %71, %75 : vector<12x12xf32>
    %cst_74 = arith.constant 0.000000e+00 : f32
    %77 = vector.broadcast %cst_74 : f32 to vector<12x12xf32>
    %78 = arith.subf %77, %76 : vector<12x12xf32>
    %79 = math.exp %78 : vector<12x12xf32>
    %cst_75 = arith.constant 1.000000e+00 : f32
    %80 = vector.broadcast %cst_75 : f32 to vector<12x12xf32>
    %81 = arith.addf %80, %79 : vector<12x12xf32>
    %cst_76 = arith.constant 1.000000e+00 : f32
    %82 = vector.broadcast %cst_76 : f32 to vector<12x12xf32>
    %83 = arith.divf %82, %81 : vector<12x12xf32>
    %c0_77 = arith.constant 0 : index
    %c0_78 = arith.constant 0 : index
    %84 = vector.load %arg4[%c0_77, %c0_78] : memref<32x12xf32, #tpu.memory_space<vmem>>, vector<32x12xf32>
    %cst_79 = arith.constant dense<0.000000e+00> : vector<32x12xf32>
    %85 = tpu.matmul %84, %83, %cst_79 {dimension_numbers = #tpu.dot_dimension_numbers<[1], [0], [0], [1], [0, 0, 1, 1], [], []>} : vector<32x12xf32>, vector<12x12xf32>, vector<32x12xf32> -> vector<32x12xf32>
    %c0_80 = arith.constant 0 : index
    %c0_81 = arith.constant 0 : index
    %86 = vector.load %arg5[%c0_80, %c0_81] : memref<12x32xf32, #tpu.memory_space<vmem>>, vector<12x32xf32>
    %cst_82 = arith.constant dense<0.000000e+00> : vector<32x32xf32>
    %87 = tpu.matmul %85, %86, %cst_82 {dimension_numbers = #tpu.dot_dimension_numbers<[1], [0], [0], [1], [0, 0, 1, 1], [], []>} : vector<32x12xf32>, vector<12x32xf32>, vector<32x32xf32> -> vector<32x32xf32>
    %c0_83 = arith.constant 0 : index
    %c0_84 = arith.constant 0 : index
    %c0_85 = arith.constant 0 : index
    %88 = vector.load %arg6[%c0_83, %c0_84, %c0_85] : memref<1x32x32xf32, #tpu.memory_space<vmem>>, vector<1x32x32xf32>
    %89 = vector.shape_cast %88 : vector<1x32x32xf32> to vector<32x32xf32>
    %90 = vector.shape_cast %87 : vector<32x32xf32> to vector<1x32x32xf32>
    tpu.vector_store %arg6[%c0_83, %c0_84, %c0_85], %90 {strides = array<i32>} : memref<1x32x32xf32, #tpu.memory_space<vmem>>, vector<1x32x32xf32>,
    return
  }
  func.func @transform_0(%arg0: i32) -> (i32, i32, i32, i32) {
    %c0_i32 = arith.constant 0 : i32
    %c0_i32_0 = arith.constant 0 : i32
    %c0_i32_1 = arith.constant 0 : i32
    %c0_i32_2 = arith.constant 0 : i32
    return %arg0, %c0_i32, %c0_i32_0, %c0_i32_1 : i32, i32, i32, i32
  }
  func.func @transform_1(%arg0: i32) -> (i32, i32, i32) {
    %c0_i32 = arith.constant 0 : i32
    %c0_i32_0 = arith.constant 0 : i32
    %c0_i32_1 = arith.constant 0 : i32
    %c0_i32_2 = arith.constant 0 : i32
    return %c0_i32, %c0_i32_0, %c0_i32_1 : i32, i32, i32
  }
  func.func @transform_2(%arg0: i32) -> (i32, i32, i32) {
    %c0_i32 = arith.constant 0 : i32
    %c0_i32_0 = arith.constant 0 : i32
    %c0_i32_1 = arith.constant 0 : i32
    %c0_i32_2 = arith.constant 0 : i32
    return %c0_i32, %c0_i32_0, %c0_i32_1 : i32, i32, i32
  }
  func.func @transform_3(%arg0: i32) -> (i32, i32) {
    %c0_i32 = arith.constant 0 : i32
    %c0_i32_0 = arith.constant 0 : i32
    %c0_i32_1 = arith.constant 0 : i32
    return %c0_i32, %c0_i32_0 : i32, i32
  }
  func.func @transform_4(%arg0: i32) -> (i32, i32) {
    %c0_i32 = arith.constant 0 : i32
    %c0_i32_0 = arith.constant 0 : i32
    %c0_i32_1 = arith.constant 0 : i32
    return %c0_i32, %c0_i32_0 : i32, i32
  }
  func.func @transform_5(%arg0: i32) -> (i32, i32, i32) {
    %c0_i32 = arith.constant 0 : i32
    %c0_i32_0 = arith.constant 0 : i32
    %c0_i32_1 = arith.constant 0 : i32
    return %arg0, %c0_i32, %c0_i32_0 : i32, i32, i32
  }
}

</mosaic_0001>

<bundles_post_ra>
// kernel: sd_head_forward.1
= control target key start
LH: loop header
LB: loop body
LE: loop exit
PB: predicated region body
PF: predicated region fallthrough
CT: control target
= control target key end

     0   :  { %10 = vsyncpa [#allocation5], 0  ;;  %s7437_s0 = inlined_call_operand.vmem [shape: f32[2,4,16,16], index: 0, kind: input, shape index: {}]   ;;  %s7438_s1 = inlined_call_operand.vmem [shape: f32[5,256,73], index: 1, kind: input, shape index: {}]   ;;  %s7439_s2 = inlined_call_operand.vmem [shape: f32[5,12,257], index: 2, kind: input, shape index: {}]   ;;  %s7440_s3 = inlined_call_operand.vmem [shape: f32[32,12], index: 3, kind: input, shape index: {}]   ;;  %s7441_s4 = inlined_call_operand.vmem [shape: f32[12,32], index: 4, kind: input, shape index: {}]   ;;  %s7442_s5 = inlined_call_operand.hbm [shape: f32[2,32,32], index: 5, kind: output, shape index: {}]  }
   0x1   :  { %12 = vsyncpa [#allocation5 + $0x1], 0  ;;  %s5499_s18 = smov 0   ;;  %s5501_s19 = smov 0  }
   0x2   :  { %s5503_s20 = smov 0   ;;  %s5505_s21 = smov 0  }
   0x3 LB: > { %s5520_s22 = sadd.s32 4294967295, %s5457_s21   ;;  %s4167_s23 = sadd.s32 4294967294, %s5457_s21   ;;  %s5457_s21 = sphi %s5505_s21, %s7567_s21   ;;  %s5453_s20 = sphi %s5503_s20, %s7566_s20   ;;  %s5449_s19 = sphi %s5501_s19, %s7565_s19   ;;  %s5445_s18 = sphi %s5499_s18, %s7564_s18  }
   0x4   : > { %s5524_s24 = sadd.s32 1, %s5457_s21   ;;  %s135_s25 = sadd.s32 1, %s5453_s20 }
   0x5   : > { %s132_s26 = ssub.s32 %s5457_s21, %s5524_s24  ;;  %p145_p0 = scmp.ne.s32.totalorder %s5453_s20, %s5449_s19 }
   0x6   : > { %p133_p1 = scmp.eq.s32.totalorder %s132_s26, 0  ;;  %p146_p2 = scmp.eq.s32.totalorder %s5520_s22, 1 }
   0x7   : > { %p151_p3 = scmp.ne.s32.totalorder %s5449_s19, %s5445_s18  ;;  %p152_p4 = scmp.eq.s32.totalorder %s4167_s23, 1 }
   0x8   : > { %s5535_s27 = scalar_select %p133_p1, %s5453_s20, %s135_s25  }
   0x9   : > { %p5537_p5 = por %p146_p2, %p145_p0  ;;  %p5541_p6 = por %p152_p4, %p151_p3 }
   0xa   : > { %p4170_p7 = scmp.ge.s32.totalorder %s5457_s21, 1  ;;  %p190_p8 = scmp.lt.s32.totalorder %s5457_s21, 3 }
   0xc   : > { %p191_p9 = pnand %p4170_p7, %p190_p8 }
   0xe   : > { %194 = sbr.rel (%p191_p9) target bundleno = 1780 (0x6f4), region = 40 }
  0x13   : > { %p218_p10 = scmp.lt.s32.totalorder %s5520_s22, 1  ;;  %vm223_vm0 = vcmask 146432   ;;  %vm233_vm1 = vcmask 139264   ;;  %v7444_v0 = vmov 0.0   ;;  %v7443_v1 = vmov 1.0   ;;  %s5461_s10 = smov 1  }
  0x14   : > { %231 = vst.msk [vmem:[#allocation2 + $0x38] sm:$0xff] %vm223_vm0, %v7444_v0  ;;  %232 = vst.msk [vmem:[#allocation2 + $0x40] sm:$0xff] %vm223_vm0, %v7444_v0  ;;  %vm427_vm2 = vcmask 1040384   ;;  %v298_v11 = vld [vmem:[%s7438_s1] sm:$0xff]  ;;  %vm330_vm3 = vcmask 596992   ;;  %vm246_vm4 = vcmask 138248  }
  0x15   : > { %224 = vst.msk [vmem:[#allocation2] sm:$0xff] %vm223_vm0, %v7444_v0  ;;  %225 = vst.msk [vmem:[#allocation2 + $0x8] sm:$0xff] %vm223_vm0, %v7444_v0  ;;  %s219_s30 = scalar_select %p218_p10, %s5520_s22, 1  ;;  %v4213_v12 = vld [vmem:[%s7438_s1 + $0x100] sm:$0xff]  ;;  %4976 = vmatprep.mubr.msk.f32.mxu0 %vm330_vm3, %v298_v11  ;;  %v299_v30 = vld [vmem:[%s7438_s1 + $0x8] sm:$0xff]  ;;  %vm2776_vm5 = vcmask 130048  }
  0x16   : > { %226 = vst.msk [vmem:[#allocation2 + $0x10] sm:$0xff] %vm223_vm0, %v7444_v0  ;;  %227 = vst.msk [vmem:[#allocation2 + $0x18] sm:$0xff] %vm223_vm0, %v7444_v0  ;;  %5044 = vmatprep.mubr.msk.f32.mxu1 %vm330_vm3, %v4213_v12  ;;  %v4214_v31 = vld [vmem:[%s7438_s1 + $0x108] sm:$0xff]  ;;  %v300_v32 = vld [vmem:[%s7438_s1 + $0x10] sm:$0xff]  ;;  %s5462_s14 = smov 127   ;;  %s5463_s17 = smov 126  }
  0x17   : > { %228 = vst.msk [vmem:[#allocation2 + $0x20] sm:$0xff] %vm223_vm0, %v7444_v0  ;;  %229 = vst.msk [vmem:[#allocation2 + $0x28] sm:$0xff] %vm223_vm0, %v7444_v0  ;;  %s4527_s6 = sshll.u32 %s219_s30, 6  ;;  %v4215_v33 = vld [vmem:[%s7438_s1 + $0x110] sm:$0xff]  ;;  %v301_v34 = vld [vmem:[%s7438_s1 + $0x18] sm:$0xff]  ;;  %s5464_s23 = smov 125  }
  0x18   : > { %230 = vst.msk [vmem:[#allocation2 + $0x30] sm:$0xff] %vm223_vm0, %v7444_v0  ;;  %s222_s9 = scalar_lea.vmem %s7437_s0, %s4527_s6  ;;  %v4216_v35 = vld [vmem:[%s7438_s1 + $0x118] sm:$0xff]  ;;  %v302_v36 = vld [vmem:[%s7438_s1 + $0x20] sm:$0xff]  ;;  %v303_v38 = vld [vmem:[%s7438_s1 + $0x28] sm:$0xff]  ;;  %s5465_s25 = smov 124   ;;  %vm2809_vm6 = vcmask 122880  }
  0x19   : > { %234 = vst.msk [vmem:[#allocation2 + $0x48] sm:$0x1] %vm233_vm1, %v7444_v0  ;;  %v4179_v2 = vld [vmem:[%s222_s9 + $0x38] sm:$0xff]  ;;  %v4177_v3 = vld [vmem:[%s222_s9 + $0x28] sm:$0xff]  ;;  %v4178_v4 = vld [vmem:[%s222_s9 + $0x30] sm:$0xff]  ;;  %vm2940_vm7 = vcmask 121864  }
  0x1a   : > { %235 = vst.msk [vmem:[#allocation2 + $0x48] sm:$0x1] %vm233_vm1, %v7443_v1  ;;  %282 = vrot.lane.b32.xlu0 %v4179_v2, %s5461_s10  ;;  %269 = vrot.lane.b32.xlu1 %v4177_v3, %s5461_s10  ;;  %v4176_v5 = vld [vmem:[%s222_s9 + $0x20] sm:$0xff]  ;;  %v4175_v7 = vld [vmem:[%s222_s9 + $0x18] sm:$0xff]  ;;  %vm3012_vm8 = vcmask 7168   ;;  %vm3882_vm9 = vcmask 97280  }
  0x1b   : > { %v4174_v8 = vld [vmem:[%s222_s9 + $0x10] sm:$0xff]  ;;  %v237_v9 = vld [vmem:[%s222_s9 + $0x8] sm:$0xff]  ;;  %v236_v10 = vld [vmem:[%s222_s9] sm:$0xff]  ;;  %vm3895_vm10 = vcmask 1043456   ;;  %s215_s12 = sand.u32 1, %s5449_s19   ;;  %vm4086_vm11 = vcmask 261120  }
  0x1c   : > { %v4217_v37 = vld [vmem:[%s7438_s1 + $0x120] sm:$0xff]  ;;  %v4218_v39 = vld [vmem:[%s7438_s1 + $0x128] sm:$0xff]  ;;  %v304_v40 = vld [vmem:[%s7438_s1 + $0x30] sm:$0xff]  ;;  %s4171_s13 = sshll.u32 %s215_s12, 5  ;;  %s7397_s26 = scalar_lea.sflag [#allocation5], %s215_s12 }
  0x1d   : > { %v4219_v41 = vld [vmem:[%s7438_s1 + $0x130] sm:$0xff]  ;;  %v305_v42 = vld [vmem:[%s7438_s1 + $0x38] sm:$0xff]  ;;  %v306_v44 = vld [vmem:[%s7438_s1 + $0x40] sm:$0xff]  ;;  %s217_s15 = scalar_lea.vmem [#allocation4], %s4171_s13 }
  0x1e   : > { %280 = vrot.lane.b32.xlu0 %v4178_v4, %s5461_s10  ;;  %267 = vrot.lane.b32.xlu1 %v4176_v5, %s5461_s10  ;;  %v4220_v43 = vld [vmem:[%s7438_s1 + $0x138] sm:$0xff]  ;;  %v4221_v45 = vld [vmem:[%s7438_s1 + $0x140] sm:$0xff]  ;;  %s4105_s16 = sshll.u32 %s217_s15, 4  ;;  %s7390_s16 = int_to_ptr.vmem [resolvable:$true] %s4105_s16 }
  0x1f   : > { %v307_v46 = vld [vmem:[%s7438_s1 + $0x48] sm:$0xff]  ;;  %v308_v48 = vld [vmem:[%s7438_s1 + $0x50] sm:$0xff]  ;;  %v309_v50 = vld [vmem:[%s7438_s1 + $0x58] sm:$0xff]  ;;  %s5397_s30 = scalar_lea.vmem %s7390_s16, 512 }
  0x20   : > { %v4222_v47 = vld [vmem:[%s7438_s1 + $0x148] sm:$0xff]  ;;  %v4223_v49 = vld [vmem:[%s7438_s1 + $0x150] sm:$0xff]  ;;  %v4224_v51 = vld [vmem:[%s7438_s1 + $0x158] sm:$0xff]  ;;  %p5398_p11 = scmp.ne.s32.totalorder %s7390_s16, %s5397_s30 }
  0x21   : > { %v5567_v6 = vld [vmem:[#allocation2 + $0x48] sm:$0x1]  ;;  %v310_v52 = vld [vmem:[%s7438_s1 + $0x60] sm:$0xff]  ;;  %v312_v56 = vld [vmem:[%s7438_s1 + $0x70] sm:$0xff] }
  0x22   : > { %4956 = vmatprep.subr.msk.mxu0 %vm427_vm2, %v5567_v6  ;;  %5024 = vmatprep.subr.msk.mxu1 %vm427_vm2, %v5567_v6  ;;  %v4225_v53 = vld [vmem:[%s7438_s1 + $0x160] sm:$0xff]  ;;  %v311_v54 = vld [vmem:[%s7438_s1 + $0x68] sm:$0xff]  ;;  %v4227_v57 = vld [vmem:[%s7438_s1 + $0x170] sm:$0xff]  ;;  %p5399_p12 = pnand %p5398_p11, %p5537_p5 }
  0x23   : > { %4957 = vmatpush3.msk.msra.mxu0 %vm427_vm2, %v5567_v6  ;;  %5025 = vmatpush3.msk.msra.mxu1 %vm427_vm2, %v5567_v6  ;;  %v4226_v55 = vld [vmem:[%s7438_s1 + $0x168] sm:$0xff]  ;;  %v313_v58 = vld [vmem:[%s7438_s1 + $0x78] sm:$0xff]  ;;  %v314_v60 = vld [vmem:[%s7438_s1 + $0x80] sm:$0xff] }
  0x24   : > { %256 = vrot.lane.b32.xlu0 %v4175_v7, %s5461_s10  ;;  %254 = vrot.lane.b32.xlu1 %v4174_v8, %s5461_s10  ;;  %v4228_v59 = vld [vmem:[%s7438_s1 + $0x178] sm:$0xff]  ;;  %v4229_v61 = vld [vmem:[%s7438_s1 + $0x180] sm:$0xff]  ;;  %p5400_p13 = pneg %p5399_p12 }
  0x25   : > { %v315_v62 = vld [vmem:[%s7438_s1 + $0x88] sm:$0xff]  ;;  %v316_v2 = vld [vmem:[%s7438_s1 + $0x90] sm:$0xff]  ;;  %v317_v4 = vld [vmem:[%s7438_s1 + $0x98] sm:$0xff] }
  0x26   : > { %v4230_v63 = vld [vmem:[%s7438_s1 + $0x188] sm:$0xff]  ;;  %v4231_v3 = vld [vmem:[%s7438_s1 + $0x190] sm:$0xff]  ;;  %v4232_v5 = vld [vmem:[%s7438_s1 + $0x198] sm:$0xff] }
  0x27   : > { %v318_v7 = vld [vmem:[%s7438_s1 + $0xa0] sm:$0xff]  ;;  %v320_v11 = vld [vmem:[%s7438_s1 + $0xb0] sm:$0xff] }
  0x28   : > { %242 = vrot.lane.b32.xlu0 %v237_v9, %s5461_s10  ;;  %240 = vrot.lane.b32.xlu1 %v236_v10, %s5461_s10  ;;  %v4233_v8 = vld [vmem:[%s7438_s1 + $0x1a0] sm:$0xff]  ;;  %v319_v9 = vld [vmem:[%s7438_s1 + $0xa8] sm:$0xff] }
  0x29   : > { %v4234_v10 = vld [vmem:[%s7438_s1 + $0x1a8] sm:$0xff]  ;;  %v4235_v12 = vld [vmem:[%s7438_s1 + $0x1b0] sm:$0xff] }
  0x8c   : > { %v283_v13 = vpop.permute.xlu0 %282  ;;  %v270_v14 = vpop.permute.xlu1 %269 }
  0x8d   : > { %287 = vst.msk [vmem:[#allocation2 + $0x3f] sm:$0xff] %vm246_vm4, %v283_v13  ;;  %274 = vst.msk [vmem:[#allocation2 + $0x2d] sm:$0xff] %vm246_vm4, %v270_v14  ;;  %v321_v13 = vld [vmem:[%s7438_s1 + $0xb8] sm:$0xff] }
  0x8e   : > { %v4236_v14 = vld [vmem:[%s7438_s1 + $0x1b8] sm:$0xff] }
  0x90   : > { %v281_v15 = vpop.permute.xlu0 %280  ;;  %v268_v16 = vpop.permute.xlu1 %267 }
  0x91   : > { %286 = vst.msk [vmem:[#allocation2 + $0x37] sm:$0xff] %vm246_vm4, %v281_v15  ;;  %273 = vst.msk [vmem:[#allocation2 + $0x25] sm:$0xff] %vm246_vm4, %v268_v16  ;;  %v322_v15 = vld [vmem:[%s7438_s1 + $0xc0] sm:$0xff] }
  0x92   : > { %v4237_v16 = vld [vmem:[%s7438_s1 + $0x1c0] sm:$0xff] }
  0x94   : > { %v5595_v18 = vld [vmem:[#allocation2 + $0x40] sm:$0xff] }
  0x95   : > { %4958 = vmatprep.subr.mxu0 %v5595_v18  ;;  %5026 = vmatprep.subr.mxu1 %v5595_v18 }
  0x96   : > { %v257_v17 = vpop.permute.xlu0 %256  ;;  %v255_v19 = vpop.permute.xlu1 %254  ;;  %4959 = vmatpush3.msra.mxu0 %v5595_v18  ;;  %5027 = vmatpush3.msra.mxu1 %v5595_v18 }
  0x97   : > { %261 = vst.msk [vmem:[#allocation2 + $0x1b] sm:$0xff] %vm246_vm4, %v257_v17  ;;  %260 = vst.msk [vmem:[#allocation2 + $0x13] sm:$0xff] %vm246_vm4, %v255_v19  ;;  %v323_v17 = vld [vmem:[%s7438_s1 + $0xc8] sm:$0xff] }
  0x98   : > { %v5603_v21 = vld [vmem:[#allocation2 + $0x38] sm:$0xff]  ;;  %v5611_v23 = vld [vmem:[#allocation2 + $0x30] sm:$0xff]  ;;  %v5617_v24 = vld [vmem:[#allocation2 + $0x28] sm:$0xff] }
  0x99   : > { %4960 = vmatprep.subr.mxu0 %v5603_v21  ;;  %5028 = vmatprep.subr.mxu1 %v5603_v21  ;;  %v4238_v19 = vld [vmem:[%s7438_s1 + $0x1c8] sm:$0xff] }
  0x9a   : > { %v243_v20 = vpop.permute.xlu0 %242  ;;  %v241_v22 = vpop.permute.xlu1 %240  ;;  %4961 = vmatpush3.msra.mxu0 %v5603_v21  ;;  %5029 = vmatpush3.msra.mxu1 %v5603_v21 }
  0x9b   : > { %248 = vst.msk [vmem:[#allocation2 + $0x9] sm:$0xff] %vm246_vm4, %v243_v20  ;;  %247 = vst.msk [vmem:[#allocation2 + $0x1] sm:$0xff] %vm246_vm4, %v241_v22  ;;  %4962 = vmatprep.subr.mxu0 %v5611_v23  ;;  %5030 = vmatprep.subr.mxu1 %v5611_v23  ;;  %v324_v20 = vld [vmem:[%s7438_s1 + $0xd0] sm:$0xff] }
  0x9c   : > { %4963 = vmatpush3.msra.mxu0 %v5611_v23  ;;  %5031 = vmatpush3.msra.mxu1 %v5611_v23  ;;  %v4239_v22 = vld [vmem:[%s7438_s1 + $0x1d0] sm:$0xff] }
  0x9d   : > { %4964 = vmatprep.subr.mxu0 %v5617_v24  ;;  %5032 = vmatprep.subr.mxu1 %v5617_v24 }
  0x9e   : > { %4965 = vmatpush3.msra.mxu0 %v5617_v24  ;;  %5033 = vmatpush3.msra.mxu1 %v5617_v24  ;;  %v5623_v25 = vld [vmem:[#allocation2 + $0x20] sm:$0xff]  ;;  %v5629_v26 = vld [vmem:[#allocation2 + $0x18] sm:$0xff] }
  0x9f   : > { %4966 = vmatprep.subr.mxu0 %v5623_v25  ;;  %5034 = vmatprep.subr.mxu1 %v5623_v25 }
  0xa0   : > { %4967 = vmatpush3.msra.mxu0 %v5623_v25  ;;  %5035 = vmatpush3.msra.mxu1 %v5623_v25 }
  0xa1   : > { %4968 = vmatprep.subr.mxu0 %v5629_v26  ;;  %5036 = vmatprep.subr.mxu1 %v5629_v26 }
  0xa2   : > { %4969 = vmatpush3.msra.mxu0 %v5629_v26  ;;  %5037 = vmatpush3.msra.mxu1 %v5629_v26  ;;  %v5635_v27 = vld [vmem:[#allocation2 + $0x10] sm:$0xff]  ;;  %v5641_v28 = vld [vmem:[#allocation2 + $0x8] sm:$0xff]  ;;  %v5647_v29 = vld [vmem:[#allocation2] sm:$0xff] }
  0xa3   : > { %4970 = vmatprep.subr.mxu0 %v5635_v27  ;;  %5038 = vmatprep.subr.mxu1 %v5635_v27 }
  0xa4   : > { %4971 = vmatpush3.msra.mxu0 %v5635_v27  ;;  %5039 = vmatpush3.msra.mxu1 %v5635_v27 }
  0xa5   : > { %4972 = vmatprep.subr.mxu0 %v5641_v28  ;;  %5040 = vmatprep.subr.mxu1 %v5641_v28 }
  0xa6   : > { %4973 = vmatpush3.msra.mxu0 %v5641_v28  ;;  %5041 = vmatpush3.msra.mxu1 %v5641_v28 }
  0xa7   : > { %4974 = vmatprep.subr.mxu0 %v5647_v29  ;;  %5042 = vmatprep.subr.mxu1 %v5647_v29 }
  0xa8   : > { %4975 = vmatpush3.msra.mxu0 %v5647_v29  ;;  %5043 = vmatpush3.msra.mxu1 %v5647_v29 }
  0xa9   : > { %4977 = vmatmul.mubr.msk.f32.vlgmr.msra.gmra.mxu0 %vm330_vm3, %v299_v30  ;;  %5045 = vmatmul.mubr.msk.f32.vlgmr.msra.gmra.mxu1 %vm330_vm3, %v4214_v31  ;;  %v325_v30 = vld [vmem:[%s7438_s1 + $0xd8] sm:$0xff] }
  0xaa   : > { %5092 = vmatprep.subr.msk.mxu0 %vm427_vm2, %v5567_v6  ;;  %5160 = vmatprep.subr.msk.mxu1 %vm427_vm2, %v5567_v6  ;;  %v4240_v31 = vld [vmem:[%s7438_s1 + $0x1d8] sm:$0xff] }
  0xab   : > { %5093 = vmatpush3.msk.msra.mxu0 %vm427_vm2, %v5567_v6  ;;  %5161 = vmatpush3.msk.msra.mxu1 %vm427_vm2, %v5567_v6 }
  0xac   : > { %5094 = vmatprep.subr.mxu0 %v5595_v18  ;;  %5162 = vmatprep.subr.mxu1 %v5595_v18 }
  0xad   : > { %4979 = vmatprep.mubr.msk.f32.mxu0 %vm330_vm3, %v300_v32  ;;  %5047 = vmatprep.mubr.msk.f32.mxu1 %vm330_vm3, %v4215_v33  ;;  %v326_v32 = vld [vmem:[%s7438_s1 + $0xe0] sm:$0xff] }
  0xae   : > { %5095 = vmatpush3.msra.mxu0 %v5595_v18  ;;  %5163 = vmatpush3.msra.mxu1 %v5595_v18  ;;  %v4241_v33 = vld [vmem:[%s7438_s1 + $0x1e0] sm:$0xff] }
  0xaf   : > { %4980 = vmatmul.mubr.msk.f32.gmra.mxu0 %vm330_vm3, %v301_v34  ;;  %5048 = vmatmul.mubr.msk.f32.gmra.mxu1 %vm330_vm3, %v4216_v35  ;;  %v327_v34 = vld [vmem:[%s7438_s1 + $0xe8] sm:$0xff] }
  0xb0   : > { %5096 = vmatprep.subr.mxu0 %v5603_v21  ;;  %5164 = vmatprep.subr.mxu1 %v5603_v21  ;;  %v4242_v35 = vld [vmem:[%s7438_s1 + $0x1e8] sm:$0xff] }
  0xb1   : > { %5097 = vmatpush3.msra.mxu0 %v5603_v21  ;;  %5165 = vmatpush3.msra.mxu1 %v5603_v21 }
  0xb2   : > { %5098 = vmatprep.subr.mxu0 %v5611_v23  ;;  %5166 = vmatprep.subr.mxu1 %v5611_v23 }
  0xb3   : > { %4982 = vmatprep.mubr.msk.f32.mxu0 %vm330_vm3, %v302_v36  ;;  %5050 = vmatprep.mubr.msk.f32.mxu1 %vm330_vm3, %v4217_v37  ;;  %v328_v36 = vld [vmem:[%s7438_s1 + $0xf0] sm:$0xff] }
  0xb4   : > { %5099 = vmatpush3.msra.mxu0 %v5611_v23  ;;  %5167 = vmatpush3.msra.mxu1 %v5611_v23  ;;  %v4243_v37 = vld [vmem:[%s7438_s1 + $0x1f0] sm:$0xff] }
  0xb5   : > { %4983 = vmatmul.mubr.msk.f32.gmra.mxu0 %vm330_vm3, %v303_v38  ;;  %5051 = vmatmul.mubr.msk.f32.gmra.mxu1 %vm330_vm3, %v4218_v39  ;;  %v329_v38 = vld [vmem:[%s7438_s1 + $0xf8] sm:$0xff] }
  0xb6   : > { %5100 = vmatprep.subr.mxu0 %v5617_v24  ;;  %5168 = vmatprep.subr.mxu1 %v5617_v24  ;;  %v4244_v39 = vld [vmem:[%s7438_s1 + $0x1f8] sm:$0xff] }
  0xb7   : > { %5101 = vmatpush3.msra.mxu0 %v5617_v24  ;;  %5169 = vmatpush3.msra.mxu1 %v5617_v24 }
  0xb8   : > { %5102 = vmatprep.subr.mxu0 %v5623_v25  ;;  %5170 = vmatprep.subr.mxu1 %v5623_v25 }
  0xb9   : > { %4985 = vmatprep.mubr.msk.f32.mxu0 %vm330_vm3, %v304_v40  ;;  %5053 = vmatprep.mubr.msk.f32.mxu1 %vm330_vm3, %v4219_v41  ;;  %v4278_v40 = vld [vmem:[%s7438_s1 + $0x200] sm:$0xff] }
  0xba   : > { %5103 = vmatpush3.msra.mxu0 %v5623_v25  ;;  %5171 = vmatpush3.msra.mxu1 %v5623_v25  ;;  %v4343_v41 = vld [vmem:[%s7438_s1 + $0x300] sm:$0xff] }
  0xbb   : > { %4986 = vmatmul.mubr.msk.f32.gmra.mxu0 %vm330_vm3, %v305_v42  ;;  %5054 = vmatmul.mubr.msk.f32.gmra.mxu1 %vm330_vm3, %v4220_v43  ;;  %v4279_v42 = vld [vmem:[%s7438_s1 + $0x208] sm:$0xff] }
  0xbc   : > { %5104 = vmatprep.subr.mxu0 %v5629_v26  ;;  %5172 = vmatprep.subr.mxu1 %v5629_v26  ;;  %v4344_v43 = vld [vmem:[%s7438_s1 + $0x308] sm:$0xff] }
  0xbd   : > { %5105 = vmatpush3.msra.mxu0 %v5629_v26  ;;  %5173 = vmatpush3.msra.mxu1 %v5629_v26 }
  0xbe   : > { %5106 = vmatprep.subr.mxu0 %v5635_v27  ;;  %5174 = vmatprep.subr.mxu1 %v5635_v27 }
  0xbf   : > { %4988 = vmatprep.mubr.msk.f32.mxu0 %vm330_vm3, %v306_v44  ;;  %5056 = vmatprep.mubr.msk.f32.mxu1 %vm330_vm3, %v4221_v45  ;;  %v4280_v44 = vld [vmem:[%s7438_s1 + $0x210] sm:$0xff] }
  0xc0   : > { %5107 = vmatpush3.msra.mxu0 %v5635_v27  ;;  %5175 = vmatpush3.msra.mxu1 %v5635_v27  ;;  %v4345_v45 = vld [vmem:[%s7438_s1 + $0x310] sm:$0xff] }
  0xc1   : > { %4989 = vmatmul.mubr.msk.f32.gmra.mxu0 %vm330_vm3, %v307_v46  ;;  %5057 = vmatmul.mubr.msk.f32.gmra.mxu1 %vm330_vm3, %v4222_v47  ;;  %v4281_v46 = vld [vmem:[%s7438_s1 + $0x218] sm:$0xff]  ;;  %v4282_v47 = vld [vmem:[%s7438_s1 + $0x220] sm:$0xff] }
  0xc2   : > { %5108 = vmatprep.subr.mxu0 %v5641_v28  ;;  %5176 = vmatprep.subr.mxu1 %v5641_v28 }
  0xc3   : > { %5109 = vmatpush3.msra.mxu0 %v5641_v28  ;;  %5177 = vmatpush3.msra.mxu1 %v5641_v28 }
  0xc4   : > { %5110 = vmatprep.subr.mxu0 %v5647_v29  ;;  %5178 = vmatprep.subr.mxu1 %v5647_v29 }
  0xc5   : > { %4991 = vmatprep.mubr.msk.f32.mxu0 %vm330_vm3, %v308_v48  ;;  %5059 = vmatprep.mubr.msk.f32.mxu1 %vm330_vm3, %v4223_v49  ;;  %v4347_v48 = vld [vmem:[%s7438_s1 + $0x320] sm:$0xff]  ;;  %v4284_v49 = vld [vmem:[%s7438_s1 + $0x230] sm:$0xff] }
  0xc6   : > { %5111 = vmatpush3.msra.mxu0 %v5647_v29  ;;  %5179 = vmatpush3.msra.mxu1 %v5647_v29 }
  0xc7   : > { %4992 = vmatmul.mubr.msk.f32.gmra.mxu0 %vm330_vm3, %v309_v50  ;;  %5060 = vmatmul.mubr.msk.f32.gmra.mxu1 %vm330_vm3, %v4224_v51  ;;  %v4349_v50 = vld [vmem:[%s7438_s1 + $0x330] sm:$0xff]  ;;  %v4286_v51 = vld [vmem:[%s7438_s1 + $0x240] sm:$0xff] }
  0xc8   : > { %4994 = vmatprep.mubr.msk.f32.mxu0 %vm330_vm3, %v310_v52  ;;  %5062 = vmatprep.mubr.msk.f32.mxu1 %vm330_vm3, %v4225_v53  ;;  %v4351_v52 = vld [vmem:[%s7438_s1 + $0x340] sm:$0xff]  ;;  %v4288_v53 = vld [vmem:[%s7438_s1 + $0x250] sm:$0xff] }
  0xc9   : > { %5228 = vmatprep.subr.msk.mxu0 %vm427_vm2, %v5567_v6 }
  0xcb   : > { %4995 = vmatmul.mubr.msk.f32.gmra.mxu0 %vm330_vm3, %v311_v54  ;;  %5063 = vmatmul.mubr.msk.f32.gmra.mxu1 %vm330_vm3, %v4226_v55  ;;  %v4353_v54 = vld [vmem:[%s7438_s1 + $0x350] sm:$0xff]  ;;  %v4290_v55 = vld [vmem:[%s7438_s1 + $0x260] sm:$0xff] }
  0xcc   : > { %4997 = vmatprep.mubr.msk.f32.mxu0 %vm330_vm3, %v312_v56  ;;  %5065 = vmatprep.mubr.msk.f32.mxu1 %vm330_vm3, %v4227_v57  ;;  %v4355_v56 = vld [vmem:[%s7438_s1 + $0x360] sm:$0xff]  ;;  %v4291_v57 = vld [vmem:[%s7438_s1 + $0x268] sm:$0xff] }
  0xcf   : > { %4998 = vmatmul.mubr.msk.f32.gmra.mxu0 %vm330_vm3, %v313_v58  ;;  %5066 = vmatmul.mubr.msk.f32.gmra.mxu1 %vm330_vm3, %v4228_v59  ;;  %v4356_v58 = vld [vmem:[%s7438_s1 + $0x368] sm:$0xff]  ;;  %v4357_v59 = vld [vmem:[%s7438_s1 + $0x370] sm:$0xff] }
  0xd0   : > { %5000 = vmatprep.mubr.msk.f32.mxu0 %vm330_vm3, %v314_v60  ;;  %5068 = vmatprep.mubr.msk.f32.mxu1 %vm330_vm3, %v4229_v61  ;;  %v4293_v60 = vld [vmem:[%s7438_s1 + $0x278] sm:$0xff]  ;;  %v4294_v61 = vld [vmem:[%s7438_s1 + $0x280] sm:$0xff] }
  0xd3   : > { %5001 = vmatmul.mubr.msk.f32.gmra.mxu0 %vm330_vm3, %v315_v62  ;;  %5069 = vmatmul.mubr.msk.f32.gmra.mxu1 %vm330_vm3, %v4230_v63  ;;  %v4358_v62 = vld [vmem:[%s7438_s1 + $0x378] sm:$0xff]  ;;  %v4359_v63 = vld [vmem:[%s7438_s1 + $0x380] sm:$0xff] }
  0xd4   : > { %5003 = vmatprep.mubr.msk.f32.mxu0 %vm330_vm3, %v316_v2  ;;  %5071 = vmatprep.mubr.msk.f32.mxu1 %vm330_vm3, %v4231_v3  ;;  %v4295_v2 = vld [vmem:[%s7438_s1 + $0x288] sm:$0xff]  ;;  %v4296_v3 = vld [vmem:[%s7438_s1 + $0x290] sm:$0xff] }
  0xd7   : > { %5004 = vmatmul.mubr.msk.f32.gmra.mxu0 %vm330_vm3, %v317_v4  ;;  %5072 = vmatmul.mubr.msk.f32.gmra.mxu1 %vm330_vm3, %v4232_v5  ;;  %v4360_v4 = vld [vmem:[%s7438_s1 + $0x388] sm:$0xff]  ;;  %v4361_v5 = vld [vmem:[%s7438_s1 + $0x390] sm:$0xff] }
  0xd8   : > { %5006 = vmatprep.mubr.msk.f32.mxu0 %vm330_vm3, %v318_v7  ;;  %5074 = vmatprep.mubr.msk.f32.mxu1 %vm330_vm3, %v4233_v8  ;;  %v4297_v7 = vld [vmem:[%s7438_s1 + $0x298] sm:$0xff]  ;;  %v4298_v8 = vld [vmem:[%s7438_s1 + $0x2a0] sm:$0xff] }
  0xdb   : > { %5007 = vmatmul.mubr.msk.f32.gmra.mxu0 %vm330_vm3, %v319_v9  ;;  %5075 = vmatmul.mubr.msk.f32.gmra.mxu1 %vm330_vm3, %v4234_v10  ;;  %v4362_v9 = vld [vmem:[%s7438_s1 + $0x398] sm:$0xff]  ;;  %v4363_v10 = vld [vmem:[%s7438_s1 + $0x3a0] sm:$0xff] }
  0xdc   : > { %5009 = vmatprep.mubr.msk.f32.mxu0 %vm330_vm3, %v320_v11  ;;  %5077 = vmatprep.mubr.msk.f32.mxu1 %vm330_vm3, %v4235_v12  ;;  %v4299_v11 = vld [vmem:[%s7438_s1 + $0x2a8] sm:$0xff]  ;;  %v4300_v12 = vld [vmem:[%s7438_s1 + $0x2b0] sm:$0xff] }
  0xdf   : > { %5010 = vmatmul.mubr.msk.f32.gmra.mxu0 %vm330_vm3, %v321_v13  ;;  %5078 = vmatmul.mubr.msk.f32.gmra.mxu1 %vm330_vm3, %v4236_v14  ;;  %v4364_v13 = vld [vmem:[%s7438_s1 + $0x3a8] sm:$0xff]  ;;  %v4365_v14 = vld [vmem:[%s7438_s1 + $0x3b0] sm:$0xff] }
  0xe0   : > { %5012 = vmatprep.mubr.msk.f32.mxu0 %vm330_vm3, %v322_v15  ;;  %5080 = vmatprep.mubr.msk.f32.mxu1 %vm330_vm3, %v4237_v16  ;;  %v4301_v15 = vld [vmem:[%s7438_s1 + $0x2b8] sm:$0xff]  ;;  %v4302_v16 = vld [vmem:[%s7438_s1 + $0x2c0] sm:$0xff] }
  0xe3   : > { %5013 = vmatmul.mubr.msk.f32.gmra.mxu0 %vm330_vm3, %v323_v17  ;;  %5081 = vmatmul.mubr.msk.f32.gmra.mxu1 %vm330_vm3, %v4238_v19  ;;  %v4366_v17 = vld [vmem:[%s7438_s1 + $0x3b8] sm:$0xff]  ;;  %v4367_v19 = vld [vmem:[%s7438_s1 + $0x3c0] sm:$0xff] }
  0xe4   : > { %5015 = vmatprep.mubr.msk.f32.mxu0 %vm330_vm3, %v324_v20  ;;  %5083 = vmatprep.mubr.msk.f32.mxu1 %vm330_vm3, %v4239_v22  ;;  %v4303_v20 = vld [vmem:[%s7438_s1 + $0x2c8] sm:$0xff]  ;;  %v4304_v22 = vld [vmem:[%s7438_s1 + $0x2d0] sm:$0xff] }
  0xe7   : > { %5016 = vmatmul.mubr.msk.f32.gmra.mxu0 %vm330_vm3, %v325_v30  ;;  %5084 = vmatmul.mubr.msk.f32.gmra.mxu1 %vm330_vm3, %v4240_v31  ;;  %v4368_v30 = vld [vmem:[%s7438_s1 + $0x3c8] sm:$0xff]  ;;  %v4369_v31 = vld [vmem:[%s7438_s1 + $0x3d0] sm:$0xff] }
  0xe8   : > { %5018 = vmatprep.mubr.msk.f32.mxu0 %vm330_vm3, %v326_v32  ;;  %5086 = vmatprep.mubr.msk.f32.mxu1 %vm330_vm3, %v4241_v33  ;;  %v4305_v32 = vld [vmem:[%s7438_s1 + $0x2d8] sm:$0xff]  ;;  %v4306_v33 = vld [vmem:[%s7438_s1 + $0x2e0] sm:$0xff] }
  0xeb   : > { %5019 = vmatmul.mubr.msk.f32.gmra.mxu0 %vm330_vm3, %v327_v34  ;;  %5087 = vmatmul.mubr.msk.f32.gmra.mxu1 %vm330_vm3, %v4242_v35  ;;  %v4370_v34 = vld [vmem:[%s7438_s1 + $0x3d8] sm:$0xff]  ;;  %v4371_v35 = vld [vmem:[%s7438_s1 + $0x3e0] sm:$0xff] }
  0xec   : > { %5021 = vmatprep.mubr.msk.f32.mxu0 %vm330_vm3, %v328_v36  ;;  %5089 = vmatprep.mubr.msk.f32.mxu1 %vm330_vm3, %v4243_v37  ;;  %v4307_v36 = vld [vmem:[%s7438_s1 + $0x2e8] sm:$0xff]  ;;  %v4308_v37 = vld [vmem:[%s7438_s1 + $0x2f0] sm:$0xff] }
  0xef   : > { %5022 = vmatmul.mubr.msk.f32.gmra.mxu0 %vm330_vm3, %v329_v38  ;;  %5090 = vmatmul.mubr.msk.f32.gmra.mxu1 %vm330_vm3, %v4244_v39  ;;  %v4372_v38 = vld [vmem:[%s7438_s1 + $0x3e8] sm:$0xff]  ;;  %v4373_v39 = vld [vmem:[%s7438_s1 + $0x3f0] sm:$0xff] }
  0xf0   : > { %5112 = vmatprep.mubr.msk.f32.mxu0 %vm330_vm3, %v4278_v40  ;;  %5180 = vmatprep.mubr.msk.f32.mxu1 %vm330_vm3, %v4343_v41  ;;  %v4309_v40 = vld [vmem:[%s7438_s1 + $0x2f8] sm:$0xff]  ;;  %v4408_v41 = vld [vmem:[%s7438_s1 + $0x400] sm:$0xff] }
  0xf3   : > { %5113 = vmatmul.mubr.msk.f32.vlgmr.msra.gmra.mxu0 %vm330_vm3, %v4279_v42  ;;  %5181 = vmatmul.mubr.msk.f32.vlgmr.msra.gmra.mxu1 %vm330_vm3, %v4344_v43  ;;  %v4374_v42 = vld [vmem:[%s7438_s1 + $0x3f8] sm:$0xff]  ;;  %v4409_v43 = vld [vmem:[%s7438_s1 + $0x408] sm:$0xff] }
  0xf4   : > { %5229 = vmatpush3.msk.msra.mxu0 %vm427_vm2, %v5567_v6  ;;  %5115 = vmatprep.mubr.msk.f32.mxu0 %vm330_vm3, %v4280_v44  ;;  %v4346_v6 = vld [vmem:[%s7438_s1 + $0x318] sm:$0xff]  ;;  %v4410_v44 = vld [vmem:[%s7438_s1 + $0x410] sm:$0xff] }
  0xf5   : > { %5230 = vmatprep.subr.mxu0 %v5595_v18  ;;  %5183 = vmatprep.mubr.msk.f32.mxu1 %vm330_vm3, %v4345_v45  ;;  %v4411_v45 = vld [vmem:[%s7438_s1 + $0x418] sm:$0xff] }
  0xf6   : > { %5231 = vmatpush3.msra.mxu0 %v5595_v18  ;;  %v4283_v18 = vld [vmem:[%s7438_s1 + $0x228] sm:$0xff] }
  0xf7   : > { %5232 = vmatprep.subr.mxu0 %v5603_v21  ;;  %5116 = vmatmul.mubr.msk.f32.gmra.mxu0 %vm330_vm3, %v4281_v46  ;;  %v4412_v46 = vld [vmem:[%s7438_s1 + $0x420] sm:$0xff] }
  0xf8   : > { %5233 = vmatpush3.msra.mxu0 %v5603_v21  ;;  %5118 = vmatprep.mubr.msk.f32.mxu0 %vm330_vm3, %v4282_v47  ;;  %v4348_v21 = vld [vmem:[%s7438_s1 + $0x328] sm:$0xff] }
  0xf9   : > { %5234 = vmatprep.subr.mxu0 %v5611_v23  ;;  %5184 = vmatmul.mubr.msk.f32.gmra.mxu1 %vm330_vm3, %v4346_v6  ;;  %v4413_v47 = vld [vmem:[%s7438_s1 + $0x428] sm:$0xff]  ;;  %v4414_v6 = vld [vmem:[%s7438_s1 + $0x430] sm:$0xff] }
  0xfa   : > { %5235 = vmatpush3.msra.mxu0 %v5611_v23  ;;  %5186 = vmatprep.mubr.msk.f32.mxu1 %vm330_vm3, %v4347_v48  ;;  %v4285_v23 = vld [vmem:[%s7438_s1 + $0x238] sm:$0xff] }
  0xfb   : > { %5236 = vmatprep.subr.mxu0 %v5617_v24  ;;  %5119 = vmatmul.mubr.msk.f32.gmra.mxu0 %vm330_vm3, %v4283_v18  ;;  %v4415_v48 = vld [vmem:[%s7438_s1 + $0x438] sm:$0xff]  ;;  %v4416_v18 = vld [vmem:[%s7438_s1 + $0x440] sm:$0xff] }
  0xfc   : > { %5237 = vmatpush3.msra.mxu0 %v5617_v24  ;;  %5121 = vmatprep.mubr.msk.f32.mxu0 %vm330_vm3, %v4284_v49  ;;  %v4350_v24 = vld [vmem:[%s7438_s1 + $0x338] sm:$0xff]  ;;  %v4417_v49 = vld [vmem:[%s7438_s1 + $0x448] sm:$0xff] }
  0xfd   : > { %5238 = vmatprep.subr.mxu0 %v5623_v25  ;;  %5187 = vmatmul.mubr.msk.f32.gmra.mxu1 %vm330_vm3, %v4348_v21  ;;  %v4418_v21 = vld [vmem:[%s7438_s1 + $0x450] sm:$0xff] }
  0xfe   : > { %5239 = vmatpush3.msra.mxu0 %v5623_v25  ;;  %5189 = vmatprep.mubr.msk.f32.mxu1 %vm330_vm3, %v4349_v50  ;;  %v4287_v25 = vld [vmem:[%s7438_s1 + $0x248] sm:$0xff]  ;;  %v4419_v50 = vld [vmem:[%s7438_s1 + $0x458] sm:$0xff] }
  0xff   : > { %5240 = vmatprep.subr.mxu0 %v5629_v26  ;;  %5122 = vmatmul.mubr.msk.f32.gmra.mxu0 %vm330_vm3, %v4285_v23  ;;  %v4420_v23 = vld [vmem:[%s7438_s1 + $0x460] sm:$0xff] }
 0x100   : > { %5241 = vmatpush3.msra.mxu0 %v5629_v26  ;;  %5124 = vmatprep.mubr.msk.f32.mxu0 %vm330_vm3, %v4286_v51  ;;  %v4352_v26 = vld [vmem:[%s7438_s1 + $0x348] sm:$0xff] }
 0x101   : > { %5242 = vmatprep.subr.mxu0 %v5635_v27  ;;  %5190 = vmatmul.mubr.msk.f32.gmra.mxu1 %vm330_vm3, %v4350_v24  ;;  %v4421_v51 = vld [vmem:[%s7438_s1 + $0x468] sm:$0xff]  ;;  %v4422_v24 = vld [vmem:[%s7438_s1 + $0x470] sm:$0xff] }
 0x102   : > { %5243 = vmatpush3.msra.mxu0 %v5635_v27  ;;  %5192 = vmatprep.mubr.msk.f32.mxu1 %vm330_vm3, %v4351_v52  ;;  %v4289_v27 = vld [vmem:[%s7438_s1 + $0x258] sm:$0xff] }
 0x103   : > { %5244 = vmatprep.subr.mxu0 %v5641_v28  ;;  %5125 = vmatmul.mubr.msk.f32.gmra.mxu0 %vm330_vm3, %v4287_v25  ;;  %v4423_v52 = vld [vmem:[%s7438_s1 + $0x478] sm:$0xff]  ;;  %v4424_v25 = vld [vmem:[%s7438_s1 + $0x480] sm:$0xff] }
 0x104   : > { %5245 = vmatpush3.msra.mxu0 %v5641_v28  ;;  %5127 = vmatprep.mubr.msk.f32.mxu0 %vm330_vm3, %v4288_v53  ;;  %v4354_v28 = vld [vmem:[%s7438_s1 + $0x358] sm:$0xff]  ;;  %v4425_v53 = vld [vmem:[%s7438_s1 + $0x488] sm:$0xff] }
 0x105   : > { %5246 = vmatprep.subr.mxu0 %v5647_v29  ;;  %5193 = vmatmul.mubr.msk.f32.gmra.mxu1 %vm330_vm3, %v4352_v26  ;;  %v4426_v26 = vld [vmem:[%s7438_s1 + $0x490] sm:$0xff] }
 0x106   : > { %5247 = vmatpush3.msra.mxu0 %v5647_v29  ;;  %5195 = vmatprep.mubr.msk.f32.mxu1 %vm330_vm3, %v4353_v54  ;;  %v4292_v29 = vld [vmem:[%s7438_s1 + $0x270] sm:$0xff]  ;;  %v4427_v54 = vld [vmem:[%s7438_s1 + $0x498] sm:$0xff] }
 0x107   : > { %5128 = vmatmul.mubr.msk.f32.gmra.mxu0 %vm330_vm3, %v4289_v27  ;;  %v4428_v27 = vld [vmem:[%s7438_s1 + $0x4a0] sm:$0xff] }
 0x108   : > { %5130 = vmatprep.mubr.msk.f32.mxu0 %vm330_vm3, %v4290_v55  ;;  %v4429_v55 = vld [vmem:[%s7438_s1 + $0x4a8] sm:$0xff] }
 0x109   : > { %5196 = vmatmul.mubr.msk.f32.gmra.mxu1 %vm330_vm3, %v4354_v28  ;;  %v4430_v28 = vld [vmem:[%s7438_s1 + $0x4b0] sm:$0xff] }
 0x10a   : > { %5198 = vmatprep.mubr.msk.f32.mxu1 %vm330_vm3, %v4355_v56  ;;  %v4431_v56 = vld [vmem:[%s7438_s1 + $0x4b8] sm:$0xff] }
 0x10b   : > { %5131 = vmatmul.mubr.msk.f32.gmra.mxu0 %vm330_vm3, %v4291_v57  ;;  %v4432_v57 = vld [vmem:[%s7438_s1 + $0x4c0] sm:$0xff] }
 0x10c   : > { %5133 = vmatprep.mubr.msk.f32.mxu0 %vm330_vm3, %v4292_v29  ;;  %v4433_v29 = vld [vmem:[%s7438_s1 + $0x4c8] sm:$0xff] }
 0x10d   : > { %5199 = vmatmul.mubr.msk.f32.gmra.mxu1 %vm330_vm3, %v4356_v58  ;;  %v4434_v58 = vld [vmem:[%s7438_s1 + $0x4d0] sm:$0xff] }
 0x10e   : > { %5201 = vmatprep.mubr.msk.f32.mxu1 %vm330_vm3, %v4357_v59  ;;  %v4435_v59 = vld [vmem:[%s7438_s1 + $0x4d8] sm:$0xff] }
 0x10f   : > { %5134 = vmatmul.mubr.msk.f32.gmra.mxu0 %vm330_vm3, %v4293_v60  ;;  %v4436_v60 = vld [vmem:[%s7438_s1 + $0x4e0] sm:$0xff] }
 0x110   : > { %5136 = vmatprep.mubr.msk.f32.mxu0 %vm330_vm3, %v4294_v61  ;;  %v4437_v61 = vld [vmem:[%s7438_s1 + $0x4e8] sm:$0xff] }
 0x111   : > { %5202 = vmatmul.mubr.msk.f32.gmra.mxu1 %vm330_vm3, %v4358_v62 }
 0x112   : > { %5204 = vmatprep.mubr.msk.f32.mxu1 %vm330_vm3, %v4359_v63 }
 0x113   : > { %5137 = vmatmul.mubr.msk.f32.gmra.mxu0 %vm330_vm3, %v4295_v2  ;;  %v4438_v2 = vld [vmem:[%s7438_s1 + $0x4f0] sm:$0xff] }
 0x114   : > { %5139 = vmatprep.mubr.msk.f32.mxu0 %vm330_vm3, %v4296_v3 }
 0x115   : > { %5205 = vmatmul.mubr.msk.f32.gmra.mxu1 %vm330_vm3, %v4360_v4 }
 0x116   : > { %5207 = vmatprep.mubr.msk.f32.mxu1 %vm330_vm3, %v4361_v5  ;;  %v4439_v5 = vld [vmem:[%s7438_s1 + $0x4f8] sm:$0xff] }
 0x117   : > { %5140 = vmatmul.mubr.msk.f32.gmra.mxu0 %vm330_vm3, %v4297_v7 }
 0x118   : > { %5142 = vmatprep.mubr.msk.f32.mxu0 %vm330_vm3, %v4298_v8 }
 0x119   : > { %5208 = vmatmul.mubr.msk.f32.gmra.mxu1 %vm330_vm3, %v4362_v9 }
 0x11a   : > { %5210 = vmatprep.mubr.msk.f32.mxu1 %vm330_vm3, %v4363_v10 }
 0x11b   : > { %5143 = vmatmul.mubr.msk.f32.gmra.mxu0 %vm330_vm3, %v4299_v11 }
 0x11c   : > { %5145 = vmatprep.mubr.msk.f32.mxu0 %vm330_vm3, %v4300_v12 }
 0x11d   : > { %5211 = vmatmul.mubr.msk.f32.gmra.mxu1 %vm330_vm3, %v4364_v13 }
 0x11e   : > { %5213 = vmatprep.mubr.msk.f32.mxu1 %vm330_vm3, %v4365_v14 }
 0x11f   : > { %5146 = vmatmul.mubr.msk.f32.gmra.mxu0 %vm330_vm3, %v4301_v15 }
 0x120   : > { %5148 = vmatprep.mubr.msk.f32.mxu0 %vm330_vm3, %v4302_v16 }
 0x121   : > { %5214 = vmatmul.mubr.msk.f32.gmra.mxu1 %vm330_vm3, %v4366_v17 }
 0x122   : > { %5216 = vmatprep.mubr.msk.f32.mxu1 %vm330_vm3, %v4367_v19 }
 0x123   : > { %5149 = vmatmul.mubr.msk.f32.gmra.mxu0 %vm330_vm3, %v4303_v20 }
 0x124   : > { %5151 = vmatprep.mubr.msk.f32.mxu0 %vm330_vm3, %v4304_v22 }
 0x125   : > { %5217 = vmatmul.mubr.msk.f32.gmra.mxu1 %vm330_vm3, %v4368_v30 }
 0x126   : > { %5219 = vmatprep.mubr.msk.f32.mxu1 %vm330_vm3, %v4369_v31 }
 0x127   : > { %5152 = vmatmul.mubr.msk.f32.gmra.mxu0 %vm330_vm3, %v4305_v32 }
 0x128   : > { %5154 = vmatprep.mubr.msk.f32.mxu0 %vm330_vm3, %v4306_v33 }
 0x129   : > { %5220 = vmatmul.mubr.msk.f32.gmra.mxu1 %vm330_vm3, %v4370_v34 }
 0x12a   : > { %5222 = vmatprep.mubr.msk.f32.mxu1 %vm330_vm3, %v4371_v35 }
 0x12b   : > { %5155 = vmatmul.mubr.msk.f32.gmra.mxu0 %vm330_vm3, %v4307_v36 }
 0x12c   : > { %5157 = vmatprep.mubr.msk.f32.mxu0 %vm330_vm3, %v4308_v37 }
 0x12d   : > { %5223 = vmatmul.mubr.msk.f32.gmra.mxu1 %vm330_vm3, %v4372_v38 }
 0x12e   : > { %5225 = vmatprep.mubr.msk.f32.mxu1 %vm330_vm3, %v4373_v39 }
 0x12f   : > { %5158 = vmatmul.mubr.msk.f32.gmra.mxu0 %vm330_vm3, %v4309_v40 }
 0x130   : > { %5248 = vmatprep.mubr.msk.f32.mxu0 %vm330_vm3, %v4408_v41 }
 0x131   : > { %5226 = vmatmul.mubr.msk.f32.gmra.mxu1 %vm330_vm3, %v4374_v42 }
 0x133   : > { %5249 = vmatmul.mubr.msk.f32.vlgmr.msra.gmra.mxu0 %vm330_vm3, %v4409_v43 }
 0x134   : > { %5251 = vmatprep.mubr.msk.f32.mxu0 %vm330_vm3, %v4410_v44 }
 0x137   : > { %5252 = vmatmul.mubr.msk.f32.gmra.mxu0 %vm330_vm3, %v4411_v45 }
 0x138   : > { %5254 = vmatprep.mubr.msk.f32.mxu0 %vm330_vm3, %v4412_v46 }
 0x13b   : > { %5255 = vmatmul.mubr.msk.f32.gmra.mxu0 %vm330_vm3, %v4413_v47 }
 0x13c   : > { %5257 = vmatprep.mubr.msk.f32.mxu0 %vm330_vm3, %v4414_v6 }
 0x13f   : > { %5258 = vmatmul.mubr.msk.f32.gmra.mxu0 %vm330_vm3, %v4415_v48 }
 0x140   : > { %5260 = vmatprep.mubr.msk.f32.mxu0 %vm330_vm3, %v4416_v18 }
 0x143   : > { %5261 = vmatmul.mubr.msk.f32.gmra.mxu0 %vm330_vm3, %v4417_v49 }
 0x144   : > { %5263 = vmatprep.mubr.msk.f32.mxu0 %vm330_vm3, %v4418_v21 }
 0x147   : > { %5264 = vmatmul.mubr.msk.f32.gmra.mxu0 %vm330_vm3, %v4419_v50 }
 0x148   : > { %5266 = vmatprep.mubr.msk.f32.mxu0 %vm330_vm3, %v4420_v23 }
 0x14b   : > { %5267 = vmatmul.mubr.msk.f32.gmra.mxu0 %vm330_vm3, %v4421_v51 }
 0x14c   : > { %5269 = vmatprep.mubr.msk.f32.mxu0 %vm330_vm3, %v4422_v24 }
 0x14f   : > { %5270 = vmatmul.mubr.msk.f32.gmra.mxu0 %vm330_vm3, %v4423_v52 }
 0x150   : > { %5272 = vmatprep.mubr.msk.f32.mxu0 %vm330_vm3, %v4424_v25 }
 0x153   : > { %5273 = vmatmul.mubr.msk.f32.gmra.mxu0 %vm330_vm3, %v4425_v53 }
 0x154   : > { %5275 = vmatprep.mubr.msk.f32.mxu0 %vm330_vm3, %v4426_v26 }
 0x157   : > { %5276 = vmatmul.mubr.msk.f32.gmra.mxu0 %vm330_vm3, %v4427_v54 }
 0x158   : > { %5278 = vmatprep.mubr.msk.f32.mxu0 %vm330_vm3, %v4428_v27 }
 0x15b   : > { %5279 = vmatmul.mubr.msk.f32.gmra.mxu0 %vm330_vm3, %v4429_v55 }
 0x15c   : > { %5281 = vmatprep.mubr.msk.f32.mxu0 %vm330_vm3, %v4430_v28 }
 0x15f   : > { %5282 = vmatmul.mubr.msk.f32.gmra.mxu0 %vm330_vm3, %v4431_v56 }
 0x160   : > { %5284 = vmatprep.mubr.msk.f32.mxu0 %vm330_vm3, %v4432_v57 }
 0x163   : > { %5285 = vmatmul.mubr.msk.f32.gmra.mxu0 %vm330_vm3, %v4433_v29 }
 0x164   : > { %5287 = vmatprep.mubr.msk.f32.mxu0 %vm330_vm3, %v4434_v58 }
 0x167   : > { %5288 = vmatmul.mubr.msk.f32.gmra.mxu0 %vm330_vm3, %v4435_v59 }
 0x168   : > { %5290 = vmatprep.mubr.msk.f32.mxu0 %vm330_vm3, %v4436_v60 }
 0x169   : > { %v6342_v62 = vpop.f32.mrf.mxu0  ;;  %v5046_v63 = vpop.f32.mrf.mxu1 }
 0x16a   : > { %7449 = vst [vmem:[#allocation7_spill] sm:$0xff] %v6342_v62  ;;  %1076 = vrot.lane.b32.xlu0 %v5046_v63, %s5462_s14 }
 0x16b   : > { %v6348_v3 = vpop.f32.mrf.mxu0  ;;  %v883_v4 = vpop.f32.mrf.mxu1  ;;  %5291 = vmatmul.mubr.msk.f32.gmra.mxu0 %vm330_vm3, %v4437_v61 }
 0x16c   : > { %7450 = vst [vmem:[#allocation8_spill] sm:$0xff] %v6348_v3  ;;  %5293 = vmatprep.mubr.msk.f32.mxu0 %vm330_vm3, %v4438_v2 }
 0x16e   : > { %1074 = vrot.lane.b32.xlu0 %v883_v4, %s5462_s14 }
 0x16f   : > { %v6356_v7 = vpop.f32.mrf.mxu0  ;;  %v5049_v8 = vpop.f32.mrf.mxu1  ;;  %5294 = vmatmul.mubr.msk.f32.gmra.mxu0 %vm330_vm3, %v4439_v5 }
 0x170   : > { %7451 = vst [vmem:[#allocation9_spill] sm:$0xff] %v6356_v7 }
 0x171   : > { %v6359_v9 = vpop.f32.mrf.mxu0  ;;  %v893_v10 = vpop.f32.mrf.mxu1 }
 0x172   : > { %7452 = vst [vmem:[#allocation10_spill] sm:$0xff] %v6359_v9  ;;  %1080 = vrot.lane.b32.xlu0 %v5049_v8, %s5462_s14 }
 0x175   : > { %v6362_v11 = vpop.f32.mrf.mxu0  ;;  %v5052_v12 = vpop.f32.mrf.mxu1 }
 0x176   : > { %1078 = vrot.lane.b32.xlu0 %v893_v10, %s5462_s14 }
 0x177   : > { %v6365_v13 = vpop.f32.mrf.mxu0  ;;  %v903_v14 = vpop.f32.mrf.mxu1 }
 0x17a   : > { %1084 = vrot.lane.b32.xlu0 %v5052_v12, %s5462_s14 }
 0x17b   : > { %v6368_v15 = vpop.f32.mrf.mxu0  ;;  %v5055_v16 = vpop.f32.mrf.mxu1 }
 0x17d   : > { %v6370_v17 = vpop.f32.mrf.mxu0  ;;  %v913_v19 = vpop.f32.mrf.mxu1 }
 0x17e   : > { %1082 = vrot.lane.b32.xlu0 %v903_v14, %s5462_s14 }
 0x181   : > { %v6373_v20 = vpop.f32.mrf.mxu0  ;;  %v5058_v22 = vpop.f32.mrf.mxu1 }
 0x182   : > { %1088 = vrot.lane.b32.xlu0 %v5055_v16, %s5462_s14 }
 0x183   : > { %v6376_v30 = vpop.f32.mrf.mxu0  ;;  %v923_v31 = vpop.f32.mrf.mxu1 }
 0x186   : > { %1086 = vrot.lane.b32.xlu0 %v913_v19, %s5462_s14 }
 0x187   : > { %v6379_v32 = vpop.f32.mrf.mxu0  ;;  %v5061_v33 = vpop.f32.mrf.mxu1 }
 0x189   : > { %v6381_v34 = vpop.f32.mrf.mxu0  ;;  %v933_v35 = vpop.f32.mrf.mxu1 }
 0x18a   : > { %1092 = vrot.lane.b32.xlu0 %v5058_v22, %s5462_s14 }
 0x18b   : > { %v6384_v36 = vpop.f32.mrf.mxu0  ;;  %v5064_v37 = vpop.f32.mrf.mxu1 }
 0x18c   : > { %1100 = vrot.lane.b32.xlu1 %v5064_v37, %s5462_s14 }
 0x18d   : > { %v6387_v38 = vpop.f32.mrf.mxu0  ;;  %v943_v39 = vpop.f32.mrf.mxu1 }
 0x18e   : > { %1090 = vrot.lane.b32.xlu0 %v923_v31, %s5462_s14 }
 0x18f   : > { %v6390_v40 = vpop.f32.mrf.mxu0  ;;  %v5067_v41 = vpop.f32.mrf.mxu1 }
 0x190   : > { %1104 = vrot.lane.b32.xlu1 %v5067_v41, %s5462_s14 }
 0x191   : > { %v6393_v42 = vpop.f32.mrf.mxu0  ;;  %v953_v43 = vpop.f32.mrf.mxu1 }
 0x192   : > { %1096 = vrot.lane.b32.xlu0 %v5061_v33, %s5462_s14 }
 0x193   : > { %v6396_v44 = vpop.f32.mrf.mxu0  ;;  %v5070_v45 = vpop.f32.mrf.mxu1 }
 0x194   : > { %7453 = vst [vmem:[#allocation11_spill] sm:$0xff] %v6396_v44 }
 0x195   : > { %v6398_v46 = vpop.f32.mrf.mxu0  ;;  %v963_v47 = vpop.f32.mrf.mxu1 }
 0x196   : > { %7454 = vst [vmem:[#allocation12_spill] sm:$0xff] %v6398_v46  ;;  %1094 = vrot.lane.b32.xlu0 %v933_v35, %s5462_s14 }
 0x197   : > { %v6401_v6 = vpop.f32.mrf.mxu0  ;;  %v5073_v48 = vpop.f32.mrf.mxu1 }
 0x199   : > { %v6403_v18 = vpop.f32.mrf.mxu0  ;;  %v973_v49 = vpop.f32.mrf.mxu1 }
 0x19a   : > { %7455 = vst [vmem:[#allocation13_spill] sm:$0xff] %v6403_v18  ;;  %1098 = vrot.lane.b32.xlu0 %v943_v39, %s5462_s14 }
 0x19b   : > { %v6406_v21 = vpop.f32.mrf.mxu0  ;;  %v5076_v50 = vpop.f32.mrf.mxu1 }
 0x19c   : > { %7456 = vst [vmem:[#allocation14_spill] sm:$0xff] %v6406_v21 }
 0x19d   : > { %v6408_v23 = vpop.f32.mrf.mxu0  ;;  %v983_v51 = vpop.f32.mrf.mxu1 }
 0x19e   : > { %7457 = vst [vmem:[#allocation15_spill] sm:$0xff] %v6408_v23  ;;  %1102 = vrot.lane.b32.xlu0 %v953_v43, %s5462_s14 }
 0x19f   : > { %v6411_v24 = vpop.f32.mrf.mxu0  ;;  %v5079_v52 = vpop.f32.mrf.mxu1 }
 0x1a0   : > { %7458 = vst [vmem:[#allocation16_spill] sm:$0xff] %v6411_v24 }
 0x1a1   : > { %v6413_v25 = vpop.f32.mrf.mxu0  ;;  %v993_v53 = vpop.f32.mrf.mxu1 }
 0x1a2   : > { %7459 = vst [vmem:[#allocation17_spill] sm:$0xff] %v6413_v25  ;;  %1108 = vrot.lane.b32.xlu0 %v5070_v45, %s5462_s14 }
 0x1a3   : > { %v6416_v26 = vpop.f32.mrf.mxu0  ;;  %v5082_v54 = vpop.f32.mrf.mxu1 }
 0x1a4   : > { %7460 = vst [vmem:[#allocation18_spill] sm:$0xff] %v6416_v26 }
 0x1a5   : > { %v6418_v27 = vpop.f32.mrf.mxu0  ;;  %v1003_v55 = vpop.f32.mrf.mxu1 }
 0x1a6   : > { %7461 = vst [vmem:[#allocation19_spill] sm:$0xff] %v6418_v27  ;;  %1106 = vrot.lane.b32.xlu0 %v963_v47, %s5462_s14 }
 0x1a7   : > { %v6421_v28 = vpop.f32.mrf.mxu0  ;;  %v5085_v56 = vpop.f32.mrf.mxu1 }
 0x1a8   : > { %7462 = vst [vmem:[#allocation20_spill] sm:$0xff] %v6421_v28 }
 0x1a9   : > { %v6423_v57 = vpop.f32.mrf.mxu0  ;;  %v1013_v29 = vpop.f32.mrf.mxu1 }
 0x1aa   : > { %7463 = vst [vmem:[#allocation21_spill] sm:$0xff] %v6423_v57  ;;  %1112 = vrot.lane.b32.xlu0 %v5073_v48, %s5462_s14 }
 0x1ab   : > { %v6426_v58 = vpop.f32.mrf.mxu0  ;;  %v5088_v59 = vpop.f32.mrf.mxu1 }
 0x1ac   : > { %7464 = vst [vmem:[#allocation22_spill] sm:$0xff] %v6426_v58 }
 0x1ad   : > { %v6428_v60 = vpop.f32.mrf.mxu0  ;;  %v1023_v61 = vpop.f32.mrf.mxu1 }
 0x1ae   : > { %7465 = vst [vmem:[#allocation23_spill] sm:$0xff] %v6428_v60  ;;  %1110 = vrot.lane.b32.xlu0 %v973_v49, %s5462_s14 }
 0x1af   : > { %v6431_v63 = vpop.f32.mrf.mxu0  ;;  %v5091_v2 = vpop.f32.mrf.mxu1 }
 0x1b0   : > { %7466 = vst [vmem:[#allocation24_spill] sm:$0xff] %v6431_v63 }
 0x1b1   : > { %v6433_v4 = vpop.f32.mrf.mxu0  ;;  %v1033_v5 = vpop.f32.mrf.mxu1 }
 0x1b2   : > { %7467 = vst [vmem:[#allocation25_spill] sm:$0xff] %v6433_v4  ;;  %1116 = vrot.lane.b32.xlu0 %v5076_v50, %s5462_s14 }
 0x1b3   : > { %v5114_v8 = vpop.f32.mrf.mxu0  ;;  %v6436_v10 = vpop.f32.mrf.mxu1 }
 0x1b4   : > { %1590 = vrot.lane.b32.xlu1 %v5114_v8, %s5463_s17 }
 0x1b5   : > { %v6439_v12 = vpop.f32.mrf.mxu0  ;;  %v6442_v16 = vpop.f32.mrf.mxu1 }
 0x1b6   : > { %1114 = vrot.lane.b32.xlu0 %v983_v51, %s5462_s14 }
 0x1b7   : > { %v5117_v14 = vpop.f32.mrf.mxu0 }
 0x1b8   : > { %1594 = vrot.lane.b32.xlu1 %v5117_v14, %s5463_s17 }
 0x1b9   : > { %v1407_v19 = vpop.f32.mrf.mxu0  ;;  %v5185_v31 = vpop.f32.mrf.mxu1 }
 0x1ba   : > { %1120 = vrot.lane.b32.xlu0 %v5079_v52, %s5462_s14 }
 0x1bb   : > { %v5120_v22 = vpop.f32.mrf.mxu0  ;;  %v6448_v37 = vpop.f32.mrf.mxu1 }
 0x1bc   : > { %1592 = vrot.lane.b32.xlu1 %v1407_v19, %s5463_s17 }
 0x1bd   : > { %v1417_v33 = vpop.f32.mrf.mxu0  ;;  %v5188_v41 = vpop.f32.mrf.mxu1 }
 0x1be   : > { %1118 = vrot.lane.b32.xlu0 %v993_v53, %s5462_s14 }
 0x1bf   : > { %v5123_v35 = vpop.f32.mrf.mxu0  ;;  %v1931_v45 = vpop.f32.mrf.mxu1 }
 0x1c0   : > { %1598 = vrot.lane.b32.xlu1 %v5120_v22, %s5463_s17 }
 0x1c1   : > { %v1427_v39 = vpop.f32.mrf.mxu0  ;;  %v5191_v49 = vpop.f32.mrf.mxu1 }
 0x1c2   : > { %1124 = vrot.lane.b32.xlu0 %v5082_v54, %s5462_s14 }
 0x1c3   : > { %v5126_v43 = vpop.f32.mrf.mxu0  ;;  %v1941_v51 = vpop.f32.mrf.mxu1 }
 0x1c4   : > { %1596 = vrot.lane.b32.xlu1 %v1417_v33, %s5463_s17 }
 0x1c5   : > { %v1437_v47 = vpop.f32.mrf.mxu0  ;;  %v5194_v53 = vpop.f32.mrf.mxu1 }
 0x1c6   : > { %1122 = vrot.lane.b32.xlu0 %v1003_v55, %s5462_s14 }
 0x1c7   : > { %v5129_v48 = vpop.f32.mrf.mxu0  ;;  %v1951_v55 = vpop.f32.mrf.mxu1 }
 0x1c8   : > { %1602 = vrot.lane.b32.xlu1 %v5123_v35, %s5463_s17 }
 0x1c9   : > { %v1447_v50 = vpop.f32.mrf.mxu0 }
 0x1ca   : > { %1128 = vrot.lane.b32.xlu0 %v5085_v56, %s5462_s14 }
 0x1cb   : > { %v5132_v52 = vpop.f32.mrf.mxu0 }
 0x1cc   : > { %1600 = vrot.lane.b32.xlu1 %v1427_v39, %s5463_s17 }
 0x1cd   : > { %v1457_v54 = vpop.f32.mrf.mxu0 }
 0x1ce   : > { %1126 = vrot.lane.b32.xlu0 %v1013_v29, %s5462_s14  ;;  %v5197_v29 = vpop.f32.mrf.mxu1 }
 0x1cf   : > { %v5135_v56 = vpop.f32.mrf.mxu0 }
 0x1d0   : > { %1606 = vrot.lane.b32.xlu1 %v5126_v43, %s5463_s17 }
 0x1d1   : > { %v1467_v8 = vpop.f32.mrf.mxu0 }
 0x1d2   : > { %1132 = vrot.lane.b32.xlu0 %v5088_v59, %s5462_s14  ;;  %v1961_v59 = vpop.f32.mrf.mxu1 }
 0x1d3   : > { %v5138_v19 = vpop.f32.mrf.mxu0 }
 0x1d4   : > { %1604 = vrot.lane.b32.xlu1 %v1437_v47, %s5463_s17 }
 0x1d6   : > { %1130 = vrot.lane.b32.xlu0 %v1023_v61, %s5462_s14  ;;  %v6471_v61 = vpop.f32.mrf.mxu0 }
 0x1d8   : > { %1610 = vrot.lane.b32.xlu1 %v5129_v48, %s5463_s17  ;;  %v5141_v35 = vpop.f32.mrf.mxu0 }
 0x1da   : > { %1136 = vrot.lane.b32.xlu0 %v5091_v2, %s5462_s14  ;;  %v5200_v2 = vpop.f32.mrf.mxu1  ;;  %v1487_v43 = vpop.f32.mrf.mxu0 }
 0x1dc   : > { %1608 = vrot.lane.b32.xlu1 %v1447_v50, %s5463_s17  ;;  %v6465_v14 = vpop.permute.xlu0 %1076  ;;  %v1971_v39 = vpop.f32.mrf.mxu1 }
 0x1dd   : > { %7468 = vst [vmem:[#allocation26_spill] sm:$0xff] %v6465_v14  ;;  %v5144_v48 = vpop.f32.mrf.mxu0 }
 0x1de   : > { %1134 = vrot.lane.b32.xlu0 %v1033_v5, %s5462_s14  ;;  %v5203_v47 = vpop.f32.mrf.mxu1 }
 0x1df   : > { %v1497_v50 = vpop.f32.mrf.mxu0 }
 0x1e0   : > { %1614 = vrot.lane.b32.xlu1 %v5132_v52, %s5463_s17  ;;  %v6469_v22 = vpop.permute.xlu0 %1074 }
 0x1e1   : > { %7469 = vst [vmem:[#allocation27_spill] sm:$0xff] %v6469_v22  ;;  %v5147_v52 = vpop.f32.mrf.mxu0 }
 0x1e2   : > { %2108 = vrot.lane.b32.xlu0 %v5185_v31, %s5464_s23 }
 0x1e4   : > { %1612 = vrot.lane.b32.xlu1 %v1457_v54, %s5463_s17  ;;  %v6475_v33 = vpop.permute.xlu0 %1080 }
 0x1e5   : > { %7470 = vst [vmem:[#allocation28_spill] sm:$0xff] %v6475_v33 }
 0x1e6   : > { %2112 = vrot.lane.b32.xlu0 %v5188_v41, %s5464_s23 }
 0x1e8   : > { %1618 = vrot.lane.b32.xlu1 %v5135_v56, %s5463_s17  ;;  %v6479_v5 = vpop.permute.xlu0 %1078 }
 0x1e9   : > { %7471 = vst [vmem:[#allocation29_spill] sm:$0xff] %v6479_v5 }
 0x1ea   : > { %2110 = vrot.lane.b32.xlu0 %v1931_v45, %s5464_s23  ;;  %v1507_v45 = vpop.f32.mrf.mxu0 }
 0x1ec   : > { %2132 = vrot.lane.b32.xlu1 %v5203_v47, %s5464_s23  ;;  %v6483_v31 = vpop.permute.xlu0 %1084  ;;  %v5150_v56 = vpop.f32.mrf.mxu0 }
 0x1ee   : > { %2116 = vrot.lane.b32.xlu0 %v5191_v49, %s5464_s23  ;;  %v1517_v49 = vpop.f32.mrf.mxu0 }
 0x1f0   : > { %1622 = vrot.lane.b32.xlu1 %v5138_v19, %s5463_s17  ;;  %v6487_v41 = vpop.permute.xlu0 %1082 }
 0x1f2   : > { %2114 = vrot.lane.b32.xlu0 %v1941_v51, %s5464_s23  ;;  %v5153_v51 = vpop.f32.mrf.mxu0 }
 0x1f4   : > { %1626 = vrot.lane.b32.xlu1 %v5141_v35, %s5463_s17  ;;  %v6491_v54 = vpop.permute.xlu0 %1088 }
 0x1f6   : > { %2120 = vrot.lane.b32.xlu0 %v5194_v53, %s5464_s23  ;;  %v1527_v53 = vpop.f32.mrf.mxu0 }
 0x1f8   : > { %1624 = vrot.lane.b32.xlu1 %v1487_v43, %s5463_s17  ;;  %v6495_v47 = vpop.permute.xlu0 %1086  ;;  %v5156_v43 = vpop.f32.mrf.mxu0 }
 0x1fa   : > { %2118 = vrot.lane.b32.xlu0 %v1951_v55, %s5464_s23  ;;  %v1537_v55 = vpop.f32.mrf.mxu0 }
 0x1fc   : > { %1630 = vrot.lane.b32.xlu1 %v5144_v48, %s5463_s17  ;;  %v6499_v19 = vpop.permute.xlu0 %1092  ;;  %v5159_v0 = vpop.f32.mrf.mxu0 }
 0x1fe   : > { %2124 = vrot.lane.b32.xlu0 %v5197_v29, %s5464_s23  ;;  %v1981_v29 = vpop.f32.mrf.mxu1  ;;  %v6540_v62 = vpop.permute.xlu1 %1100 }
 0x200   : > { %1628 = vrot.lane.b32.xlu1 %v1497_v50, %s5463_s17  ;;  %v6503_v35 = vpop.permute.xlu0 %1090  ;;  %v6514_v50 = vpop.f32.mrf.mxu1 }
 0x202   : > { %2122 = vrot.lane.b32.xlu0 %v1961_v59, %s5464_s23 }
 0x204   : > { %1634 = vrot.lane.b32.xlu1 %v5147_v52, %s5463_s17  ;;  %v6507_v1 = vpop.permute.xlu0 %1096  ;;  %v6520_v52 = vpop.f32.mrf.mxu1 }
 0x206   : > { %2128 = vrot.lane.b32.xlu0 %v5200_v2, %s5464_s23  ;;  %v1547_v2 = vpop.f32.mrf.mxu0  ;;  %v5209_v22 = vpop.f32.mrf.mxu1 }
 0x208   : > { %1632 = vrot.lane.b32.xlu1 %v1507_v45, %s5463_s17  ;;  %v6511_v48 = vpop.permute.xlu0 %1094 }
 0x20a   : > { %2126 = vrot.lane.b32.xlu0 %v1971_v39, %s5464_s23  ;;  %v6526_v39 = vpop.f32.mrf.mxu0 }
 0x20c   : > { %1638 = vrot.lane.b32.xlu1 %v5150_v56, %s5463_s17  ;;  %v6517_v59 = vpop.permute.xlu0 %1098  ;;  %v2001_v56 = vpop.f32.mrf.mxu1 }
 0x20e   : > { %1616 = vrot.lane.b32.xlu0 %v1467_v8, %s5463_s17  ;;  %v6532_v8 = vpop.f32.mrf.mxu0 }
 0x210   : > { %1636 = vrot.lane.b32.xlu1 %v1517_v49, %s5463_s17  ;;  %v6523_v45 = vpop.permute.xlu0 %1102  ;;  %v6538_v49 = vpop.f32.mrf.mxu0 }
 0x212   : > { %2130 = vrot.lane.b32.xlu0 %v1981_v29, %s5464_s23  ;;  %v5212_v29 = vpop.f32.mrf.mxu1 }
 0x214   : > { %1642 = vrot.lane.b32.xlu1 %v5153_v51, %s5463_s17  ;;  %v6529_v3 = vpop.permute.xlu0 %1108  ;;  %v2011_v14 = vpop.f32.mrf.mxu1 }
 0x215   : > { %7472 = vst [vmem:[#allocation30_spill] sm:$0xff] %v6529_v3 }
 0x216   : > { %2140 = vrot.lane.b32.xlu0 %v5209_v22, %s5464_s23  ;;  %v6546_v22 = vpop.f32.mrf.mxu0  ;;  %v5215_v44 = vpop.f32.mrf.mxu1 }
 0x218   : > { %1640 = vrot.lane.b32.xlu1 %v1527_v53, %s5463_s17  ;;  %v6535_v46 = vpop.permute.xlu0 %1106  ;;  %v2021_v18 = vpop.f32.mrf.mxu1 }
 0x219   : > { %7473 = vst [vmem:[#allocation31_spill] sm:$0xff] %v6535_v46  ;;  %v6551_v46 = vpop.permute.xlu1 %1104 }
 0x21a   : > { %2138 = vrot.lane.b32.xlu0 %v2001_v56, %s5464_s23  ;;  %v5256_v56 = vpop.f32.mrf.mxu0 }
 0x21c   : > { %1646 = vrot.lane.b32.xlu1 %v5156_v43, %s5463_s17  ;;  %v6543_v51 = vpop.permute.xlu0 %1112 }
 0x21e   : > { %2144 = vrot.lane.b32.xlu0 %v5212_v29, %s5464_s23  ;;  %v2445_v29 = vpop.f32.mrf.mxu0 }
 0x220   : > { %1644 = vrot.lane.b32.xlu1 %v1537_v55, %s5463_s17  ;;  %v6549_v53 = vpop.permute.xlu0 %1110 }
 0x221   : > { %7474 = vst [vmem:[#allocation32_spill] sm:$0xff] %v6549_v53  ;;  %v5259_v53 = vpop.f32.mrf.mxu0 }
 0x222   : > { %2142 = vrot.lane.b32.xlu0 %v2011_v14, %s5464_s23  ;;  %v5218_v14 = vpop.f32.mrf.mxu1 }
 0x224   : > { %1650 = vrot.lane.b32.xlu1 %v5159_v0, %s5463_s17  ;;  %v6555_v43 = vpop.permute.xlu0 %1116 }
 0x225   : > { %7475 = vst [vmem:[#allocation33_spill] sm:$0xff] %v6555_v43 }
 0x226   : > { %v6557_v3 = vpop.permute.xlu1 %1590  ;;  %2148 = vrot.lane.b32.xlu0 %v5215_v44, %s5464_s23 }
 0x227   : > { %7476 = vst [vmem:[#allocation34_spill] sm:$0xff] %v6557_v3  ;;  %v2455_v3 = vpop.f32.mrf.mxu0 }
 0x228   : > { %1648 = vrot.lane.b32.xlu1 %v1547_v2, %s5463_s17  ;;  %v6561_v55 = vpop.permute.xlu0 %1114  ;;  %v2031_v2 = vpop.f32.mrf.mxu1 }
 0x229   : > { %7477 = vst [vmem:[#allocation35_spill] sm:$0xff] %v6561_v55  ;;  %v5262_v44 = vpop.f32.mrf.mxu0 }
 0x22a   : > { %v6563_v5 = vpop.permute.xlu1 %1594  ;;  %2146 = vrot.lane.b32.xlu0 %v2021_v18, %s5464_s23  ;;  %v5221_v21 = vpop.f32.mrf.mxu1 }
 0x22b   : > { %7478 = vst [vmem:[#allocation36_spill] sm:$0xff] %v6563_v5  ;;  %v2465_v18 = vpop.f32.mrf.mxu0 }
 0x22c   : > { %2626 = vrot.lane.b32.xlu1 %v5256_v56, %s5465_s25  ;;  %v6567_v0 = vpop.permute.xlu0 %1120 }
 0x22d   : > { %7479 = vst [vmem:[#allocation37_spill] sm:$0xff] %v6567_v0  ;;  %v5265_v43 = vpop.f32.mrf.mxu0 }
 0x22e   : > { %v6569_v9 = vpop.permute.xlu1 %1592  ;;  %2152 = vrot.lane.b32.xlu0 %v5218_v14, %s5464_s23  ;;  %v2041_v14 = vpop.f32.mrf.mxu1 }
 0x22f   : > { %7480 = vst [vmem:[#allocation38_spill] sm:$0xff] %v6569_v9  ;;  %v2475_v5 = vpop.f32.mrf.mxu0 }
 0x230   : > { %2624 = vrot.lane.b32.xlu1 %v2445_v29, %s5465_s25  ;;  %v6573_v55 = vpop.permute.xlu0 %1118 }
 0x231   : > { %7481 = vst [vmem:[#allocation39_spill] sm:$0xff] %v6573_v55  ;;  %v5268_v33 = vpop.f32.mrf.mxu0 }
 0x232   : > { %v6575_v23 = vpop.permute.xlu1 %1598  ;;  %2150 = vrot.lane.b32.xlu0 %v2031_v2, %s5464_s23  ;;  %v5224_v2 = vpop.f32.mrf.mxu1 }
 0x233   : > { %v2485_v25 = vpop.f32.mrf.mxu0 }
 0x234   : > { %2630 = vrot.lane.b32.xlu1 %v5259_v53, %s5465_s25  ;;  %v6579_v56 = vpop.permute.xlu0 %1124 }
 0x235   : > { %7482 = vst [vmem:[#allocation40_spill] sm:$0xff] %v6579_v56  ;;  %v5271_v4 = vpop.f32.mrf.mxu0 }
 0x236   : > { %v6581_v9 = vpop.permute.xlu1 %1596  ;;  %2156 = vrot.lane.b32.xlu0 %v5221_v21, %s5464_s23  ;;  %v2051_v21 = vpop.f32.mrf.mxu1 }
 0x237   : > { %v2495_v60 = vpop.f32.mrf.mxu0 }
 0x238   : > { %2628 = vrot.lane.b32.xlu1 %v2455_v3, %s5465_s25  ;;  %v6585_v29 = vpop.permute.xlu0 %1122 }
 0x239   : > { %7483 = vst [vmem:[#allocation41_spill] sm:$0xff] %v6585_v29 }
 0x23a   : > { %v6587_v7 = vpop.permute.xlu1 %1602  ;;  %2154 = vrot.lane.b32.xlu0 %v2041_v14, %s5464_s23  ;;  %v5227_v14 = vpop.f32.mrf.mxu1 }
 0x23c   : > { %2634 = vrot.lane.b32.xlu1 %v5262_v44, %s5465_s25  ;;  %v6591_v53 = vpop.permute.xlu0 %1128 }
 0x23d   : > { %7484 = vst [vmem:[#allocation42_spill] sm:$0xff] %v6591_v53 }
 0x23e   : > { %v6593_v55 = vpop.permute.xlu1 %1600  ;;  %2160 = vrot.lane.b32.xlu0 %v5224_v2, %s5464_s23  ;;  %v2061_v2 = vpop.f32.mrf.mxu1 }
 0x240   : > { %2632 = vrot.lane.b32.xlu1 %v2465_v18, %s5465_s25  ;;  %v6597_v3 = vpop.permute.xlu0 %1126 }
 0x241   : > { %7485 = vst [vmem:[#allocation43_spill] sm:$0xff] %v6597_v3  ;;  %v6611_v3 = vpop.f32.mrf.mxu0 }
 0x242   : > { %v6599_v63 = vpop.permute.xlu1 %1606  ;;  %2158 = vrot.lane.b32.xlu0 %v2051_v21, %s5464_s23 }
 0x243   : > { %v2505_v21 = vpop.f32.mrf.mxu0 }
 0x244   : > { %2638 = vrot.lane.b32.xlu1 %v5265_v43, %s5465_s25  ;;  %v6603_v44 = vpop.permute.xlu0 %1132 }
 0x245   : > { %7486 = vst [vmem:[#allocation44_spill] sm:$0xff] %v6603_v44 }
 0x246   : > { %v6605_v58 = vpop.permute.xlu1 %1604  ;;  %2164 = vrot.lane.b32.xlu0 %v5227_v14, %s5464_s23  ;;  %v5277_v14 = vpop.f32.mrf.mxu0 }
 0x248   : > { %2636 = vrot.lane.b32.xlu1 %v2475_v5, %s5465_s25  ;;  %v6609_v18 = vpop.permute.xlu0 %1130 }
 0x249   : > { %7487 = vst [vmem:[#allocation45_spill] sm:$0xff] %v6609_v18 }
 0x24a   : > { %v6613_v57 = vpop.permute.xlu1 %1610  ;;  %2162 = vrot.lane.b32.xlu0 %v2061_v2, %s5464_s23  ;;  %v2515_v2 = vpop.f32.mrf.mxu0 }
 0x24c   : > { %2642 = vrot.lane.b32.xlu1 %v5268_v33, %s5465_s25  ;;  %v6617_v43 = vpop.permute.xlu0 %1136 }
 0x24d   : > { %7488 = vst [vmem:[#allocation46_spill] sm:$0xff] %v6617_v43 }
 0x24e   : > { %v6619_v44 = vpop.permute.xlu1 %1608  ;;  %2106 = vrot.lane.b32.xlu0 %v6448_v37, %s5464_s23 }
 0x250   : > { %2640 = vrot.lane.b32.xlu1 %v2485_v25, %s5465_s25  ;;  %v6624_v5 = vpop.permute.xlu0 %1134 }
 0x251   : > { %7489 = vst [vmem:[#allocation47_spill] sm:$0xff] %v6624_v5 }
 0x252   : > { %v6626_v18 = vpop.permute.xlu1 %1614  ;;  %1620 = vrot.lane.b32.xlu0 %v6471_v61, %s5463_s17 }
 0x254   : > { %2646 = vrot.lane.b32.xlu1 %v5271_v4, %s5465_s25  ;;  %v6631_v33 = vpop.permute.xlu0 %2108 }
 0x255   : > { %7490 = vst [vmem:[#allocation48_spill] sm:$0xff] %v6631_v33  ;;  %v5280_v33 = vpop.f32.mrf.mxu0 }
 0x256   : > { %v6633_v43 = vpop.permute.xlu1 %1612  ;;  %2652 = vrot.lane.b32.xlu0 %v2515_v2, %s5465_s25 }
 0x258   : > { %2644 = vrot.lane.b32.xlu1 %v2495_v60, %s5465_s25  ;;  %v6637_v25 = vpop.permute.xlu0 %2112 }
 0x25a   : > { %v6639_v37 = vpop.permute.xlu1 %1618  ;;  %2104 = vrot.lane.b32.xlu0 %v6436_v10, %s5464_s23  ;;  %v2525_v10 = vpop.f32.mrf.mxu0 }
 0x25c   : > { %2654 = vrot.lane.b32.xlu1 %v5277_v14, %s5465_s25  ;;  %v6644_v61 = vpop.permute.xlu0 %2110  ;;  %v5283_v5 = vpop.f32.mrf.mxu0 }
 0x25e   : > { %v6646_v4 = vpop.permute.xlu1 %2132  ;;  %2134 = vrot.lane.b32.xlu0 %v6520_v52, %s5464_s23 }
 0x260   : > { %2658 = vrot.lane.b32.xlu1 %v5280_v33, %s5465_s25  ;;  %v6653_v2 = vpop.permute.xlu0 %2116 }
 0x262   : > { %v6651_v60 = vpop.permute.xlu1 %1622  ;;  %2102 = vrot.lane.b32.xlu0 %v6442_v16, %s5464_s23 }
 0x263   : > { %7491 = vst [vmem:[#allocation49_spill] sm:$0xff] %v6651_v60  ;;  %v2535_v60 = vpop.f32.mrf.mxu0 }
 0x264   : > { %2656 = vrot.lane.b32.xlu1 %v2525_v10, %s5465_s25  ;;  %v6662_v52 = vpop.permute.xlu0 %2114 }
 0x265   : > { %v5286_v53 = vpop.f32.mrf.mxu0 }
 0x266   : > { %v6658_v14 = vpop.permute.xlu1 %1626  ;;  %2648 = vrot.lane.b32.xlu0 %v2505_v21, %s5465_s25 }
 0x267   : > { %v2545_v21 = vpop.f32.mrf.mxu0 }
 0x268   : > { %2662 = vrot.lane.b32.xlu1 %v5283_v5, %s5465_s25  ;;  %v6669_v16 = vpop.permute.xlu0 %2120 }
 0x26a   : > { %v6664_v33 = vpop.permute.xlu1 %1624 }
 0x26b   : > { %7492 = vst [vmem:[#allocation50_spill] sm:$0xff] %v6664_v33  ;;  %v5289_v33 = vpop.f32.mrf.mxu0 }
 0x26c   : > { %2660 = vrot.lane.b32.xlu1 %v2535_v60, %s5465_s25  ;;  %v6675_v5 = vpop.permute.xlu0 %2118 }
 0x26d   : > { %v2555_v27 = vpop.f32.mrf.mxu0 }
 0x26e   : > { %v6667_v28 = vpop.permute.xlu1 %1630 }
 0x26f   : > { %7493 = vst [vmem:[#allocation51_spill] sm:$0xff] %v6667_v28 }
 0x270   : > { %2666 = vrot.lane.b32.xlu1 %v5286_v53, %s5465_s25  ;;  %v6680_v60 = vpop.permute.xlu0 %2124 }
 0x272   : > { %v6672_v10 = vpop.permute.xlu1 %1628 }
 0x273   : > { %7494 = vst [vmem:[#allocation52_spill] sm:$0xff] %v6672_v10  ;;  %v5292_v10 = vpop.f32.mrf.mxu0 }
 0x274   : > { %2664 = vrot.lane.b32.xlu1 %v2545_v21, %s5465_s25  ;;  %v6687_v26 = vpop.permute.xlu0 %2122 }
 0x275   : > { %v2565_v56 = vpop.f32.mrf.mxu0 }
 0x276   : > { %v6677_v29 = vpop.permute.xlu1 %1634 }
 0x277   : > { %7495 = vst [vmem:[#allocation53_spill] sm:$0xff] %v6677_v29 }
 0x278   : > { %2670 = vrot.lane.b32.xlu1 %v5289_v33, %s5465_s25  ;;  %v6693_v33 = vpop.permute.xlu0 %2128 }
 0x27a   : > { %v6682_v28 = vpop.permute.xlu1 %1632 }
 0x27b   : > { %7496 = vst [vmem:[#allocation54_spill] sm:$0xff] %v6682_v28  ;;  %v5295_v28 = vpop.f32.mrf.mxu0 }
 0x27c   : > { %2668 = vrot.lane.b32.xlu1 %v2555_v27, %s5465_s25  ;;  %v6700_v24 = vpop.permute.xlu0 %2126 }
 0x27e   : > { %v6685_v53 = vpop.permute.xlu1 %1638 }
 0x27f   : > { %7497 = vst [vmem:[#allocation55_spill] sm:$0xff] %v6685_v53  ;;  %v2575_v53 = vpop.f32.mrf.mxu0 }
 0x280   : > { %2674 = vrot.lane.b32.xlu1 %v5292_v10, %s5465_s25 }
 0x282   : > { %v6690_v21 = vpop.permute.xlu1 %1636 }
 0x283   : > { %7498 = vst [vmem:[#allocation56_spill] sm:$0xff] %v6690_v21 }
 0x284   : > { %2672 = vrot.lane.b32.xlu1 %v2565_v56, %s5465_s25  ;;  %v6707_v56 = vpop.permute.xlu0 %1616 }
 0x286   : > { %v6695_v29 = vpop.permute.xlu1 %1642 }
 0x287   : > { %7499 = vst [vmem:[#allocation57_spill] sm:$0xff] %v6695_v29 }
 0x288   : > { %2678 = vrot.lane.b32.xlu1 %v5295_v28, %s5465_s25 }
 0x28a   : > { %v6698_v27 = vpop.permute.xlu1 %1640 }
 0x28b   : > { %7500 = vst [vmem:[#allocation58_spill] sm:$0xff] %v6698_v27  ;;  %v6715_v27 = vpop.permute.xlu0 %2130 }
 0x28c   : > { %2676 = vrot.lane.b32.xlu1 %v2575_v53, %s5465_s25 }
 0x28e   : > { %v6703_v10 = vpop.permute.xlu1 %1646 }
 0x28f   : > { %7501 = vst [vmem:[#allocation59_spill] sm:$0xff] %v6703_v10 }
 0x290   : > { %2622 = vrot.lane.b32.xlu1 %v6538_v49, %s5465_s25  ;;  %v6723_v49 = vpop.permute.xlu0 %2140 }
 0x292   : > { %v6709_v21 = vpop.permute.xlu1 %1644 }
 0x293   : > { %7502 = vst [vmem:[#allocation60_spill] sm:$0xff] %v6709_v21  ;;  %v7505_v21 = vmov 0.0  }
 0x294   : > { %2136 = vrot.lane.b32.xlu1 %v6514_v50, %s5464_s23  ;;  %2784 = vst.msk [vmem:[#allocation3 + $0x38] sm:$0xff] %vm2776_vm5, %v7505_v21  ;;  %2777 = vst.msk [vmem:[#allocation3] sm:$0xff] %vm2776_vm5, %v7505_v21 }
 0x295   : > { %2778 = vst.msk [vmem:[#allocation3 + $0x8] sm:$0xff] %vm2776_vm5, %v7505_v21  ;;  %2779 = vst.msk [vmem:[#allocation3 + $0x10] sm:$0xff] %vm2776_vm5, %v7505_v21 }
 0x296   : > { %v6713_v28 = vpop.permute.xlu1 %1650  ;;  %2780 = vst.msk [vmem:[#allocation3 + $0x18] sm:$0xff] %vm2776_vm5, %v7505_v21  ;;  %2781 = vst.msk [vmem:[#allocation3 + $0x20] sm:$0xff] %vm2776_vm5, %v7505_v21 }
 0x297   : > { %7503 = vst [vmem:[#allocation61_spill] sm:$0xff] %v6713_v28  ;;  %2782 = vst.msk [vmem:[#allocation3 + $0x28] sm:$0xff] %vm2776_vm5, %v7505_v21 }
 0x298   : > { %1588 = vrot.lane.b32.xlu1 %v6439_v12, %s5463_s17  ;;  %2783 = vst.msk [vmem:[#allocation3 + $0x30] sm:$0xff] %vm2776_vm5, %v7505_v21  ;;  %2785 = vst.msk [vmem:[#allocation3 + $0x40] sm:$0xff] %vm2776_vm5, %v7505_v21  ;;  %v1177_v12 = vadd.f32 %v6368_v15, %v6491_v54 }
 0x299   : > { %2786 = vst.msk [vmem:[#allocation3 + $0x48] sm:$0xff] %vm2776_vm5, %v7505_v21  ;;  %2787 = vst.msk [vmem:[#allocation3 + $0x50] sm:$0xff] %vm2776_vm5, %v7505_v21 }
 0x29a   : > { %v6719_v53 = vpop.permute.xlu1 %1648  ;;  %2788 = vst.msk [vmem:[#allocation3 + $0x58] sm:$0xff] %vm2776_vm5, %v7505_v21  ;;  %2789 = vst.msk [vmem:[#allocation3 + $0x60] sm:$0xff] %vm2776_vm5, %v7505_v21 }
 0x29b   : > { %7504 = vst [vmem:[#allocation62_spill] sm:$0xff] %v6719_v53  ;;  %2790 = vst.msk [vmem:[#allocation3 + $0x68] sm:$0xff] %vm2776_vm5, %v7505_v21  ;;  %v6798_v53 = vpop.permute.xlu0 %2138 }
 0x29c   : > { %2620 = vrot.lane.b32.xlu1 %v6546_v22, %s5465_s25  ;;  %2791 = vst.msk [vmem:[#allocation3 + $0x70] sm:$0xff] %vm2776_vm5, %v7505_v21  ;;  %2792 = vst.msk [vmem:[#allocation3 + $0x78] sm:$0xff] %vm2776_vm5, %v7505_v21  ;;  %v1691_v22 = vadd.f32 %v6587_v7, %v1177_v12 }
 0x29d   : > { %2793 = vst.msk [vmem:[#allocation3 + $0x80] sm:$0xff] %vm2776_vm5, %v7505_v21  ;;  %2794 = vst.msk [vmem:[#allocation3 + $0x88] sm:$0xff] %vm2776_vm5, %v7505_v21 }
 0x29e   : > { %v6725_v10 = vpop.permute.xlu1 %2626  ;;  %2795 = vst.msk [vmem:[#allocation3 + $0x90] sm:$0xff] %vm2776_vm5, %v7505_v21  ;;  %2796 = vst.msk [vmem:[#allocation3 + $0x98] sm:$0xff] %vm2776_vm5, %v7505_v21  ;;  %v2205_v28 = vadd.f32 %v6653_v2, %v1691_v22 }
 0x29f   : > { %2797 = vst.msk [vmem:[#allocation3 + $0xa0] sm:$0xff] %vm2776_vm5, %v7505_v21  ;;  %2798 = vst.msk [vmem:[#allocation3 + $0xa8] sm:$0xff] %vm2776_vm5, %v7505_v21  ;;  %v6807_v54 = vpop.permute.xlu0 %2144 }
 0x2a0   : > { %2799 = vst.msk [vmem:[#allocation3 + $0xb0] sm:$0xff] %vm2776_vm5, %v7505_v21  ;;  %2800 = vst.msk [vmem:[#allocation3 + $0xb8] sm:$0xff] %vm2776_vm5, %v7505_v21  ;;  %2650 = vrot.lane.b32.xlu1 %v6611_v3, %s5465_s25  ;;  %v1179_v3 = vadd.f32 %v6373_v20, %v6499_v19  ;;  %v1181_v20 = vadd.f32 %v6379_v32, %v6507_v1 }
 0x2a1   : > { %2801 = vst.msk [vmem:[#allocation3 + $0xc0] sm:$0xff] %vm2776_vm5, %v7505_v21  ;;  %2802 = vst.msk [vmem:[#allocation3 + $0xc8] sm:$0xff] %vm2776_vm5, %v7505_v21 }
 0x2a2   : > { %2803 = vst.msk [vmem:[#allocation3 + $0xd0] sm:$0xff] %vm2776_vm5, %v7505_v21  ;;  %2804 = vst.msk [vmem:[#allocation3 + $0xd8] sm:$0xff] %vm2776_vm5, %v7505_v21  ;;  %v6795_v50 = vpop.permute.xlu1 %2624  ;;  %v1693_v7 = vadd.f32 %v6599_v63, %v1179_v3  ;;  %v1695_v22 = vadd.f32 %v6613_v57, %v1181_v20  ;;  %v1183_v57 = vadd.f32 %v6384_v36, %v6540_v62 }
 0x2a3   : > { %2805 = vst.msk [vmem:[#allocation3 + $0xe0] sm:$0xff] %vm2776_vm5, %v7505_v21  ;;  %2806 = vst.msk [vmem:[#allocation3 + $0xe8] sm:$0xff] %vm2776_vm5, %v7505_v21  ;;  %v6817_v12 = vpop.permute.xlu0 %2142 }
 0x2a4   : > { %2807 = vst.msk [vmem:[#allocation3 + $0xf0] sm:$0xff] %vm2776_vm5, %v7505_v21  ;;  %2808 = vst.msk [vmem:[#allocation3 + $0xf8] sm:$0xff] %vm2776_vm5, %v7505_v21  ;;  %2618 = vrot.lane.b32.xlu1 %v6526_v39, %s5465_s25  ;;  %v1178_v39 = vadd.f32 %v6503_v35, %v6376_v30  ;;  %v1180_v30 = vadd.f32 %v6511_v48, %v6381_v34  ;;  %v1697_v34 = vadd.f32 %v6626_v18, %v1183_v57 }
 0x2a6   : > { %v2631_v29 = vpop.permute.xlu1 %2630  ;;  %v1694_v1 = vadd.f32 %v6619_v44, %v1180_v30  ;;  %v1182_v44 = vadd.f32 %v6517_v59, %v6387_v38  ;;  %v1184_v59 = vadd.f32 %v6523_v45, %v6393_v42  ;;  %v1175_v30 = vadd.f32 %v6362_v11, %v6483_v31 }
 0x2a7   : > { %v2719_v0 = vadd.f32 %v2631_v29, %v2205_v28  ;;  %v2207_v29 = vadd.f32 %v6669_v16, %v1693_v7  ;;  %v6827_v16 = vpop.permute.xlu0 %2148 }
 0x2a8   : > { %2616 = vrot.lane.b32.xlu1 %v6532_v8, %s5465_s25  ;;  %v1692_v8 = vadd.f32 %v6605_v58, %v1178_v39  ;;  %v2209_v58 = vadd.f32 %v6680_v60, %v1695_v22  ;;  %v1696_v62 = vadd.f32 %v6633_v43, %v1182_v44  ;;  %v7509_v44 = vld [vmem:[#allocation40_spill] sm:$0xff] }
 0x2a9   : > { %v2751_v15 = vmax.f32 %v2719_v0, 0.0 }
 0x2aa   : > { %v6809_v21 = vpop.permute.xlu1 %2628  ;;  %v2206_v19 = vadd.f32 %v6675_v5, %v1692_v8  ;;  %v2208_v5 = vadd.f32 %v6687_v26, %v1694_v1  ;;  %v1185_v26 = vadd.f32 %v6390_v40, %v6551_v46  ;;  %v2210_v18 = vadd.f32 %v6700_v24, %v1696_v62 }
 0x2ab   : > { %v6836_v60 = vpop.permute.xlu0 %2146  ;;  %v1176_v40 = vadd.f32 %v6495_v47, %v6370_v17  ;;  %v1698_v46 = vadd.f32 %v6707_v56, %v1184_v59 }
 0x2ac   : > { %2858 = vrot.lane.b32.xlu1 %v2751_v15, %s5461_s10 }
 0x2ad   : > { %v2212_v42 = vadd.f32 %v6715_v27, %v1698_v46 }
 0x2ae   : > { %v2635_v2 = vpop.permute.xlu1 %2634 }
 0x2af   : > { %v2721_v28 = vadd.f32 %v2635_v2, %v2207_v29  ;;  %v2211_v29 = vadd.f32 %v6693_v33, %v1697_v34  ;;  %v2153_v20 = vpop.permute.xlu0 %2152 }
 0x2b1   : > { %v2753_v0 = vmax.f32 %v2721_v28, 0.0 }
 0x2b2   : > { %v2633_v63 = vpop.permute.xlu1 %2632 }
 0x2b3   : > { %v2720_v3 = vadd.f32 %v2633_v63, %v2206_v19  ;;  %2862 = vrot.lane.b32.xlu1 %v2753_v0, %s5461_s10  ;;  %v1699_v0 = vadd.f32 %v6639_v37, %v1185_v26  ;;  %v2151_v22 = vpop.permute.xlu0 %2150  ;;  %v1189_v37 = vadd.f32 %v6401_v6, %v6543_v51 }
 0x2b5   : > { %v2752_v35 = vmax.f32 %v2720_v3, 0.0  ;;  %v2213_v43 = vadd.f32 %v6646_v4, %v1699_v0  ;;  %v1690_v3 = vadd.f32 %v6593_v55, %v1176_v40  ;;  %v1703_v17 = vadd.f32 %v6658_v14, %v1189_v37 }
 0x2b6   : > { %v2639_v15 = vpop.permute.xlu1 %2638 }
 0x2b7   : > { %v2723_v32 = vadd.f32 %v2639_v15, %v2209_v58  ;;  %2860 = vrot.lane.b32.xlu1 %v2752_v35, %s5461_s10  ;;  %v2204_v47 = vadd.f32 %v6662_v52, %v1690_v3  ;;  %v1689_v58 = vadd.f32 %v6575_v23, %v1175_v30  ;;  %v2217_v6 = vadd.f32 %v6723_v49, %v1703_v17  ;;  %v2157_v27 = vpop.permute.xlu0 %2156  ;;  %v7518_v30 = vld [vmem:[#allocation21_spill] sm:$0xff]  ;;  %v7519_v17 = vld [vmem:[#allocation43_spill] sm:$0xff] }
 0x2b8   : > { %v1174_v15 = vadd.f32 %v6487_v41, %v6365_v13  ;;  %v7507_v13 = vld [vmem:[#allocation16_spill] sm:$0xff] }
 0x2b9   : > { %v2755_v7 = vmax.f32 %v2723_v32, 0.0  ;;  %v2718_v51 = vadd.f32 %v6809_v21, %v2204_v47  ;;  %v2203_v11 = vadd.f32 %v6637_v25, %v1689_v58  ;;  %v7506_v32 = vld [vmem:[#allocation37_spill] sm:$0xff]  ;;  %v1196_v47 = vadd.f32 %v7519_v17, %v7518_v30 }
 0x2ba   : > { %v2637_v39 = vpop.permute.xlu1 %2636  ;;  %v1688_v14 = vadd.f32 %v6581_v9, %v1174_v15  ;;  %v1193_v41 = vadd.f32 %v7507_v13, %v7506_v32  ;;  %v7522_v15 = vld [vmem:[#allocation22_spill] sm:$0xff] }
 0x2bb   : > { %v2722_v48 = vadd.f32 %v2637_v39, %v2208_v5  ;;  %2866 = vrot.lane.b32.xlu1 %v2755_v7, %s5461_s10  ;;  %v2717_v23 = vadd.f32 %v6725_v10, %v2203_v11  ;;  %v2750_v52 = vmax.f32 %v2718_v51, 0.0  ;;  %v2155_v1 = vpop.permute.xlu0 %2154  ;;  %v7508_v7 = vld [vmem:[#allocation53_spill] sm:$0xff] }
 0x2bc   : > { %v2202_v21 = vadd.f32 %v6644_v61, %v1688_v14  ;;  %v1707_v9 = vadd.f32 %v7508_v7, %v1193_v41  ;;  %v7525_v41 = vld [vmem:[#allocation45_spill] sm:$0xff] }
 0x2bd   : > { %v2754_v2 = vmax.f32 %v2722_v48, 0.0  ;;  %v2749_v25 = vmax.f32 %v2717_v23, 0.0 }
 0x2be   : > { %v2643_v8 = vpop.permute.xlu1 %2642  ;;  %v2716_v57 = vadd.f32 %v6795_v50, %v2202_v21  ;;  %v2221_v10 = vadd.f32 %v6827_v16, %v1707_v9  ;;  %v7511_v50 = vld [vmem:[#allocation55_spill] sm:$0xff] }
 0x2bf   : > { %v2725_v36 = vadd.f32 %v2643_v8, %v2211_v29  ;;  %2864 = vrot.lane.b32.xlu1 %v2754_v2, %s5461_s10  ;;  %v2161_v34 = vpop.permute.xlu0 %2160  ;;  %v7510_v29 = vld [vmem:[#allocation18_spill] sm:$0xff]  ;;  %v7523_v21 = vld [vmem:[#allocation59_spill] sm:$0xff] }
 0x2c0   : > { %v2748_v39 = vmax.f32 %v2716_v57, 0.0  ;;  %v1195_v2 = vadd.f32 %v7510_v29, %v7509_v44  ;;  %v7528_v44 = vld [vmem:[#allocation24_spill] sm:$0xff] }
 0x2c1   : > { %v2757_v28 = vmax.f32 %v2725_v36, 0.0 }
 0x2c2   : > { %v2641_v19 = vpop.permute.xlu1 %2640  ;;  %v1709_v36 = vadd.f32 %v7511_v50, %v1195_v2 }
 0x2c3   : > { %v2724_v38 = vadd.f32 %v2641_v19, %v2210_v18  ;;  %2870 = vrot.lane.b32.xlu1 %v2757_v28, %s5461_s10  ;;  %v2159_v26 = vpop.permute.xlu0 %2158  ;;  %v7512_v18 = vld [vmem:[#allocation19_spill] sm:$0xff]  ;;  %v7513_v28 = vld [vmem:[#allocation41_spill] sm:$0xff] }
 0x2c4   : > { %v1194_v16 = vadd.f32 %v7513_v28, %v7512_v18  ;;  %v2223_v19 = vadd.f32 %v2153_v20, %v1709_v36  ;;  %v7529_v36 = vld [vmem:[#allocation61_spill] sm:$0xff] }
 0x2c5   : > { %v2756_v33 = vmax.f32 %v2724_v38, 0.0  ;;  %v7514_v38 = vld [vmem:[#allocation56_spill] sm:$0xff] }
 0x2c6   : > { %v2647_v63 = vpop.permute.xlu1 %2646  ;;  %v1708_v59 = vadd.f32 %v7514_v38, %v1194_v16  ;;  %v7530_v16 = vld [vmem:[#allocation25_spill] sm:$0xff] }
 0x2c7   : > { %v2727_v24 = vadd.f32 %v2647_v63, %v2213_v43  ;;  %2868 = vrot.lane.b32.xlu1 %v2756_v33, %s5461_s10  ;;  %v7515_v33 = vld [vmem:[#allocation42_spill] sm:$0xff]  ;;  %v7516_v63 = vld [vmem:[#allocation20_spill] sm:$0xff]  ;;  %v2165_v37 = vpop.permute.xlu0 %2164 }
 0x2c8   : > { %v1197_v40 = vadd.f32 %v7516_v63, %v7515_v33  ;;  %v2222_v46 = vadd.f32 %v2151_v22, %v1708_v59  ;;  %v7532_v33 = vld [vmem:[#allocation17_spill] sm:$0xff]  ;;  %v7533_v63 = vld [vmem:[#allocation39_spill] sm:$0xff] }
 0x2c9   : > { %v2759_v45 = vmax.f32 %v2727_v24, 0.0 }
 0x2ca   : > { %v2645_v4 = vpop.permute.xlu1 %2644 }
 0x2cb   : > { %v2726_v56 = vadd.f32 %v2645_v4, %v2212_v42  ;;  %2874 = vrot.lane.b32.xlu1 %v2759_v45, %s5461_s10  ;;  %v7517_v42 = vld [vmem:[#allocation57_spill] sm:$0xff]  ;;  %v2163_v22 = vpop.permute.xlu0 %2162 }
 0x2cc   : > { %v1711_v45 = vadd.f32 %v7517_v42, %v1197_v40  ;;  %v1192_v40 = vadd.f32 %v7533_v63, %v7532_v33  ;;  %v7536_v42 = vld [vmem:[#allocation9_spill] sm:$0xff]  ;;  %v7552_v33 = vld [vmem:[#allocation30_spill] sm:$0xff]  ;;  %v7553_v63 = vld [vmem:[#allocation11_spill] sm:$0xff] }
 0x2cd   : > { %v2758_v55 = vmax.f32 %v2726_v56, 0.0 }
 0x2ce   : > { %v2655_v35 = vpop.permute.xlu1 %2654  ;;  %v2225_v20 = vadd.f32 %v2157_v27, %v1711_v45  ;;  %v7524_v27 = vld [vmem:[#allocation23_spill] sm:$0xff] }
 0x2cf   : > { %v6870_v31 = vadd.f32 %v2655_v35, %v2217_v6  ;;  %2872 = vrot.lane.b32.xlu1 %v2758_v55, %s5461_s10  ;;  %v7520_v6 = vld [vmem:[#allocation58_spill] sm:$0xff]  ;;  %v7521_v35 = vld [vmem:[#allocation44_spill] sm:$0xff]  ;;  %v2107_v9 = vpop.permute.xlu0 %2106 }
 0x2d0   : > { %v1710_v51 = vadd.f32 %v7520_v6, %v1196_v47  ;;  %v1199_v11 = vadd.f32 %v7522_v15, %v7521_v35  ;;  %v7539_v6 = vld [vmem:[#allocation33_spill] sm:$0xff] }
 0x2d2   : > { %v6875_v49 = vpop.permute.xlu1 %2658  ;;  %v2224_v14 = vadd.f32 %v2155_v1, %v1710_v51  ;;  %v1713_v32 = vadd.f32 %v7523_v21, %v1199_v11  ;;  %v7527_v1 = vld [vmem:[#allocation46_spill] sm:$0xff]  ;;  %v7541_v11 = vld [vmem:[#allocation48_spill] sm:$0xff] }
 0x2d3   : > { %2856 = vrot.lane.b32.xlu1 %v2750_v52, %s5461_s10  ;;  %v1201_v29 = vadd.f32 %v7528_v44, %v7527_v1  ;;  %v7540_v51 = vld [vmem:[#allocation14_spill] sm:$0xff] }
 0x2d4   : > { %v2227_v57 = vadd.f32 %v2161_v34, %v1713_v32  ;;  %v6917_v34 = vpop.permute.xlu0 %1620  ;;  %v7546_v44 = vld [vmem:[#allocation10_spill] sm:$0xff] }
 0x2d5   : > { %v1715_v18 = vadd.f32 %v7529_v36, %v1201_v29  ;;  %v7547_v29 = vld [vmem:[#allocation29_spill] sm:$0xff] }
 0x2d6   : > { %v6882_v5 = vpop.permute.xlu1 %2656 }
 0x2d7   : > { %2854 = vrot.lane.b32.xlu1 %v2749_v25, %s5461_s10  ;;  %v1198_v25 = vadd.f32 %v7525_v41, %v7524_v27  ;;  %v2229_v38 = vadd.f32 %v2165_v37, %v1715_v18  ;;  %v7538_v37 = vld [vmem:[#allocation36_spill] sm:$0xff]  ;;  %v7544_v27 = vld [vmem:[#allocation35_spill] sm:$0xff]  ;;  %v7548_v18 = vld [vmem:[#allocation13_spill] sm:$0xff] }
 0x2da   : > { %v2663_v61 = vpop.permute.xlu1 %2662 }
 0x2db   : > { %v2735_v48 = vadd.f32 %v2663_v61, %v2221_v10  ;;  %2852 = vrot.lane.b32.xlu1 %v2748_v39, %s5461_s10  ;;  %v7526_v39 = vld [vmem:[#allocation60_spill] sm:$0xff] }
 0x2dc   : > { %v1712_v61 = vadd.f32 %v7526_v39, %v1198_v25 }
 0x2dd   : > { %v2767_v8 = vmax.f32 %v2735_v48, 0.0 }
 0x2de   : > { %v6890_v62 = vpop.permute.xlu1 %2660  ;;  %v2226_v2 = vadd.f32 %v2159_v26, %v1712_v61 }
 0x2df   : > { %2890 = vrot.lane.b32.xlu0 %v2767_v8, %s5461_s10 }
 0x2e2   : > { %v2667_v0 = vpop.permute.xlu1 %2666 }
 0x2e3   : > { %v2737_v43 = vadd.f32 %v2667_v0, %v2223_v19  ;;  %v7531_v19 = vld [vmem:[#allocation47_spill] sm:$0xff] }
 0x2e4   : > { %v1200_v0 = vadd.f32 %v7531_v19, %v7530_v16  ;;  %v7550_v16 = vld [vmem:[#allocation38_spill] sm:$0xff] }
 0x2e5   : > { %v2769_v24 = vmax.f32 %v2737_v43, 0.0 }
 0x2e6   : > { %v2665_v3 = vpop.permute.xlu1 %2664 }
 0x2e7   : > { %v2736_v4 = vadd.f32 %v2665_v3, %v2222_v46  ;;  %2894 = vrot.lane.b32.xlu0 %v2769_v24, %s5461_s10  ;;  %v7534_v46 = vld [vmem:[#allocation62_spill] sm:$0xff]  ;;  %v7535_v3 = vld [vmem:[#allocation28_spill] sm:$0xff] }
 0x2e8   : > { %v1714_v26 = vadd.f32 %v7534_v46, %v1200_v0  ;;  %v1173_v45 = vadd.f32 %v7536_v42, %v7535_v3 }
 0x2e9   : > { %v2768_v56 = vmax.f32 %v2736_v4, 0.0  ;;  %v7537_v4 = vld [vmem:[#allocation54_spill] sm:$0xff] }
 0x2ea   : > { %v2671_v58 = vpop.permute.xlu1 %2670  ;;  %v1706_v30 = vadd.f32 %v7537_v4, %v1192_v40  ;;  %v2228_v17 = vadd.f32 %v2163_v22, %v1714_v26  ;;  %v1187_v40 = vadd.f32 %v7553_v63, %v7552_v33  ;;  %v7554_v26 = vld [vmem:[#allocation26_spill] sm:$0xff] }
 0x2eb   : > { %v2739_v55 = vadd.f32 %v2671_v58, %v2225_v20  ;;  %2892 = vrot.lane.b32.xlu0 %v2768_v56, %s5461_s10  ;;  %v2653_v20 = vpop.permute.xlu0 %2652  ;;  %v1687_v58 = vadd.f32 %v7538_v37, %v1173_v45  ;;  %v7556_v45 = vld [vmem:[#allocation49_spill] sm:$0xff] }
 0x2ec   : > { %v2220_v35 = vadd.f32 %v6836_v60, %v1706_v30  ;;  %v1701_v4 = vadd.f32 %v7556_v45, %v1187_v40  ;;  %v2763_v30 = vmax.f32 %v6870_v31, 0.0  ;;  %v7562_v31 = vmov 0.0  }
 0x2ed   : > { %v2771_v23 = vmax.f32 %v2739_v55, 0.0  ;;  %v1191_v55 = vadd.f32 %v7540_v51, %v7539_v6  ;;  %v7559_v6 = vld [vmem:[#allocation8_spill] sm:$0xff]  ;;  %v7560_v51 = vld [vmem:[#allocation27_spill] sm:$0xff]  ;;  %2810 = vst.msk [vmem:[#allocation3 + $0x100] sm:$0x1] %vm2809_vm6, %v7562_v31 }
 0x2ee   : > { %v2669_v52 = vpop.permute.xlu1 %2668  ;;  %v2734_v21 = vadd.f32 %v6890_v62, %v2220_v35 }
 0x2ef   : > { %v2738_v13 = vadd.f32 %v2669_v52, %v2224_v14  ;;  %2898 = vrot.lane.b32.xlu0 %v2771_v23, %s5461_s10  ;;  %v2201_v14 = vadd.f32 %v7541_v11, %v1687_v58  ;;  %v7542_v23 = vld [vmem:[#allocation51_spill] sm:$0xff]  ;;  %v2105_v60 = vpop.permute.xlu0 %2104 }
 0x2f0   : > { %v1705_v52 = vadd.f32 %v7542_v23, %v1191_v55  ;;  %v2766_v61 = vmax.f32 %v2734_v21, 0.0  ;;  %v7561_v55 = vld [vmem:[#allocation34_spill] sm:$0xff]  ;;  %v7563_v21 = vmov 1.0  }
 0x2f1   : > { %v2770_v7 = vmax.f32 %v2738_v13, 0.0  ;;  %v7543_v13 = vld [vmem:[#allocation15_spill] sm:$0xff]  ;;  %2811 = vst.msk [vmem:[#allocation3 + $0x100] sm:$0x1] %vm2809_vm6, %v7563_v21 }
 0x2f2   : > { %v2675_v10 = vpop.permute.xlu1 %2674  ;;  %v1190_v41 = vadd.f32 %v7544_v27, %v7543_v13  ;;  %v2219_v25 = vadd.f32 %v6807_v54, %v1705_v52  ;;  %v1172_v54 = vadd.f32 %v7547_v29, %v7546_v44 }
 0x2f3   : > { %v2741_v48 = vadd.f32 %v2675_v10, %v2227_v57  ;;  %2896 = vrot.lane.b32.xlu0 %v2770_v7, %s5461_s10  ;;  %v7545_v7 = vld [vmem:[#allocation52_spill] sm:$0xff] }
 0x2f4   : > { %v1704_v10 = vadd.f32 %v7545_v7, %v1190_v41  ;;  %v2733_v39 = vadd.f32 %v6875_v49, %v2219_v25  ;;  %v1686_v19 = vadd.f32 %v7550_v16, %v1172_v54 }
 0x2f5   : > { %v2773_v8 = vmax.f32 %v2741_v48, 0.0 }
 0x2f6   : > { %v2673_v50 = vpop.permute.xlu1 %2672  ;;  %v2218_v62 = vadd.f32 %v6817_v12, %v1704_v10  ;;  %v7551_v12 = vld [vmem:[#allocation50_spill] sm:$0xff] }
 0x2f7   : > { %v2740_v28 = vadd.f32 %v2673_v50, %v2226_v2  ;;  %2902 = vrot.lane.b32.xlu0 %v2773_v8, %s5461_s10  ;;  %v2765_v2 = vmax.f32 %v2733_v39, 0.0  ;;  %v2135_v50 = vpop.permute.xlu0 %2134  ;;  %v4486_v39 = vld [vmem:[%s7439_s2 + $0x68] sm:$0xff] }
 0x2f8   : > { %v2732_v8 = vadd.f32 %v6882_v5, %v2218_v62  ;;  %3424 = vmatprep.mubr.f32.mxu0 %v4486_v39 }
 0x2f9   : > { %v2772_v59 = vmax.f32 %v2740_v28, 0.0  ;;  %v7549_v28 = vld [vmem:[#allocation32_spill] sm:$0xff] }
 0x2fa   : > { %v2679_v43 = vpop.permute.xlu1 %2678  ;;  %v1188_v49 = vadd.f32 %v7549_v28, %v7548_v18 }
 0x2fb   : > { %v2743_v24 = vadd.f32 %v2679_v43, %v2229_v38  ;;  %2900 = vrot.lane.b32.xlu0 %v2772_v59, %s5461_s10  ;;  %v2200_v38 = vadd.f32 %v2107_v9, %v1686_v19  ;;  %v2764_v59 = vmax.f32 %v2732_v8, 0.0  ;;  %v2103_v42 = vpop.permute.xlu0 %2102 }
 0x2fc   : > { %v1702_v0 = vadd.f32 %v7551_v12, %v1188_v49 }
 0x2fd   : > { %v2775_v47 = vmax.f32 %v2743_v24, 0.0  ;;  %v7555_v24 = vld [vmem:[#allocation7_spill] sm:$0xff] }
 0x2fe   : > { %v2677_v56 = vpop.permute.xlu1 %2676  ;;  %v2216_v46 = vadd.f32 %v6798_v53, %v1702_v0  ;;  %v1171_v3 = vadd.f32 %v7555_v24, %v7554_v26  ;;  %v1170_v53 = vadd.f32 %v7560_v51, %v7559_v6 }
 0x2ff   : > { %v2742_v15 = vadd.f32 %v2677_v56, %v2228_v17  ;;  %2906 = vrot.lane.b32.xlu0 %v2775_v47, %s5461_s10  ;;  %v7557_v47 = vld [vmem:[#allocation12_spill] sm:$0xff]  ;;  %v7558_v56 = vld [vmem:[#allocation31_spill] sm:$0xff] }
 0x300   : > { %v2730_v17 = vadd.f32 %v2653_v20, %v2216_v46  ;;  %v1186_v37 = vadd.f32 %v7558_v56, %v7557_v47  ;;  %v1685_v35 = vadd.f32 %v7561_v55, %v1171_v3 }
 0x301   : > { %v2774_v22 = vmax.f32 %v2742_v15, 0.0 }
 0x302   : > { %v2623_v32 = vpop.permute.xlu1 %2622  ;;  %v1700_v11 = vadd.f32 %v6917_v34, %v1186_v37  ;;  %v2762_v20 = vmax.f32 %v2730_v17, 0.0 }
 0x303   : > { %v2715_v57 = vadd.f32 %v2623_v32, %v2201_v14  ;;  %2904 = vrot.lane.b32.xlu0 %v2774_v22, %s5461_s10  ;;  %v2199_v14 = vadd.f32 %v2105_v60, %v1685_v35  ;;  %v2649_v22 = vpop.permute.xlu0 %2648  ;;  %v3007_v60 = vld [vmem:[%s7439_s2 + $0x8] sm:$0xff] }
 0x304   : > { %v2214_v13 = vadd.f32 %v2135_v50, %v1700_v11  ;;  %3086 = vmatprep.mubr.f32.mxu1 %v3007_v60 }
 0x305   : > { %v2747_v48 = vmax.f32 %v2715_v57, 0.0 }
 0x306   : > { %v2137_v1 = vpop.permute.xlu1 %2136  ;;  %v2728_v41 = vadd.f32 %v2649_v22, %v2214_v13 }
 0x307   : > { %2850 = vrot.lane.b32.xlu1 %v2747_v48, %s5461_s10  ;;  %2888 = vrot.lane.b32.xlu0 %v2766_v61, %s5461_s10  ;;  %v2215_v15 = vadd.f32 %v2137_v1, %v1701_v4 }
 0x308   : > { %v2760_v61 = vmax.f32 %v2728_v41, 0.0 }
 0x30a   : > { %v1589_v36 = vpop.permute.xlu1 %1588 }
 0x30b   : > { %2886 = vrot.lane.b32.xlu0 %v2765_v2, %s5461_s10  ;;  %v1684_v23 = vadd.f32 %v1589_v36, %v1170_v53 }
 0x30d   : > { %v2198_v7 = vadd.f32 %v2103_v42, %v1684_v23 }
 0x30e   : > { %v2621_v43 = vpop.permute.xlu1 %2620 }
 0x30f   : > { %v2714_v5 = vadd.f32 %v2621_v43, %v2200_v38  ;;  %2884 = vrot.lane.b32.xlu0 %v2764_v59, %s5461_s10 }
 0x311   : > { %v2746_v9 = vmax.f32 %v2714_v5, 0.0 }
 0x312   : > { %v2651_v58 = vpop.permute.xlu1 %2650 }
 0x313   : > { %2848 = vrot.lane.b32.xlu1 %v2746_v9, %s5461_s10  ;;  %2882 = vrot.lane.b32.xlu0 %v2763_v30, %s5461_s10  ;;  %v2729_v52 = vadd.f32 %v2651_v58, %v2215_v15 }
 0x315   : > { %v2761_v25 = vmax.f32 %v2729_v52, 0.0 }
 0x316   : > { %v2619_v32 = vpop.permute.xlu1 %2618 }
 0x317   : > { %v2713_v27 = vadd.f32 %v2619_v32, %v2199_v14  ;;  %2880 = vrot.lane.b32.xlu0 %v2762_v20, %s5461_s10 }
 0x319   : > { %v2745_v57 = vmax.f32 %v2713_v27, 0.0 }
 0x31a   : > { %v2617_v10 = vpop.permute.xlu1 %2616 }
 0x31b   : > { %v2712_v34 = vadd.f32 %v2617_v10, %v2198_v7  ;;  %2846 = vrot.lane.b32.xlu1 %v2745_v57, %s5461_s10  ;;  %2878 = vrot.lane.b32.xlu0 %v2761_v25, %s5461_s10 }
 0x31d   : > { %v2744_v48 = vmax.f32 %v2712_v34, 0.0 }
 0x31e   : > { %v2859_v1 = vpop.permute.xlu1 %2858 }
 0x31f   : > { %2948 = vst.msk [vmem:[#allocation3 + $0x38] sm:$0xff] %vm2940_vm7, %v2859_v1  ;;  %2844 = vrot.lane.b32.xlu1 %v2744_v48, %s5461_s10  ;;  %2876 = vrot.lane.b32.xlu0 %v2760_v61, %s5461_s10  ;;  %v3006_v61 = vld [vmem:[%s7439_s2] sm:$0xff] }
 0x325   : > { %v2863_v62 = vpop.permute.xlu1 %2862 }
 0x326   : > { %2950 = vst.msk [vmem:[#allocation3 + $0x48] sm:$0xff] %vm2940_vm7, %v2863_v62  ;;  %v7078_v20 = vld [vmem:[#allocation3 + $0x38] sm:$0xff]  ;;  %v7141_v62 = vld [vmem:[#allocation3 + $0x100] sm:$0x1] }
 0x329   : > { %v2861_v44 = vpop.permute.xlu1 %2860 }
 0x32a   : > { %2949 = vst.msk [vmem:[#allocation3 + $0x40] sm:$0xff] %vm2940_vm7, %v2861_v44  ;;  %v4485_v44 = vld [vmem:[%s7439_s2 + $0x60] sm:$0xff] }
 0x32d   : > { %v2867_v29 = vpop.permute.xlu1 %2866  ;;  %v7061_v55 = vld [vmem:[#allocation3 + $0x48] sm:$0xff] }
 0x32e   : > { %2952 = vst.msk [vmem:[#allocation3 + $0x58] sm:$0xff] %vm2940_vm7, %v2867_v29  ;;  %v3010_v29 = vld [vmem:[%s7439_s2 + $0x20] sm:$0xf] }
 0x331   : > { %v2865_v54 = vpop.permute.xlu1 %2864  ;;  %v7070_v11 = vld [vmem:[#allocation3 + $0x40] sm:$0xff] }
 0x332   : > { %2951 = vst.msk [vmem:[#allocation3 + $0x50] sm:$0xff] %vm2940_vm7, %v2865_v54  ;;  %v4489_v54 = vld [vmem:[%s7439_s2 + $0x80] sm:$0xf] }
 0x335   : > { %v2871_v2 = vpop.permute.xlu1 %2870  ;;  %v7043_v56 = vld [vmem:[#allocation3 + $0x58] sm:$0xff] }
 0x336   : > { %2954 = vst.msk [vmem:[#allocation3 + $0x68] sm:$0xff] %vm2940_vm7, %v2871_v2  ;;  %v3009_v2 = vld [vmem:[%s7439_s2 + $0x18] sm:$0xf] }
 0x339   : > { %v2869_v8 = vpop.permute.xlu1 %2868  ;;  %v7053_v51 = vld [vmem:[#allocation3 + $0x50] sm:$0xff] }
 0x33a   : > { %2953 = vst.msk [vmem:[#allocation3 + $0x60] sm:$0xff] %vm2940_vm7, %v2869_v8  ;;  %v4488_v8 = vld [vmem:[%s7439_s2 + $0x78] sm:$0xf] }
 0x33d   : > { %v2875_v50 = vpop.permute.xlu1 %2874  ;;  %v7026_v4 = vld [vmem:[#allocation3 + $0x68] sm:$0xff] }
 0x33e   : > { %2956 = vst.msk [vmem:[#allocation3 + $0x78] sm:$0xff] %vm2940_vm7, %v2875_v50  ;;  %v3008_v50 = vld [vmem:[%s7439_s2 + $0x10] sm:$0xff] }
 0x341   : > { %v2873_v36 = vpop.permute.xlu1 %2872  ;;  %v7035_v9 = vld [vmem:[#allocation3 + $0x60] sm:$0xff] }
 0x342   : > { %2955 = vst.msk [vmem:[#allocation3 + $0x70] sm:$0xff] %vm2940_vm7, %v2873_v36  ;;  %v4496_v36 = vld [vmem:[%s7439_s2 + $0xa0] sm:$0xff] }
 0x345   : > { %v2857_v18 = vpop.permute.xlu1 %2856  ;;  %v7009_v26 = vld [vmem:[#allocation3 + $0x78] sm:$0xff] }
 0x346   : > { %2947 = vst.msk [vmem:[#allocation3 + $0x30] sm:$0xff] %vm2940_vm7, %v2857_v18  ;;  %v3011_v18 = vld [vmem:[%s7439_s2 + $0x28] sm:$0xf] }
 0x349   : > { %v2855_v28 = vpop.permute.xlu1 %2854  ;;  %v7018_v42 = vld [vmem:[#allocation3 + $0x70] sm:$0xff] }
 0x34a   : > { %2946 = vst.msk [vmem:[#allocation3 + $0x28] sm:$0xff] %vm2940_vm7, %v2855_v28  ;;  %v4499_v28 = vld [vmem:[%s7439_s2 + $0xb8] sm:$0xf] }
 0x34d   : > { %v2853_v49 = vpop.permute.xlu1 %2852  ;;  %v7088_v21 = vld [vmem:[#allocation3 + $0x30] sm:$0xff] }
 0x34e   : > { %2945 = vst.msk [vmem:[#allocation3 + $0x20] sm:$0xff] %vm2940_vm7, %v2853_v49  ;;  %v4477_v49 = vld [vmem:[%s7439_s2 + $0x38] sm:$0xff] }
 0x351   : > { %v2891_v16 = vpop.permute.xlu0 %2890  ;;  %v7096_v32 = vld [vmem:[#allocation3 + $0x28] sm:$0xff] }
 0x352   : > { %2964 = vst.msk [vmem:[#allocation3 + $0xb8] sm:$0xff] %vm2940_vm7, %v2891_v16  ;;  %v4476_v16 = vld [vmem:[%s7439_s2 + $0x30] sm:$0xff] }
 0x355   : > { %v7106_v25 = vld [vmem:[#allocation3 + $0x20] sm:$0xff] }
 0x359   : > { %v2895_v19 = vpop.permute.xlu0 %2894  ;;  %v7074_v31 = vld [vmem:[#allocation3 + $0xb8] sm:$0xff] }
 0x35a   : > { %2966 = vst.msk [vmem:[#allocation3 + $0xc8] sm:$0xff] %vm2940_vm7, %v2895_v19  ;;  %v4480_v19 = vld [vmem:[%s7439_s2 + $0x50] sm:$0xf] }
 0x35d   : > { %v2893_v12 = vpop.permute.xlu0 %2892 }
 0x35e   : > { %2965 = vst.msk [vmem:[#allocation3 + $0xc0] sm:$0xff] %vm2940_vm7, %v2893_v12  ;;  %v4504_v12 = vld [vmem:[%s7439_s2 + $0xc8] sm:$0xff] }
 0x361   : > { %v2899_v0 = vpop.permute.xlu0 %2898  ;;  %v7057_v53 = vld [vmem:[#allocation3 + $0xc8] sm:$0xff] }
 0x362   : > { %2968 = vst.msk [vmem:[#allocation3 + $0xd8] sm:$0xff] %vm2940_vm7, %v2899_v0  ;;  %v4503_v0 = vld [vmem:[%s7439_s2 + $0xc0] sm:$0xff] }
 0x365   : > { %v2897_v38 = vpop.permute.xlu0 %2896  ;;  %v7065_v15 = vld [vmem:[#allocation3 + $0xc0] sm:$0xff] }
 0x366   : > { %2967 = vst.msk [vmem:[#allocation3 + $0xd0] sm:$0xff] %vm2940_vm7, %v2897_v38  ;;  %v4479_v38 = vld [vmem:[%s7439_s2 + $0x48] sm:$0xf] }
 0x369   : > { %v2903_v59 = vpop.permute.xlu0 %2902  ;;  %v7039_v47 = vld [vmem:[#allocation3 + $0xd8] sm:$0xff] }
 0x36a   : > { %2970 = vst.msk [vmem:[#allocation3 + $0xe8] sm:$0xff] %vm2940_vm7, %v2903_v59  ;;  %v4507_v59 = vld [vmem:[%s7439_s2 + $0xe0] sm:$0xf] }
 0x36d   : > { %v2901_v43 = vpop.permute.xlu0 %2900  ;;  %v7047_v6 = vld [vmem:[#allocation3 + $0xd0] sm:$0xff] }
 0x36e   : > { %2969 = vst.msk [vmem:[#allocation3 + $0xe0] sm:$0xff] %vm2940_vm7, %v2901_v43  ;;  %v4478_v43 = vld [vmem:[%s7439_s2 + $0x40] sm:$0xff] }
 0x371   : > { %v2907_v33 = vpop.permute.xlu0 %2906  ;;  %v7022_v45 = vld [vmem:[#allocation3 + $0xe8] sm:$0xff] }
 0x372   : > { %2972 = vst.msk [vmem:[#allocation3 + $0xf8] sm:$0xff] %vm2940_vm7, %v2907_v33  ;;  %v4506_v33 = vld [vmem:[%s7439_s2 + $0xd8] sm:$0xf] }
 0x375   : > { %v2905_v63 = vpop.permute.xlu0 %2904  ;;  %v7030_v17 = vld [vmem:[#allocation3 + $0xe0] sm:$0xff] }
 0x376   : > { %2971 = vst.msk [vmem:[#allocation3 + $0xf0] sm:$0xff] %vm2940_vm7, %v2905_v63  ;;  %v4481_v63 = vld [vmem:[%s7439_s2 + $0x58] sm:$0xf] }
 0x379   : > { %v2851_v40 = vpop.permute.xlu1 %2850  ;;  %v2889_v46 = vpop.permute.xlu0 %2888  ;;  %v7003_v5 = vld [vmem:[#allocation3 + $0xf8] sm:$0xff] }
 0x37a   : > { %2944 = vst.msk [vmem:[#allocation3 + $0x18] sm:$0xff] %vm2940_vm7, %v2851_v40  ;;  %2963 = vst.msk [vmem:[#allocation3 + $0xb0] sm:$0xff] %vm2940_vm7, %v2889_v46  ;;  %4739 = vmatprep.subr.mxu1 %v7003_v5  ;;  %4821 = vmatprep.subr.mxu0 %v7003_v5  ;;  %v4487_v40 = vld [vmem:[%s7439_s2 + $0x70] sm:$0xff]  ;;  %v4490_v46 = vld [vmem:[%s7439_s2 + $0x88] sm:$0xf] }
 0x37b   : > { %4740 = vmatpush3.msra.mxu1 %v7009_v26  ;;  %4822 = vmatpush3.msra.mxu0 %v7009_v26 }
 0x37d   : > { %v2887_v24 = vpop.permute.xlu0 %2886  ;;  %v7013_v3 = vld [vmem:[#allocation3 + $0xf0] sm:$0xff] }
 0x37e   : > { %2962 = vst.msk [vmem:[#allocation3 + $0xa8] sm:$0xff] %vm2940_vm7, %v2887_v24  ;;  %4741 = vmatprep.subr.mxu1 %v7013_v3  ;;  %4823 = vmatprep.subr.mxu0 %v7013_v3  ;;  %v4495_v24 = vld [vmem:[%s7439_s2 + $0x98] sm:$0xff] }
 0x37f   : > { %4742 = vmatpush3.msra.mxu1 %v7018_v42  ;;  %4824 = vmatpush3.msra.mxu0 %v7018_v42 }
 0x380   : > { %4743 = vmatprep.subr.mxu1 %v7022_v45  ;;  %4825 = vmatprep.subr.mxu0 %v7022_v45 }
 0x381   : > { %4744 = vmatpush3.msra.mxu1 %v7026_v4  ;;  %4826 = vmatpush3.msra.mxu0 %v7026_v4  ;;  %v2885_v30 = vpop.permute.xlu0 %2884  ;;  %v7082_v52 = vld [vmem:[#allocation3 + $0xb0] sm:$0xff]  ;;  %v7114_v7 = vld [vmem:[#allocation3 + $0x18] sm:$0xff] }
 0x382   : > { %2961 = vst.msk [vmem:[#allocation3 + $0xa0] sm:$0xff] %vm2940_vm7, %v2885_v30  ;;  %4745 = vmatprep.subr.mxu1 %v7030_v17  ;;  %4827 = vmatprep.subr.mxu0 %v7030_v17 }
 0x383   : > { %4746 = vmatpush3.msra.mxu1 %v7035_v9  ;;  %4828 = vmatpush3.msra.mxu0 %v7035_v9 }
 0x384   : > { %4747 = vmatprep.subr.mxu1 %v7039_v47  ;;  %4829 = vmatprep.subr.mxu0 %v7039_v47 }
 0x385   : > { %v2849_v37 = vpop.permute.xlu1 %2848  ;;  %4748 = vmatpush3.msra.mxu1 %v7043_v56  ;;  %4830 = vmatpush3.msra.mxu0 %v7043_v56  ;;  %v2883_v58 = vpop.permute.xlu0 %2882  ;;  %v7092_v22 = vld [vmem:[#allocation3 + $0xa8] sm:$0xff] }
 0x386   : > { %2943 = vst.msk [vmem:[#allocation3 + $0x10] sm:$0xff] %vm2940_vm7, %v2849_v37  ;;  %2960 = vst.msk [vmem:[#allocation3 + $0x98] sm:$0xff] %vm2940_vm7, %v2883_v58  ;;  %4749 = vmatprep.subr.mxu1 %v7047_v6  ;;  %4831 = vmatprep.subr.mxu0 %v7047_v6 }
 0x387   : > { %4750 = vmatpush3.msra.mxu1 %v7053_v51  ;;  %4832 = vmatpush3.msra.mxu0 %v7053_v51 }
 0x388   : > { %4751 = vmatprep.subr.mxu1 %v7057_v53  ;;  %4833 = vmatprep.subr.mxu0 %v7057_v53 }
 0x389   : > { %4752 = vmatpush3.msra.mxu1 %v7061_v55  ;;  %4834 = vmatpush3.msra.mxu0 %v7061_v55  ;;  %v2881_v35 = vpop.permute.xlu0 %2880  ;;  %v7100_v41 = vld [vmem:[#allocation3 + $0xa0] sm:$0xff] }
 0x38a   : > { %2959 = vst.msk [vmem:[#allocation3 + $0x90] sm:$0xff] %vm2940_vm7, %v2881_v35  ;;  %4753 = vmatprep.subr.mxu1 %v7065_v15  ;;  %4835 = vmatprep.subr.mxu0 %v7065_v15 }
 0x38b   : > { %4754 = vmatpush3.msra.mxu1 %v7070_v11  ;;  %4836 = vmatpush3.msra.mxu0 %v7070_v11 }
 0x38c   : > { %4755 = vmatprep.subr.mxu1 %v7074_v31  ;;  %4837 = vmatprep.subr.mxu0 %v7074_v31 }
 0x38d   : > { %v2847_v14 = vpop.permute.xlu1 %2846  ;;  %4756 = vmatpush3.msra.mxu1 %v7078_v20  ;;  %4838 = vmatpush3.msra.mxu0 %v7078_v20  ;;  %v2879_v23 = vpop.permute.xlu0 %2878  ;;  %v7110_v57 = vld [vmem:[#allocation3 + $0x98] sm:$0xff]  ;;  %v7122_v34 = vld [vmem:[#allocation3 + $0x10] sm:$0xff] }
 0x38e   : > { %2942 = vst.msk [vmem:[#allocation3 + $0x8] sm:$0xff] %vm2940_vm7, %v2847_v14  ;;  %2958 = vst.msk [vmem:[#allocation3 + $0x88] sm:$0xff] %vm2940_vm7, %v2879_v23  ;;  %4757 = vmatprep.subr.mxu1 %v7082_v52  ;;  %4839 = vmatprep.subr.mxu0 %v7082_v52 }
 0x38f   : > { %4758 = vmatpush3.msra.mxu1 %v7088_v21  ;;  %4840 = vmatpush3.msra.mxu0 %v7088_v21 }
 0x390   : > { %4759 = vmatprep.subr.mxu1 %v7092_v22  ;;  %4841 = vmatprep.subr.mxu0 %v7092_v22 }
 0x391   : > { %v2845_v13 = vpop.permute.xlu1 %2844  ;;  %4760 = vmatpush3.msra.mxu1 %v7096_v32  ;;  %4842 = vmatpush3.msra.mxu0 %v7096_v32  ;;  %v2877_v27 = vpop.permute.xlu0 %2876  ;;  %v7118_v10 = vld [vmem:[#allocation3 + $0x90] sm:$0xff] }
 0x392   : > { %2941 = vst.msk [vmem:[#allocation3] sm:$0xff] %vm2940_vm7, %v2845_v13  ;;  %2957 = vst.msk [vmem:[#allocation3 + $0x80] sm:$0xff] %vm2940_vm7, %v2877_v27  ;;  %4761 = vmatprep.subr.mxu1 %v7100_v41  ;;  %4843 = vmatprep.subr.mxu0 %v7100_v41 }
 0x393   : > { %4762 = vmatpush3.msra.mxu1 %v7106_v25  ;;  %4844 = vmatpush3.msra.mxu0 %v7106_v25 }
 0x394   : > { %4763 = vmatprep.subr.mxu1 %v7110_v57  ;;  %4845 = vmatprep.subr.mxu0 %v7110_v57 }
 0x395   : > { %4764 = vmatpush3.msra.mxu1 %v7114_v7  ;;  %4846 = vmatpush3.msra.mxu0 %v7114_v7  ;;  %v7126_v60 = vld [vmem:[#allocation3 + $0x88] sm:$0xff] }
 0x396   : > { %4765 = vmatprep.subr.mxu1 %v7118_v10  ;;  %4847 = vmatprep.subr.mxu0 %v7118_v10  ;;  %v7130_v39 = vld [vmem:[#allocation3 + $0x8] sm:$0xff] }
 0x397   : > { %4766 = vmatpush3.msra.mxu1 %v7122_v34  ;;  %4848 = vmatpush3.msra.mxu0 %v7122_v34 }
 0x398   : > { %4767 = vmatprep.subr.mxu1 %v7126_v60  ;;  %4849 = vmatprep.subr.mxu0 %v7126_v60 }
 0x399   : > { %4768 = vmatpush3.msra.mxu1 %v7130_v39  ;;  %4850 = vmatpush3.msra.mxu0 %v7130_v39  ;;  %v7137_v48 = vld [vmem:[#allocation3 + $0x80] sm:$0xff] }
 0x39a   : > { %v7139_v1 = vld [vmem:[#allocation3] sm:$0xff]  ;;  %4769 = vmatprep.subr.mxu1 %v7137_v48  ;;  %4851 = vmatprep.subr.mxu0 %v7137_v48 }
 0x39b   : > { %4770 = vmatpush3.msra.mxu1 %v7139_v1  ;;  %4852 = vmatpush3.msra.mxu0 %v7139_v1 }
 0x39c   : > { %3087 = vmatmul.mubr.f32.vlgmr.msra.gmra.mxu1 %v3006_v61  ;;  %5296 = vmatprep.subr.msk.mxu1 %vm427_vm2, %v7141_v62 }
 0x39d   : > { %3425 = vmatmul.mubr.f32.vlgmr.msra.gmra.mxu0 %v4485_v44  ;;  %5311 = vmatprep.subr.msk.mxu0 %vm427_vm2, %v7141_v62 }
 0x39e   : > { %5297 = vmatpush3.msk.msra.mxu1 %vm427_vm2, %v7141_v62  ;;  %5312 = vmatpush3.msk.msra.mxu0 %vm427_vm2, %v7141_v62 }
 0x39f   : > { %4780 = vmatprep.subr.mxu1 %v7003_v5  ;;  %4903 = vmatprep.subr.mxu0 %v7003_v5 }
 0x3a0   : > { %3091 = vmatprep.mubr.f32.mxu1 %v3010_v29  ;;  %3429 = vmatprep.mubr.f32.mxu0 %v4489_v54 }
 0x3a1   : > { %3092 = vmatmul.mubr.f32.gmra.mxu1 %v3009_v2  ;;  %3430 = vmatmul.mubr.f32.gmra.mxu0 %v4488_v8 }
 0x3a2   : > { %5298 = vmatprep.mubr.msk.f32.mxu1 %vm3012_vm8, %v3008_v50  ;;  %5313 = vmatprep.mubr.msk.f32.mxu0 %vm3012_vm8, %v4496_v36 }
 0x3a5   : > { %5299 = vmatmul.mubr.msk.f32.vlgmr.msra.gmra.mxu1 %vm3012_vm8, %v3011_v18  ;;  %5314 = vmatmul.mubr.msk.f32.vlgmr.msra.gmra.mxu0 %vm3012_vm8, %v4499_v28 }
 0x3a6   : > { %4781 = vmatpush3.msra.mxu1 %v7009_v26  ;;  %4904 = vmatpush3.msra.mxu0 %v7009_v26 }
 0x3a7   : > { %4782 = vmatprep.subr.mxu1 %v7013_v3  ;;  %4905 = vmatprep.subr.mxu0 %v7013_v3 }
 0x3a8   : > { %4783 = vmatpush3.msra.mxu1 %v7018_v42  ;;  %4906 = vmatpush3.msra.mxu0 %v7018_v42 }
 0x3a9   : > { %4784 = vmatprep.subr.mxu1 %v7022_v45  ;;  %4907 = vmatprep.subr.mxu0 %v7022_v45 }
 0x3aa   : > { %4785 = vmatpush3.msra.mxu1 %v7026_v4  ;;  %4908 = vmatpush3.msra.mxu0 %v7026_v4 }
 0x3ab   : > { %4786 = vmatprep.subr.mxu1 %v7030_v17  ;;  %4909 = vmatprep.subr.mxu0 %v7030_v17 }
 0x3ac   : > { %4787 = vmatpush3.msra.mxu1 %v7035_v9  ;;  %4910 = vmatpush3.msra.mxu0 %v7035_v9 }
 0x3ad   : > { %4788 = vmatprep.subr.mxu1 %v7039_v47  ;;  %4911 = vmatprep.subr.mxu0 %v7039_v47 }
 0x3ae   : > { %4789 = vmatpush3.msra.mxu1 %v7043_v56  ;;  %4912 = vmatpush3.msra.mxu0 %v7043_v56 }
 0x3af   : > { %4790 = vmatprep.subr.mxu1 %v7047_v6  ;;  %4913 = vmatprep.subr.mxu0 %v7047_v6 }
 0x3b0   : > { %4791 = vmatpush3.msra.mxu1 %v7053_v51  ;;  %4914 = vmatpush3.msra.mxu0 %v7053_v51 }
 0x3b1   : > { %4792 = vmatprep.subr.mxu1 %v7057_v53  ;;  %4915 = vmatprep.subr.mxu0 %v7057_v53 }
 0x3b2   : > { %4793 = vmatpush3.msra.mxu1 %v7061_v55  ;;  %4916 = vmatpush3.msra.mxu0 %v7061_v55 }
 0x3b3   : > { %4794 = vmatprep.subr.mxu1 %v7065_v15  ;;  %4917 = vmatprep.subr.mxu0 %v7065_v15 }
 0x3b4   : > { %4795 = vmatpush3.msra.mxu1 %v7070_v11  ;;  %4918 = vmatpush3.msra.mxu0 %v7070_v11 }
 0x3b5   : > { %4796 = vmatprep.subr.mxu1 %v7074_v31  ;;  %4919 = vmatprep.subr.mxu0 %v7074_v31 }
 0x3b6   : > { %4797 = vmatpush3.msra.mxu1 %v7078_v20  ;;  %4920 = vmatpush3.msra.mxu0 %v7078_v20 }
 0x3b7   : > { %4798 = vmatprep.subr.mxu1 %v7082_v52  ;;  %4921 = vmatprep.subr.mxu0 %v7082_v52 }
 0x3b8   : > { %4799 = vmatpush3.msra.mxu1 %v7088_v21  ;;  %4922 = vmatpush3.msra.mxu0 %v7088_v21 }
 0x3b9   : > { %4800 = vmatprep.subr.mxu1 %v7092_v22  ;;  %4923 = vmatprep.subr.mxu0 %v7092_v22 }
 0x3ba   : > { %4801 = vmatpush3.msra.mxu1 %v7096_v32  ;;  %4924 = vmatpush3.msra.mxu0 %v7096_v32 }
 0x3bb   : > { %4802 = vmatprep.subr.mxu1 %v7100_v41  ;;  %4925 = vmatprep.subr.mxu0 %v7100_v41 }
 0x3bc   : > { %4803 = vmatpush3.msra.mxu1 %v7106_v25  ;;  %4926 = vmatpush3.msra.mxu0 %v7106_v25 }
 0x3bd   : > { %4804 = vmatprep.subr.mxu1 %v7110_v57  ;;  %4927 = vmatprep.subr.mxu0 %v7110_v57 }
 0x3be   : > { %4805 = vmatpush3.msra.mxu1 %v7114_v7  ;;  %4928 = vmatpush3.msra.mxu0 %v7114_v7 }
 0x3bf   : > { %4806 = vmatprep.subr.mxu1 %v7118_v10  ;;  %4929 = vmatprep.subr.mxu0 %v7118_v10 }
 0x3c0   : > { %4807 = vmatpush3.msra.mxu1 %v7122_v34  ;;  %4930 = vmatpush3.msra.mxu0 %v7122_v34 }
 0x3c1   : > { %4808 = vmatprep.subr.mxu1 %v7126_v60  ;;  %4931 = vmatprep.subr.mxu0 %v7126_v60 }
 0x3c2   : > { %4809 = vmatpush3.msra.mxu1 %v7130_v39  ;;  %4932 = vmatpush3.msra.mxu0 %v7130_v39 }
 0x3c3   : > { %4810 = vmatprep.subr.mxu1 %v7137_v48  ;;  %4933 = vmatprep.subr.mxu0 %v7137_v48 }
 0x3c4   : > { %4811 = vmatpush3.msra.mxu1 %v7139_v1  ;;  %3251 = vmatprep.mubr.f32.mxu1 %v4477_v49 }
 0x3c5   : > { %4934 = vmatpush3.msra.mxu0 %v7139_v1  ;;  %3252 = vmatmul.mubr.f32.vlgmr.msra.gmra.mxu1 %v4476_v16 }
 0x3c6   : > { %3256 = vmatprep.mubr.f32.mxu1 %v4480_v19  ;;  %5301 = vmatprep.subr.msk.mxu1 %vm427_vm2, %v7141_v62 }
 0x3c7   : > { %5302 = vmatpush3.msk.msra.mxu1 %vm427_vm2, %v7141_v62  ;;  %3770 = vmatprep.mubr.f32.mxu0 %v4504_v12 }
 0x3c8   : > { %5306 = vmatprep.subr.msk.mxu1 %vm427_vm2, %v7141_v62  ;;  %3771 = vmatmul.mubr.f32.vlgmr.msra.gmra.mxu0 %v4503_v0  ;;  %v3878_v0 = vld [vmem:[%s7440_s3] sm:$0xff] }
 0x3c9   : > { %3257 = vmatmul.mubr.f32.gmra.mxu1 %v4479_v38  ;;  %3775 = vmatprep.mubr.f32.mxu0 %v4507_v59 }
 0x3ca   : > { %5303 = vmatprep.mubr.msk.f32.mxu1 %vm3012_vm8, %v4478_v43 }
 0x3cc   : > { %3776 = vmatmul.mubr.f32.gmra.mxu0 %v4506_v33 }
 0x3cd   : > { %5304 = vmatmul.mubr.msk.f32.vlgmr.msra.gmra.mxu1 %vm3012_vm8, %v4481_v63 }
 0x3ce   : > { %5307 = vmatpush3.msk.msra.mxu1 %vm427_vm2, %v7141_v62  ;;  %5308 = vmatprep.mubr.msk.f32.mxu1 %vm3012_vm8, %v4487_v40 }
 0x3cf   : > { %4862 = vmatprep.subr.mxu1 %v7003_v5  ;;  %v4494_v5 = vld [vmem:[%s7439_s2 + $0x90] sm:$0xff] }
 0x3d1   : > { %5309 = vmatmul.mubr.msk.f32.vlgmr.msra.gmra.mxu1 %vm3012_vm8, %v4490_v46 }
 0x3d2   : > { %4863 = vmatpush3.msra.mxu1 %v7009_v26  ;;  %3597 = vmatprep.mubr.f32.mxu1 %v4495_v24  ;;  %v4498_v26 = vld [vmem:[%s7439_s2 + $0xb0] sm:$0xf] }
 0x3d3   : > { %4864 = vmatprep.subr.mxu1 %v7013_v3  ;;  %v4497_v3 = vld [vmem:[%s7439_s2 + $0xa8] sm:$0xf] }
 0x3d4   : > { %4865 = vmatpush3.msra.mxu1 %v7018_v42  ;;  %v4505_v42 = vld [vmem:[%s7439_s2 + $0xd0] sm:$0xff] }
 0x3d5   : > { %4866 = vmatprep.subr.mxu1 %v7022_v45  ;;  %v4508_v45 = vld [vmem:[%s7439_s2 + $0xe8] sm:$0xf] }
 0x3d6   : > { %4867 = vmatpush3.msra.mxu1 %v7026_v4 }
 0x3d7   : > { %4868 = vmatprep.subr.mxu1 %v7030_v17 }
 0x3d8   : > { %4869 = vmatpush3.msra.mxu1 %v7035_v9 }
 0x3d9   : > { %4870 = vmatprep.subr.mxu1 %v7039_v47 }
 0x3da   : > { %4871 = vmatpush3.msra.mxu1 %v7043_v56 }
 0x3db   : > { %4872 = vmatprep.subr.mxu1 %v7047_v6 }
 0x3dc   : > { %4873 = vmatpush3.msra.mxu1 %v7053_v51 }
 0x3dd   : > { %4874 = vmatprep.subr.mxu1 %v7057_v53 }
 0x3de   : > { %4875 = vmatpush3.msra.mxu1 %v7061_v55 }
 0x3df   : > { %4876 = vmatprep.subr.mxu1 %v7065_v15 }
 0x3e0   : > { %4877 = vmatpush3.msra.mxu1 %v7070_v11 }
 0x3e1   : > { %4878 = vmatprep.subr.mxu1 %v7074_v31 }
 0x3e2   : > { %4879 = vmatpush3.msra.mxu1 %v7078_v20 }
 0x3e3   : > { %4880 = vmatprep.subr.mxu1 %v7082_v52 }
 0x3e4   : > { %4881 = vmatpush3.msra.mxu1 %v7088_v21 }
 0x3e5   : > { %4882 = vmatprep.subr.mxu1 %v7092_v22 }
 0x3e6   : > { %4883 = vmatpush3.msra.mxu1 %v7096_v32 }
 0x3e7   : > { %4884 = vmatprep.subr.mxu1 %v7100_v41 }
 0x3e8   : > { %4885 = vmatpush3.msra.mxu1 %v7106_v25 }
 0x3e9   : > { %4886 = vmatprep.subr.mxu1 %v7110_v57 }
 0x3ea   : > { %4887 = vmatpush3.msra.mxu1 %v7114_v7 }
 0x3eb   : > { %4888 = vmatprep.subr.mxu1 %v7118_v10 }
 0x3ec   : > { %4889 = vmatpush3.msra.mxu1 %v7122_v34 }
 0x3ed   : > { %4890 = vmatprep.subr.mxu1 %v7126_v60 }
 0x3ee   : > { %4891 = vmatpush3.msra.mxu1 %v7130_v39 }
 0x3ef   : > { %4892 = vmatprep.subr.mxu1 %v7137_v48 }
 0x3f0   : > { %4893 = vmatpush3.msra.mxu1 %v7139_v1 }
 0x3f1   : > { %3598 = vmatmul.mubr.f32.vlgmr.msra.gmra.mxu1 %v4494_v5  ;;  %5316 = vmatprep.subr.msk.mxu1 %vm427_vm2, %v7141_v62 }
 0x3f2   : > { %3602 = vmatprep.mubr.f32.mxu1 %v4498_v26  ;;  %5317 = vmatpush3.msk.msra.mxu1 %vm427_vm2, %v7141_v62 }
 0x3f5   : > { %3603 = vmatmul.mubr.f32.gmra.mxu1 %v4497_v3 }
 0x3f6   : > { %5318 = vmatprep.mubr.msk.f32.mxu1 %vm3012_vm8, %v4505_v42 }
 0x3f9   : > { %5319 = vmatmul.mubr.msk.f32.vlgmr.msra.gmra.mxu1 %vm3012_vm8, %v4508_v45 }
 0x3fa   : > { %5325 = vmatprep.mubr.msk.f32.mxu1 %vm3882_vm9, %v3878_v0 }
 0x45c   : > { %v4771_v4 = vpop.f32.mrf.mxu1 }
 0x45d   : > { %v4853_v53 = vpop.f32.mrf.mxu0 }
 0x45e   : > { %v4772_v30 = vpop.f32.mrf.mxu1 }
 0x45f   : > { %v4773_v17 = vadd.f32 %v4772_v30, %v4771_v4  ;;  %v4854_v55 = vpop.f32.mrf.mxu0 }
 0x460   : > { %v4855_v25 = vadd.f32 %v4854_v55, %v4853_v53 }
 0x461   : > { %v4774_v9 = vpop.f32.mrf.mxu1  ;;  %v4856_v11 = vpop.f32.mrf.mxu0 }
 0x463   : > { %v4775_v47 = vpop.f32.mrf.mxu1  ;;  %v4857_v14 = vpop.f32.mrf.mxu0 }
 0x464   : > { %v4776_v56 = vadd.f32 %v4775_v47, %v4774_v9  ;;  %v4858_v32 = vadd.f32 %v4857_v14, %v4856_v11  ;;  %v3880_v11 = vld [vmem:[%s7440_s3 + $0x10] sm:$0xff]  ;;  %v3984_v14 = vld [vmem:[%s7441_s4] sm:$0xff] }
 0x465   : > { %v5300_v37 = vpop.f32.mrf.mxu1  ;;  %v5315_v34 = vpop.f32.mrf.mxu0 }
 0x466   : > { %v3169_v58 = vadd.f32 %v5300_v37, %v4776_v56 }
 0x467   : > { %v3163_v6 = vpop.f32.mrf.mxu1  ;;  %v3674_v60 = vpop.f32.mrf.mxu0 }
 0x468   : > { %v3164_v51 = vadd.f32 %v4773_v17, %v3163_v6 }
 0x485   : > { %v4812_v35 = vpop.f32.mrf.mxu1 }
 0x487   : > { %v4813_v15 = vpop.f32.mrf.mxu1 }
 0x488   : > { %v4814_v21 = vadd.f32 %v4813_v15, %v4812_v35  ;;  %v4935_v39 = vpop.f32.mrf.mxu0  ;;  %v3879_v15 = vld [vmem:[%s7440_s3 + $0x8] sm:$0xff] }
 0x489   : > { %v4815_v31 = vpop.f32.mrf.mxu1 }
 0x48a   : > { %v4936_v61 = vpop.f32.mrf.mxu0 }
 0x48b   : > { %v4816_v20 = vpop.f32.mrf.mxu1  ;;  %v4937_v28 = vadd.f32 %v4936_v61, %v4935_v39 }
 0x48c   : > { %v4817_v23 = vadd.f32 %v4816_v20, %v4815_v31  ;;  %v4938_v62 = vpop.f32.mrf.mxu0  ;;  %v3881_v31 = vld [vmem:[%s7440_s3 + $0x18] sm:$0xff]  ;;  %v3985_v20 = vld [vmem:[%s7441_s4 + $0x8] sm:$0xf] }
 0x48d   : > { %v5305_v52 = vpop.f32.mrf.mxu1 }
 0x48e   : > { %v3334_v22 = vadd.f32 %v5305_v52, %v4817_v23  ;;  %v4939_v8 = vpop.f32.mrf.mxu0 }
 0x48f   : > { %v3328_v13 = vpop.f32.mrf.mxu1  ;;  %v4940_v49 = vadd.f32 %v4939_v8, %v4938_v62 }
 0x490   : > { %v3329_v27 = vadd.f32 %v4814_v21, %v3328_v13  ;;  %3341 = vrot.lane.b32.xlu0 %v3334_v22, %s5462_s14 }
 0x491   : > { %v5310_v41 = vpop.f32.mrf.mxu1 }
 0x492   : > { %v3507_v57 = vadd.f32 %v5310_v41, %v4858_v32  ;;  %3339 = vrot.lane.b32.xlu1 %v3329_v27, %s5462_s14  ;;  %s4528_s14 = sshll.u32 %s5520_s22, 9  ;;  %s5466_s22 = smov [#allocation4]  }
 0x493   : > { %v3501_v7 = vpop.f32.mrf.mxu1  ;;  %s5401_s6 = sshll.u32 %s5466_s22, 4  ;;  %s5402_s6 = int_to_ptr.vmem [resolvable:$false] %s5401_s6 }
 0x494   : > { %v3502_v10 = vadd.f32 %v4855_v25, %v3501_v7  ;;  %3514 = vrot.lane.b32.xlu0 %v3507_v57, %s5463_s17  ;;  %s5403_s7 = scalar_lea.vmem %s5402_s6, 1024  ;;  %p5404_p0 = scmp.lt.s32.totalorder %s7390_s16, %s5402_s6 }
 0x495   : > { %p5405_p1 = scmp.lt.s32.totalorder %s5403_s7, %s5397_s30 }
 0x496   : > { %3512 = vrot.lane.b32.xlu1 %v3502_v10, %s5463_s17 }
 0x497   : > { %p5406_p2 = por %p5405_p1, %p5404_p0 }
 0x499   : > { %p5407_p3 = pnand %p5406_p2, %p5400_p13 }
 0x4b1   : > { %v4894_v48 = vpop.f32.mrf.mxu1 }
 0x4b3   : > { %v4895_v1 = vpop.f32.mrf.mxu1 }
 0x4b4   : > { %v4896_v44 = vadd.f32 %v4895_v1, %v4894_v48 }
 0x4b5   : > { %v4897_v29 = vpop.f32.mrf.mxu1 }
 0x4b6   : > { %v3675_v54 = vadd.f32 %v4896_v44, %v3674_v60 }
 0x4b7   : > { %v4898_v2 = vpop.f32.mrf.mxu1 }
 0x4b8   : > { %v4899_v50 = vadd.f32 %v4898_v2, %v4897_v29  ;;  %3685 = vrot.lane.b32.xlu1 %v3675_v54, %s5464_s23 }
 0x4b9   : > { %v5320_v36 = vpop.f32.mrf.mxu1 }
 0x4ba   : > { %v3680_v18 = vadd.f32 %v5315_v34, %v4899_v50  ;;  %v3853_v12 = vadd.f32 %v5320_v36, %v4940_v49 }
 0x4bb   : > { %v3847_v16 = vpop.f32.mrf.mxu1 }
 0x4bc   : > { %v3848_v19 = vadd.f32 %v4937_v28, %v3847_v16  ;;  %3687 = vrot.lane.b32.xlu0 %v3680_v18, %s5464_s23 }
 0x4be   : > { %3858 = vrot.lane.b32.xlu1 %v3848_v19, %s5465_s25 }
 0x4c0   : > { %3860 = vrot.lane.b32.xlu0 %v3853_v12, %s5465_s25  ;;  %s7395_s25 = scalar_lea.hbm %s7442_s5, %s4528_s14 }
 0x502   : > { %v3342_v59 = vpop.permute.xlu0 %3341 }
 0x503   : > { %v3346_v46 = vadd.f32 %v3342_v59, %v3169_v58 }
 0x504   : > { %v3340_v38 = vpop.permute.xlu1 %3339 }
 0x505   : > { %v3345_v63 = vadd.f32 %v3340_v38, %v3164_v51 }
 0x506   : > { %v3515_v33 = vpop.permute.xlu0 %3514 }
 0x507   : > { %v3519_v26 = vadd.f32 %v3515_v33, %v3346_v46 }
 0x508   : > { %v3513_v43 = vpop.permute.xlu1 %3512 }
 0x509   : > { %v3518_v24 = vadd.f32 %v3513_v43, %v3345_v63 }
 0x52a   : > { %v3686_v40 = vpop.permute.xlu1 %3685 }
 0x52b   : > { %v3691_v3 = vadd.f32 %v3686_v40, %v3518_v24 }
 0x52e   : > { %v3688_v5 = vpop.permute.xlu0 %3687 }
 0x52f   : > { %v3692_v45 = vadd.f32 %v3688_v5, %v3519_v26 }
 0x530   : > { %v3859_v42 = vpop.permute.xlu1 %3858 }
 0x531   : > { %v3864_v4 = vadd.f32 %v3859_v42, %v3691_v3 }
 0x532   : > { %v3861_v30 = vpop.permute.xlu0 %3860 }
 0x533   : > { %v3866_v17 = vsub.f32 0.0, %v3864_v4  ;;  %v3865_v9 = vadd.f32 %v3861_v30, %v3692_v45 }
 0x535   : > { %v3868_v47 = vmul.f32 1.442695, %v3866_v17  ;;  %v3867_v56 = vsub.f32 0.0, %v3865_v9 }
 0x537   : > { %5389 = vpow2.f32 %v3868_v47  ;;  %v3870_v37 = vmul.f32 1.442695, %v3867_v56 }
 0x539   : > { %5391 = vpow2.f32 %v3870_v37 }
 0x544   : > { %v5390_v6 = vpop.eup %5389 }
 0x545   : > { %v3872_v51 = vadd.f32 1.0, %v5390_v6 }
 0x546   : > { %v5392_v53 = vpop.eup %5391 }
 0x547   : > { %v3873_v55 = vadd.f32 1.0, %v5392_v53 }
 0x549   : > { %5393 = vrcp.f32 %v3873_v55 }
 0x54a   : > { %5395 = vrcp.f32 %v3872_v51 }
 0x556   : > { %v5394_v58 = vpop.eup %5393 }
 0x557   : > { %5321 = vmatprep.subr.msk.mxu1 %vm3895_vm10, %v5394_v58  ;;  %v5396_v35 = vpop.eup %5395 }
 0x558   : > { %5322 = vmatpush3.msk.msra.mxu1 %vm3895_vm10, %v5394_v58 }
 0x559   : > { %5323 = vmatprep.subr.mxu1 %v5396_v35 }
 0x55a   : > { %5324 = vmatpush3.msra.mxu1 %v5396_v35 }
 0x55b   : > { %5326 = vmatmul.mubr.msk.f32.vlgmr.msra.gmra.mxu1 %vm3882_vm9, %v3879_v15  ;;  %5331 = vmatprep.subr.msk.mxu1 %vm3895_vm10, %v3985_v20 }
 0x55c   : > { %5328 = vmatprep.mubr.msk.f32.mxu1 %vm3882_vm9, %v3880_v11  ;;  %5332 = vmatpush3.msk.msra.mxu1 %vm3895_vm10, %v3985_v20 }
 0x55d   : > { %5333 = vmatprep.subr.mxu1 %v3984_v14 }
 0x55e   : > { %5334 = vmatpush3.msra.mxu1 %v3984_v14 }
 0x55f   : > { %5329 = vmatmul.mubr.msk.f32.gmra.mxu1 %vm3882_vm9, %v3881_v31 }
 0x61b   : > { %v5327_v23 = vpop.f32.mrf.mxu1 }
 0x61d   : > { %v3965_v52 = vpop.f32.mrf.mxu1 }
 0x61e   : > { %5335 = vmatprep.mubr.msk.f32.mxu1 %vm3882_vm9, %v3965_v52 }
 0x61f   : > { %v5330_v21 = vpop.f32.mrf.mxu1  ;;  %5336 = vmatmul.mubr.msk.f32.vlgmr.msra.gmra.mxu1 %vm3882_vm9, %v5327_v23 }
 0x621   : > { %v3975_v22 = vpop.f32.mrf.mxu1 }
 0x622   : > { %5338 = vmatprep.mubr.msk.f32.mxu1 %vm3882_vm9, %v3975_v22 }
 0x623   : > { %5339 = vmatmul.mubr.msk.f32.gmra.mxu1 %vm3882_vm9, %v5330_v21 }
 0x6df   : > { %v5337_v32 = vpop.f32.mrf.mxu1 }
 0x6e0   : > { %4088 = vst.msk [vmem:[%s217_s15 + $0x8] sm:$0xff] %vm4086_vm11, %v5337_v32 }
 0x6e1   : > { %v4067_v13 = vpop.f32.mrf.mxu1 }
 0x6e2   : > { %4087 = vst.msk [vmem:[%s217_s15] sm:$0xff] %vm4086_vm11, %v4067_v13 }
 0x6e3   : > { %v5340_v27 = vpop.f32.mrf.mxu1 }
 0x6e4   : > { %4090 = vst.msk [vmem:[%s217_s15 + $0x18] sm:$0xff] %vm4086_vm11, %v5340_v27 }
 0x6e5   : > { %v4077_v41 = vpop.f32.mrf.mxu1 }
 0x6e6   : > { %4089 = vst.msk [vmem:[%s217_s15 + $0x10] sm:$0xff] %vm4086_vm11, %v4077_v41 }
 0x6e7   : > { %5410 = shalt.err (!%p5407_p3)
}
 0x6e8   : > { %s5411_s10 = scalar_lea.hbm %s7395_s25, 512  ;;  %s5415_s11 = scalar_lea.hbm %s7442_s5, 1024 }
 0x6e9   : > { %p5412_p4 = scmp.ne.s32.totalorder %s7395_s25, %s5411_s10  ;;  %p5416_p9 = scmp.lt.s32.totalorder %s7395_s25, %s7442_s5 }
 0x6ea   : > { %p5417_p10 = scmp.lt.s32.totalorder %s5415_s11, %s5411_s10 }
 0x6eb   : > { %p5413_p7 = pnand %p5412_p4, %p5537_p5 }
 0x6ec   : > { %p5418_p11 = por %p5417_p10, %p5416_p9 }
 0x6ed   : > { %p5414_p8 = pneg %p5413_p7 }
 0x6ef   : > { %p5419_p12 = pnand %p5418_p11, %p5414_p8 }
 0x6f1   : > { %5422 = shalt.err (!%p5419_p12)
}
 0x6f2   : > { %s5467_s15 = smov 128   ;;  %s5468_s14 = smov 8  }
 0x6f3   : > { %5341 = dma.vmem_to_hbm [thread:$0]  (%p5537_p5), %s7390_s16, 512, %s7395_s25, %s7397_s26, %s5467_s15, %s5467_s15, %s5468_s14  }
 0x6f4 PF: > { %p5347_p13 = scmp.ge.s32.totalorder %s5457_s21, 2  ;;  %s4120_s17 = sand.u32 1, %s5445_s18  }
 0x6f5   : > { %s4121_s23 = scalar_lea.sflag [#allocation5], %s4120_s17 }
 0x6f6   : > { %p5344_p0 = pnand %p5347_p13, %p5541_p6 }
 0x6f8   : > { %p5345_p1 = pneg %p5344_p0 }
 0x6fa   : > { %5440 = dma.done.wait (%p5345_p1), %s4121_s23, 512  }
 0x6fb   : > { %5442 = vsyncadd (%p5345_p1), %s4121_s23, 4294966784  ;;  %p15_p2 = scmp.ge.s32.totalorder %s5524_s24, 4   ;;  %s7564_s18 = smov %s5449_s19 }
 0x6fc   : > { %s7565_s19 = smov %s5453_s20  ;;  %s7566_s20 = smov %s5535_s27 }
 0x6fd   : > { %s7567_s21 = smov %s5524_s24  ;;  %17 = sbr.rel (!%p15_p2) target bundleno = 3 (0x3), region = 86 }
 0x702   :  { %4126 = vsyncpa [#allocation5], 1 }
 0x703   :  { %4128 = vsyncpa [#allocation5 + $0x1], 1 }

</bundles_post_ra>
